<compile_context>
chip_gen: v5e
topology: v5e:2x2
jax: 0.10.0
libtpu: 0.0.40
codegen_flags: <defaults>
</compile_context>

<pallas_src>
import jax
import jax.numpy as jnp
from jax.experimental import pallas as pl
from jax.experimental.pallas import tpu as pltpu


def wafercaps_kernel(x_ref, w_ref, o_ref, u_ref):
    # x_ref: (TB, I, R)          one batch tile, streamed per grid step
    # w_ref: (I, C, O, R)        resident weight (constant index_map)
    # o_ref: (1, B*C*O)          lane-dense output slab (written in last step)
    # u_ref: (B, C, O, R) VMEM scratch, persistent across grid steps
    TB, I, R = x_ref.shape
    _, C, O, _ = w_ref.shape
    B = u_ref.shape[0]

    bt = pl.program_id(0)
    nb = pl.num_programs(0)

    # ---- Phase 1 (every grid step): build this batch tile's u_hat -----------
    x_t = x_ref[...]                                            # (TB, I, R)
    for tb in range(TB):
        row = bt * TB + tb
        xv = x_t[tb]                                            # (I, R)
        x_rows = [xv[i:i + 1, :] for i in range(I)]             # I x (1, R)
        for c in range(C):
            # Fused I-term FMA chain: the (O, R) chunk (a few vregs) stays in
            # registers until the single store below (no VMEM round trips).
            acc = w_ref[0, c] * x_rows[0]
            for i in range(1, I):
                acc = acc + w_ref[i, c] * x_rows[i]
            u_ref[row, c] = acc                                 # one store per chunk

    # ---- Phase 2 (last grid step only): batch-global dynamic routing --------
    # b_ij / c_ij are shared across the whole batch (torch semantics), so routing
    # must see all batch tiles; it runs once here on the resident u_hat scratch.
    @pl.when(bt == nb - 1)
    def _routing():
        num_iterations = 3
        b_ij = jnp.zeros((C, R), dtype=jnp.float32)             # routes on lane axis
        for it in range(num_iterations):
            # softmax over routes (torch: softmax(b_ij, dim=1) on (1,R,C,1))
            m = jnp.max(b_ij, axis=-1, keepdims=True)
            e = jnp.exp(b_ij - m)
            denom = jnp.sum(e, axis=-1, keepdims=True)
            inv = pl.reciprocal(denom, approx=True)             # EUP slot
            inv = inv * (2.0 - denom * inv)                     # Newton -> f32 accuracy
            c_ij = e * inv                                      # (C, R)

            agree = jnp.zeros((C, R), dtype=jnp.float32)
            v_rows = []
            # Chunked per batch row: only a (C, O, R) product temp is live at a
            # time (never a full (B, C, O, R) temporary).
            # TODO(synk): at production (B=128) convert this static loop to a
            # lax.fori_loop over batch tiles to bound code size / live ranges, and
            # on v7x split it across the 2 TensorCores with a CMEM/VMEM_SHARED
            # reduction of the tiny (C, R) agreement partial + core barrier.
            for b in range(B):
                u_b = u_ref[b]                                          # (C, O, R)
                s = jnp.sum(c_ij[:, None, :] * u_b, axis=-1)            # (C, O)
                # squash over a size-1 trailing dim is element-wise:
                #   sq*s/((1+sq)*sqrt(sq)) == s*|s|/(1+sq)  (s==0 -> 0, not NaN)
                v = s * jnp.abs(s) / (1.0 + s * s)                      # (C, O)
                if it == num_iterations - 1:
                    v_rows.append(v)
                else:
                    # agreement a[b,c,r] = sum_o u_hat[b,c,o,r] * v[b,c,o]
                    agree = agree + jnp.sum(u_b * v[:, :, None], axis=1)
            if it < num_iterations - 1:
                b_ij = b_ij + agree * (1.0 / B)                 # batch MEAN (global)

        # Lane-dense epilogue: one unmasked full-width store of (1, B*C*O).
        v_all = jnp.stack(v_rows, axis=0)                       # (B, C, O)
        o_ref[...] = v_all.reshape(1, B * C * O)


def prepare_wafercaps_weight(W, dtype=jnp.float32):
    """(1, R, C, O, I) parameter -> (I, C, O, R) kernel layout.  Call ONCE at init.
    dtype=jnp.bfloat16 halves W's HBM/VMEM footprint (useful at production shapes on
    v5e bandwidth / v7x VMEM); keep float32 when validating against 1e-4 tolerance."""
    return jnp.transpose(W[0], (3, 1, 2, 0)).astype(dtype)


def _pick_batch_tile(B):
    # Largest divisor of B that still leaves >= 2 grid steps (so the x DMA actually
    # pipelines against compute), capped at 8 rows per tile.
    for tb in range(min(8, B // 2), 0, -1):
        if B % tb == 0:
            return tb
    return 1  # B == 1


def wafercaps_forward(x, w_t, *, batch_tile=None):
    """x: (B, R, I) float32; w_t: (I, C, O, R) pre-transposed weight.
    Returns (B, C, O, 1), matching the torch module's v_j.squeeze(1)."""
    B, R, I = x.shape
    _, C, O, _ = w_t.shape
    TB = batch_tile if batch_tile is not None else _pick_batch_tile(B)
    assert B % TB == 0
    NB = B // TB

    # Only x is transposed per call (routes -> lane axis); the W transpose is hoisted.
    x_t = jnp.transpose(x, (0, 2, 1))                           # (B, I, R)

    # Explicit VMEM budget (review item): double-buffered x tiles + resident W +
    # whole-batch u_hat scratch + output slab, with headroom for compiler temps.
    w_itemsize = jnp.dtype(w_t.dtype).itemsize
    resident = (2 * TB * I * R * 4                  # x tile, double-buffered
                + 2 * I * C * O * R * w_itemsize    # W (constant index map)
                + B * C * O * R * 4                 # u_hat scratch
                + B * C * O * 4)                    # output slab
    vmem_limit = int(min(max(2 * resident + 8 * 2**20, 16 * 2**20), 64 * 2**20))

    out = pl.pallas_call(
        wafercaps_kernel,
        out_shape=jax.ShapeDtypeStruct((1, B * C * O), jnp.float32),
        grid_spec=pltpu.PrefetchScalarGridSpec(
            num_scalar_prefetch=0,
            grid=(NB,),
            in_specs=[
                # x streams one batch tile per grid step (pipelined DMA).
                pl.BlockSpec((TB, I, R), lambda b: (b, 0, 0)),
                # W: constant index map -> DMA'd once, stays resident in VMEM.
                pl.BlockSpec((I, C, O, R), lambda b: (0, 0, 0, 0)),
            ],
            out_specs=pl.BlockSpec((1, B * C * O), lambda b: (0, 0)),
            scratch_shapes=[
                # Whole-batch u_hat kept resident across grid steps so the
                # batch-coupled routing never recomputes or re-DMAs it.
                # TODO(synk): at production on v7x (64 MiB VMEM) consider a bf16
                # u_hat scratch if the accuracy budget allows; keep f32 on v6e.
                pltpu.VMEM((B, C, O, R), jnp.float32),
            ],
        ),
        compiler_params=pltpu.CompilerParams(
            # Sequential grid: the scratch accumulates across steps and the
            # batch-global routing runs in the last step.  A "parallel" B axis
            # would break the shared b_ij semantics (review correctness item).
            dimension_semantics=("arbitrary",),
            vmem_limit_bytes=vmem_limit,
        ),
    )(x_t, w_t)
    return out.reshape(B, C, O, 1)


def wafercaps_ref(x, W):
    """Pure-JAX transcription of the torch forward, for validation."""
    u_hat = jnp.einsum("rcoi,bri->brco", W[0], x)               # (B, R, C, O)
    R, C = W.shape[1], W.shape[2]
    b_ij = jnp.zeros((R, C), jnp.float32)
    v_j = None
    for it in range(3):
        c_ij = jax.nn.softmax(b_ij, axis=0)                     # over routes
        s_j = jnp.einsum("rc,brco->bco", c_ij, u_hat)
        sq = s_j * s_j
        v_j = sq * s_j / ((1.0 + sq) * jnp.sqrt(sq))
        if it < 2:
            a = jnp.einsum("brco,bco->brc", u_hat, v_j)
            b_ij = b_ij + jnp.mean(a, axis=0)
    return v_j[..., None]                                       # (B, C, O, 1)


if __name__ == "__main__":
    # Small shapes consistent with the module's forward.
    B, num_routes, num_capsules, in_channels, out_channels = 2, 128, 4, 8, 16

    key = jax.random.PRNGKey(0)
    kx, kw = jax.random.split(key)
    x = jax.random.normal(kx, (B, num_routes, in_channels), dtype=jnp.float32)
    # Deterministic stand-in for nn.Parameter(torch.randn(...)).
    W = jax.random.normal(
        kw, (1, num_routes, num_capsules, out_channels, in_channels), dtype=jnp.float32)

    w_t = prepare_wafercaps_weight(W)        # one-time weight layout prep (hoisted)
    fwd = jax.jit(wafercaps_forward)

    out = jax.block_until_ready(fwd(x, w_t))
    ref = jax.block_until_ready(wafercaps_ref(x, W))

    assert out.shape == (B, num_capsules, out_channels, 1), out.shape
    assert jnp.allclose(out, ref, rtol=1e-4, atol=1e-4), (
        float(jnp.max(jnp.abs(out - ref))))
    print("KERNEL_OK")
</pallas_src>

<mosaic_0001>
module attributes {stable_mosaic.version = 11 : i64} {
  func.func @wafercaps_kernel(%arg0: i32, %arg1: memref<1x8x128xf32, #tpu.memory_space<vmem>>, %arg2: memref<8x4x16x128xf32, #tpu.memory_space<vmem>>, %arg3: memref<1x128xf32, #tpu.memory_space<vmem>>, %arg4: memref<2x4x16x128xf32, #tpu.memory_space<vmem>>) attributes {dimension_semantics = [#tpu.dimension_semantics<arbitrary>], iteration_bounds = array<i64: 2>, scalar_prefetch = 0 : i64, scratch_operands = 1 : i64, tpu.core_type = #tpu.core_type<tc>, window_params = [{transform_indices = @transform_0, window_bounds = array<i64: 1, 8, 128>}, {pipeline_mode = #tpu.pipeline_mode<synchronous>, transform_indices = @transform_1, window_bounds = array<i64: 8, 4, 16, 128>}, {pipeline_mode = #tpu.pipeline_mode<synchronous>, transform_indices = @transform_2, window_bounds = array<i64: 1, 128>}]} {
    %c0 = arith.constant 0 : index
    %c0_0 = arith.constant 0 : index
    %c0_1 = arith.constant 0 : index
    %0 = vector.load %arg1[%c0, %c0_0, %c0_1] : memref<1x8x128xf32, #tpu.memory_space<vmem>>, vector<1x8x128xf32>
    %c1_i32 = arith.constant 1 : i32
    %1 = arith.muli %arg0, %c1_i32 : i32
    %c0_i32 = arith.constant 0 : i32
    %2 = arith.addi %1, %c0_i32 : i32
    %3 = vector.shape_cast %0 : vector<1x8x128xf32> to vector<8x128xf32>
    %4 = vector.extract_strided_slice %3 {offsets = [0, 0], sizes = [1, 128], strides = [1, 1]} : vector<8x128xf32> to vector<1x128xf32>
    %5 = vector.extract_strided_slice %3 {offsets = [1, 0], sizes = [1, 128], strides = [1, 1]} : vector<8x128xf32> to vector<1x128xf32>
    %6 = vector.extract_strided_slice %3 {offsets = [2, 0], sizes = [1, 128], strides = [1, 1]} : vector<8x128xf32> to vector<1x128xf32>
    %7 = vector.extract_strided_slice %3 {offsets = [3, 0], sizes = [1, 128], strides = [1, 1]} : vector<8x128xf32> to vector<1x128xf32>
    %8 = vector.extract_strided_slice %3 {offsets = [4, 0], sizes = [1, 128], strides = [1, 1]} : vector<8x128xf32> to vector<1x128xf32>
    %9 = vector.extract_strided_slice %3 {offsets = [5, 0], sizes = [1, 128], strides = [1, 1]} : vector<8x128xf32> to vector<1x128xf32>
    %10 = vector.extract_strided_slice %3 {offsets = [6, 0], sizes = [1, 128], strides = [1, 1]} : vector<8x128xf32> to vector<1x128xf32>
    %11 = vector.extract_strided_slice %3 {offsets = [7, 0], sizes = [1, 128], strides = [1, 1]} : vector<8x128xf32> to vector<1x128xf32>
    %c0_2 = arith.constant 0 : index
    %c0_3 = arith.constant 0 : index
    %c0_4 = arith.constant 0 : index
    %c0_5 = arith.constant 0 : index
    %12 = vector.load %arg2[%c0_2, %c0_3, %c0_4, %c0_5] : memref<8x4x16x128xf32, #tpu.memory_space<vmem>>, vector<1x1x16x128xf32>
    %13 = vector.shape_cast %12 : vector<1x1x16x128xf32> to vector<16x128xf32>
    %14 = vector.broadcast %4 : vector<1x128xf32> to vector<16x128xf32>
    %15 = arith.mulf %13, %14 : vector<16x128xf32>
    %c1 = arith.constant 1 : index
    %c0_6 = arith.constant 0 : index
    %c0_7 = arith.constant 0 : index
    %c0_8 = arith.constant 0 : index
    %16 = vector.load %arg2[%c1, %c0_6, %c0_7, %c0_8] : memref<8x4x16x128xf32, #tpu.memory_space<vmem>>, vector<1x1x16x128xf32>
    %17 = vector.shape_cast %16 : vector<1x1x16x128xf32> to vector<16x128xf32>
    %18 = vector.broadcast %5 : vector<1x128xf32> to vector<16x128xf32>
    %19 = arith.mulf %17, %18 : vector<16x128xf32>
    %20 = arith.addf %15, %19 : vector<16x128xf32>
    %c2 = arith.constant 2 : index
    %c0_9 = arith.constant 0 : index
    %c0_10 = arith.constant 0 : index
    %c0_11 = arith.constant 0 : index
    %21 = vector.load %arg2[%c2, %c0_9, %c0_10, %c0_11] : memref<8x4x16x128xf32, #tpu.memory_space<vmem>>, vector<1x1x16x128xf32>
    %22 = vector.shape_cast %21 : vector<1x1x16x128xf32> to vector<16x128xf32>
    %23 = vector.broadcast %6 : vector<1x128xf32> to vector<16x128xf32>
    %24 = arith.mulf %22, %23 : vector<16x128xf32>
    %25 = arith.addf %20, %24 : vector<16x128xf32>
    %c3 = arith.constant 3 : index
    %c0_12 = arith.constant 0 : index
    %c0_13 = arith.constant 0 : index
    %c0_14 = arith.constant 0 : index
    %26 = vector.load %arg2[%c3, %c0_12, %c0_13, %c0_14] : memref<8x4x16x128xf32, #tpu.memory_space<vmem>>, vector<1x1x16x128xf32>
    %27 = vector.shape_cast %26 : vector<1x1x16x128xf32> to vector<16x128xf32>
    %28 = vector.broadcast %7 : vector<1x128xf32> to vector<16x128xf32>
    %29 = arith.mulf %27, %28 : vector<16x128xf32>
    %30 = arith.addf %25, %29 : vector<16x128xf32>
    %c4 = arith.constant 4 : index
    %c0_15 = arith.constant 0 : index
    %c0_16 = arith.constant 0 : index
    %c0_17 = arith.constant 0 : index
    %31 = vector.load %arg2[%c4, %c0_15, %c0_16, %c0_17] : memref<8x4x16x128xf32, #tpu.memory_space<vmem>>, vector<1x1x16x128xf32>
    %32 = vector.shape_cast %31 : vector<1x1x16x128xf32> to vector<16x128xf32>
    %33 = vector.broadcast %8 : vector<1x128xf32> to vector<16x128xf32>
    %34 = arith.mulf %32, %33 : vector<16x128xf32>
    %35 = arith.addf %30, %34 : vector<16x128xf32>
    %c5 = arith.constant 5 : index
    %c0_18 = arith.constant 0 : index
    %c0_19 = arith.constant 0 : index
    %c0_20 = arith.constant 0 : index
    %36 = vector.load %arg2[%c5, %c0_18, %c0_19, %c0_20] : memref<8x4x16x128xf32, #tpu.memory_space<vmem>>, vector<1x1x16x128xf32>
    %37 = vector.shape_cast %36 : vector<1x1x16x128xf32> to vector<16x128xf32>
    %38 = vector.broadcast %9 : vector<1x128xf32> to vector<16x128xf32>
    %39 = arith.mulf %37, %38 : vector<16x128xf32>
    %40 = arith.addf %35, %39 : vector<16x128xf32>
    %c6 = arith.constant 6 : index
    %c0_21 = arith.constant 0 : index
    %c0_22 = arith.constant 0 : index
    %c0_23 = arith.constant 0 : index
    %41 = vector.load %arg2[%c6, %c0_21, %c0_22, %c0_23] : memref<8x4x16x128xf32, #tpu.memory_space<vmem>>, vector<1x1x16x128xf32>
    %42 = vector.shape_cast %41 : vector<1x1x16x128xf32> to vector<16x128xf32>
    %43 = vector.broadcast %10 : vector<1x128xf32> to vector<16x128xf32>
    %44 = arith.mulf %42, %43 : vector<16x128xf32>
    %45 = arith.addf %40, %44 : vector<16x128xf32>
    %c7 = arith.constant 7 : index
    %c0_24 = arith.constant 0 : index
    %c0_25 = arith.constant 0 : index
    %c0_26 = arith.constant 0 : index
    %46 = vector.load %arg2[%c7, %c0_24, %c0_25, %c0_26] : memref<8x4x16x128xf32, #tpu.memory_space<vmem>>, vector<1x1x16x128xf32>
    %47 = vector.shape_cast %46 : vector<1x1x16x128xf32> to vector<16x128xf32>
    %48 = vector.broadcast %11 : vector<1x128xf32> to vector<16x128xf32>
    %49 = arith.mulf %47, %48 : vector<16x128xf32>
    %50 = arith.addf %45, %49 : vector<16x128xf32>
    %51 = arith.index_cast %2 : i32 to index
    %c0_27 = arith.constant 0 : index
    %c0_28 = arith.constant 0 : index
    %c0_29 = arith.constant 0 : index
    %52 = vector.load %arg4[%51, %c0_27, %c0_28, %c0_29] : memref<2x4x16x128xf32, #tpu.memory_space<vmem>>, vector<1x1x16x128xf32>
    %53 = vector.shape_cast %52 : vector<1x1x16x128xf32> to vector<16x128xf32>
    %54 = vector.shape_cast %50 : vector<16x128xf32> to vector<1x1x16x128xf32>
    tpu.vector_store %arg4[%51, %c0_27, %c0_28, %c0_29], %54 {strides = array<i32>} : memref<2x4x16x128xf32, #tpu.memory_space<vmem>>, vector<1x1x16x128xf32>,
    %c0_30 = arith.constant 0 : index
    %c1_31 = arith.constant 1 : index
    %c0_32 = arith.constant 0 : index
    %c0_33 = arith.constant 0 : index
    %55 = vector.load %arg2[%c0_30, %c1_31, %c0_32, %c0_33] : memref<8x4x16x128xf32, #tpu.memory_space<vmem>>, vector<1x1x16x128xf32>
    %56 = vector.shape_cast %55 : vector<1x1x16x128xf32> to vector<16x128xf32>
    %57 = vector.broadcast %4 : vector<1x128xf32> to vector<16x128xf32>
    %58 = arith.mulf %56, %57 : vector<16x128xf32>
    %c1_34 = arith.constant 1 : index
    %c1_35 = arith.constant 1 : index
    %c0_36 = arith.constant 0 : index
    %c0_37 = arith.constant 0 : index
    %59 = vector.load %arg2[%c1_34, %c1_35, %c0_36, %c0_37] : memref<8x4x16x128xf32, #tpu.memory_space<vmem>>, vector<1x1x16x128xf32>
    %60 = vector.shape_cast %59 : vector<1x1x16x128xf32> to vector<16x128xf32>
    %61 = vector.broadcast %5 : vector<1x128xf32> to vector<16x128xf32>
    %62 = arith.mulf %60, %61 : vector<16x128xf32>
    %63 = arith.addf %58, %62 : vector<16x128xf32>
    %c2_38 = arith.constant 2 : index
    %c1_39 = arith.constant 1 : index
    %c0_40 = arith.constant 0 : index
    %c0_41 = arith.constant 0 : index
    %64 = vector.load %arg2[%c2_38, %c1_39, %c0_40, %c0_41] : memref<8x4x16x128xf32, #tpu.memory_space<vmem>>, vector<1x1x16x128xf32>
    %65 = vector.shape_cast %64 : vector<1x1x16x128xf32> to vector<16x128xf32>
    %66 = vector.broadcast %6 : vector<1x128xf32> to vector<16x128xf32>
    %67 = arith.mulf %65, %66 : vector<16x128xf32>
    %68 = arith.addf %63, %67 : vector<16x128xf32>
    %c3_42 = arith.constant 3 : index
    %c1_43 = arith.constant 1 : index
    %c0_44 = arith.constant 0 : index
    %c0_45 = arith.constant 0 : index
    %69 = vector.load %arg2[%c3_42, %c1_43, %c0_44, %c0_45] : memref<8x4x16x128xf32, #tpu.memory_space<vmem>>, vector<1x1x16x128xf32>
    %70 = vector.shape_cast %69 : vector<1x1x16x128xf32> to vector<16x128xf32>
    %71 = vector.broadcast %7 : vector<1x128xf32> to vector<16x128xf32>
    %72 = arith.mulf %70, %71 : vector<16x128xf32>
    %73 = arith.addf %68, %72 : vector<16x128xf32>
    %c4_46 = arith.constant 4 : index
    %c1_47 = arith.constant 1 : index
    %c0_48 = arith.constant 0 : index
    %c0_49 = arith.constant 0 : index
    %74 = vector.load %arg2[%c4_46, %c1_47, %c0_48, %c0_49] : memref<8x4x16x128xf32, #tpu.memory_space<vmem>>, vector<1x1x16x128xf32>
    %75 = vector.shape_cast %74 : vector<1x1x16x128xf32> to vector<16x128xf32>
    %76 = vector.broadcast %8 : vector<1x128xf32> to vector<16x128xf32>
    %77 = arith.mulf %75, %76 : vector<16x128xf32>
    %78 = arith.addf %73, %77 : vector<16x128xf32>
    %c5_50 = arith.constant 5 : index
    %c1_51 = arith.constant 1 : index
    %c0_52 = arith.constant 0 : index
    %c0_53 = arith.constant 0 : index
    %79 = vector.load %arg2[%c5_50, %c1_51, %c0_52, %c0_53] : memref<8x4x16x128xf32, #tpu.memory_space<vmem>>, vector<1x1x16x128xf32>
    %80 = vector.shape_cast %79 : vector<1x1x16x128xf32> to vector<16x128xf32>
    %81 = vector.broadcast %9 : vector<1x128xf32> to vector<16x128xf32>
    %82 = arith.mulf %80, %81 : vector<16x128xf32>
    %83 = arith.addf %78, %82 : vector<16x128xf32>
    %c6_54 = arith.constant 6 : index
    %c1_55 = arith.constant 1 : index
    %c0_56 = arith.constant 0 : index
    %c0_57 = arith.constant 0 : index
    %84 = vector.load %arg2[%c6_54, %c1_55, %c0_56, %c0_57] : memref<8x4x16x128xf32, #tpu.memory_space<vmem>>, vector<1x1x16x128xf32>
    %85 = vector.shape_cast %84 : vector<1x1x16x128xf32> to vector<16x128xf32>
    %86 = vector.broadcast %10 : vector<1x128xf32> to vector<16x128xf32>
    %87 = arith.mulf %85, %86 : vector<16x128xf32>
    %88 = arith.addf %83, %87 : vector<16x128xf32>
    %c7_58 = arith.constant 7 : index
    %c1_59 = arith.constant 1 : index
    %c0_60 = arith.constant 0 : index
    %c0_61 = arith.constant 0 : index
    %89 = vector.load %arg2[%c7_58, %c1_59, %c0_60, %c0_61] : memref<8x4x16x128xf32, #tpu.memory_space<vmem>>, vector<1x1x16x128xf32>
    %90 = vector.shape_cast %89 : vector<1x1x16x128xf32> to vector<16x128xf32>
    %91 = vector.broadcast %11 : vector<1x128xf32> to vector<16x128xf32>
    %92 = arith.mulf %90, %91 : vector<16x128xf32>
    %93 = arith.addf %88, %92 : vector<16x128xf32>
    %94 = arith.index_cast %2 : i32 to index
    %c1_62 = arith.constant 1 : index
    %c0_63 = arith.constant 0 : index
    %c0_64 = arith.constant 0 : index
    %95 = vector.load %arg4[%94, %c1_62, %c0_63, %c0_64] : memref<2x4x16x128xf32, #tpu.memory_space<vmem>>, vector<1x1x16x128xf32>
    %96 = vector.shape_cast %95 : vector<1x1x16x128xf32> to vector<16x128xf32>
    %97 = vector.shape_cast %93 : vector<16x128xf32> to vector<1x1x16x128xf32>
    tpu.vector_store %arg4[%94, %c1_62, %c0_63, %c0_64], %97 {strides = array<i32>} : memref<2x4x16x128xf32, #tpu.memory_space<vmem>>, vector<1x1x16x128xf32>,
    %c0_65 = arith.constant 0 : index
    %c2_66 = arith.constant 2 : index
    %c0_67 = arith.constant 0 : index
    %c0_68 = arith.constant 0 : index
    %98 = vector.load %arg2[%c0_65, %c2_66, %c0_67, %c0_68] : memref<8x4x16x128xf32, #tpu.memory_space<vmem>>, vector<1x1x16x128xf32>
    %99 = vector.shape_cast %98 : vector<1x1x16x128xf32> to vector<16x128xf32>
    %100 = vector.broadcast %4 : vector<1x128xf32> to vector<16x128xf32>
    %101 = arith.mulf %99, %100 : vector<16x128xf32>
    %c1_69 = arith.constant 1 : index
    %c2_70 = arith.constant 2 : index
    %c0_71 = arith.constant 0 : index
    %c0_72 = arith.constant 0 : index
    %102 = vector.load %arg2[%c1_69, %c2_70, %c0_71, %c0_72] : memref<8x4x16x128xf32, #tpu.memory_space<vmem>>, vector<1x1x16x128xf32>
    %103 = vector.shape_cast %102 : vector<1x1x16x128xf32> to vector<16x128xf32>
    %104 = vector.broadcast %5 : vector<1x128xf32> to vector<16x128xf32>
    %105 = arith.mulf %103, %104 : vector<16x128xf32>
    %106 = arith.addf %101, %105 : vector<16x128xf32>
    %c2_73 = arith.constant 2 : index
    %c2_74 = arith.constant 2 : index
    %c0_75 = arith.constant 0 : index
    %c0_76 = arith.constant 0 : index
    %107 = vector.load %arg2[%c2_73, %c2_74, %c0_75, %c0_76] : memref<8x4x16x128xf32, #tpu.memory_space<vmem>>, vector<1x1x16x128xf32>
    %108 = vector.shape_cast %107 : vector<1x1x16x128xf32> to vector<16x128xf32>
    %109 = vector.broadcast %6 : vector<1x128xf32> to vector<16x128xf32>
    %110 = arith.mulf %108, %109 : vector<16x128xf32>
    %111 = arith.addf %106, %110 : vector<16x128xf32>
    %c3_77 = arith.constant 3 : index
    %c2_78 = arith.constant 2 : index
    %c0_79 = arith.constant 0 : index
    %c0_80 = arith.constant 0 : index
    %112 = vector.load %arg2[%c3_77, %c2_78, %c0_79, %c0_80] : memref<8x4x16x128xf32, #tpu.memory_space<vmem>>, vector<1x1x16x128xf32>
    %113 = vector.shape_cast %112 : vector<1x1x16x128xf32> to vector<16x128xf32>
    %114 = vector.broadcast %7 : vector<1x128xf32> to vector<16x128xf32>
    %115 = arith.mulf %113, %114 : vector<16x128xf32>
    %116 = arith.addf %111, %115 : vector<16x128xf32>
    %c4_81 = arith.constant 4 : index
    %c2_82 = arith.constant 2 : index
    %c0_83 = arith.constant 0 : index
    %c0_84 = arith.constant 0 : index
    %117 = vector.load %arg2[%c4_81, %c2_82, %c0_83, %c0_84] : memref<8x4x16x128xf32, #tpu.memory_space<vmem>>, vector<1x1x16x128xf32>
    %118 = vector.shape_cast %117 : vector<1x1x16x128xf32> to vector<16x128xf32>
    %119 = vector.broadcast %8 : vector<1x128xf32> to vector<16x128xf32>
    %120 = arith.mulf %118, %119 : vector<16x128xf32>
    %121 = arith.addf %116, %120 : vector<16x128xf32>
    %c5_85 = arith.constant 5 : index
    %c2_86 = arith.constant 2 : index
    %c0_87 = arith.constant 0 : index
    %c0_88 = arith.constant 0 : index
    %122 = vector.load %arg2[%c5_85, %c2_86, %c0_87, %c0_88] : memref<8x4x16x128xf32, #tpu.memory_space<vmem>>, vector<1x1x16x128xf32>
    %123 = vector.shape_cast %122 : vector<1x1x16x128xf32> to vector<16x128xf32>
    %124 = vector.broadcast %9 : vector<1x128xf32> to vector<16x128xf32>
    %125 = arith.mulf %123, %124 : vector<16x128xf32>
    %126 = arith.addf %121, %125 : vector<16x128xf32>
    %c6_89 = arith.constant 6 : index
    %c2_90 = arith.constant 2 : index
    %c0_91 = arith.constant 0 : index
    %c0_92 = arith.constant 0 : index
    %127 = vector.load %arg2[%c6_89, %c2_90, %c0_91, %c0_92] : memref<8x4x16x128xf32, #tpu.memory_space<vmem>>, vector<1x1x16x128xf32>
    %128 = vector.shape_cast %127 : vector<1x1x16x128xf32> to vector<16x128xf32>
    %129 = vector.broadcast %10 : vector<1x128xf32> to vector<16x128xf32>
    %130 = arith.mulf %128, %129 : vector<16x128xf32>
    %131 = arith.addf %126, %130 : vector<16x128xf32>
    %c7_93 = arith.constant 7 : index
    %c2_94 = arith.constant 2 : index
    %c0_95 = arith.constant 0 : index
    %c0_96 = arith.constant 0 : index
    %132 = vector.load %arg2[%c7_93, %c2_94, %c0_95, %c0_96] : memref<8x4x16x128xf32, #tpu.memory_space<vmem>>, vector<1x1x16x128xf32>
    %133 = vector.shape_cast %132 : vector<1x1x16x128xf32> to vector<16x128xf32>
    %134 = vector.broadcast %11 : vector<1x128xf32> to vector<16x128xf32>
    %135 = arith.mulf %133, %134 : vector<16x128xf32>
    %136 = arith.addf %131, %135 : vector<16x128xf32>
    %137 = arith.index_cast %2 : i32 to index
    %c2_97 = arith.constant 2 : index
    %c0_98 = arith.constant 0 : index
    %c0_99 = arith.constant 0 : index
    %138 = vector.load %arg4[%137, %c2_97, %c0_98, %c0_99] : memref<2x4x16x128xf32, #tpu.memory_space<vmem>>, vector<1x1x16x128xf32>
    %139 = vector.shape_cast %138 : vector<1x1x16x128xf32> to vector<16x128xf32>
    %140 = vector.shape_cast %136 : vector<16x128xf32> to vector<1x1x16x128xf32>
    tpu.vector_store %arg4[%137, %c2_97, %c0_98, %c0_99], %140 {strides = array<i32>} : memref<2x4x16x128xf32, #tpu.memory_space<vmem>>, vector<1x1x16x128xf32>,
    %c0_100 = arith.constant 0 : index
    %c3_101 = arith.constant 3 : index
    %c0_102 = arith.constant 0 : index
    %c0_103 = arith.constant 0 : index
    %141 = vector.load %arg2[%c0_100, %c3_101, %c0_102, %c0_103] : memref<8x4x16x128xf32, #tpu.memory_space<vmem>>, vector<1x1x16x128xf32>
    %142 = vector.shape_cast %141 : vector<1x1x16x128xf32> to vector<16x128xf32>
    %143 = vector.broadcast %4 : vector<1x128xf32> to vector<16x128xf32>
    %144 = arith.mulf %142, %143 : vector<16x128xf32>
    %c1_104 = arith.constant 1 : index
    %c3_105 = arith.constant 3 : index
    %c0_106 = arith.constant 0 : index
    %c0_107 = arith.constant 0 : index
    %145 = vector.load %arg2[%c1_104, %c3_105, %c0_106, %c0_107] : memref<8x4x16x128xf32, #tpu.memory_space<vmem>>, vector<1x1x16x128xf32>
    %146 = vector.shape_cast %145 : vector<1x1x16x128xf32> to vector<16x128xf32>
    %147 = vector.broadcast %5 : vector<1x128xf32> to vector<16x128xf32>
    %148 = arith.mulf %146, %147 : vector<16x128xf32>
    %149 = arith.addf %144, %148 : vector<16x128xf32>
    %c2_108 = arith.constant 2 : index
    %c3_109 = arith.constant 3 : index
    %c0_110 = arith.constant 0 : index
    %c0_111 = arith.constant 0 : index
    %150 = vector.load %arg2[%c2_108, %c3_109, %c0_110, %c0_111] : memref<8x4x16x128xf32, #tpu.memory_space<vmem>>, vector<1x1x16x128xf32>
    %151 = vector.shape_cast %150 : vector<1x1x16x128xf32> to vector<16x128xf32>
    %152 = vector.broadcast %6 : vector<1x128xf32> to vector<16x128xf32>
    %153 = arith.mulf %151, %152 : vector<16x128xf32>
    %154 = arith.addf %149, %153 : vector<16x128xf32>
    %c3_112 = arith.constant 3 : index
    %c3_113 = arith.constant 3 : index
    %c0_114 = arith.constant 0 : index
    %c0_115 = arith.constant 0 : index
    %155 = vector.load %arg2[%c3_112, %c3_113, %c0_114, %c0_115] : memref<8x4x16x128xf32, #tpu.memory_space<vmem>>, vector<1x1x16x128xf32>
    %156 = vector.shape_cast %155 : vector<1x1x16x128xf32> to vector<16x128xf32>
    %157 = vector.broadcast %7 : vector<1x128xf32> to vector<16x128xf32>
    %158 = arith.mulf %156, %157 : vector<16x128xf32>
    %159 = arith.addf %154, %158 : vector<16x128xf32>
    %c4_116 = arith.constant 4 : index
    %c3_117 = arith.constant 3 : index
    %c0_118 = arith.constant 0 : index
    %c0_119 = arith.constant 0 : index
    %160 = vector.load %arg2[%c4_116, %c3_117, %c0_118, %c0_119] : memref<8x4x16x128xf32, #tpu.memory_space<vmem>>, vector<1x1x16x128xf32>
    %161 = vector.shape_cast %160 : vector<1x1x16x128xf32> to vector<16x128xf32>
    %162 = vector.broadcast %8 : vector<1x128xf32> to vector<16x128xf32>
    %163 = arith.mulf %161, %162 : vector<16x128xf32>
    %164 = arith.addf %159, %163 : vector<16x128xf32>
    %c5_120 = arith.constant 5 : index
    %c3_121 = arith.constant 3 : index
    %c0_122 = arith.constant 0 : index
    %c0_123 = arith.constant 0 : index
    %165 = vector.load %arg2[%c5_120, %c3_121, %c0_122, %c0_123] : memref<8x4x16x128xf32, #tpu.memory_space<vmem>>, vector<1x1x16x128xf32>
    %166 = vector.shape_cast %165 : vector<1x1x16x128xf32> to vector<16x128xf32>
    %167 = vector.broadcast %9 : vector<1x128xf32> to vector<16x128xf32>
    %168 = arith.mulf %166, %167 : vector<16x128xf32>
    %169 = arith.addf %164, %168 : vector<16x128xf32>
    %c6_124 = arith.constant 6 : index
    %c3_125 = arith.constant 3 : index
    %c0_126 = arith.constant 0 : index
    %c0_127 = arith.constant 0 : index
    %170 = vector.load %arg2[%c6_124, %c3_125, %c0_126, %c0_127] : memref<8x4x16x128xf32, #tpu.memory_space<vmem>>, vector<1x1x16x128xf32>
    %171 = vector.shape_cast %170 : vector<1x1x16x128xf32> to vector<16x128xf32>
    %172 = vector.broadcast %10 : vector<1x128xf32> to vector<16x128xf32>
    %173 = arith.mulf %171, %172 : vector<16x128xf32>
    %174 = arith.addf %169, %173 : vector<16x128xf32>
    %c7_128 = arith.constant 7 : index
    %c3_129 = arith.constant 3 : index
    %c0_130 = arith.constant 0 : index
    %c0_131 = arith.constant 0 : index
    %175 = vector.load %arg2[%c7_128, %c3_129, %c0_130, %c0_131] : memref<8x4x16x128xf32, #tpu.memory_space<vmem>>, vector<1x1x16x128xf32>
    %176 = vector.shape_cast %175 : vector<1x1x16x128xf32> to vector<16x128xf32>
    %177 = vector.broadcast %11 : vector<1x128xf32> to vector<16x128xf32>
    %178 = arith.mulf %176, %177 : vector<16x128xf32>
    %179 = arith.addf %174, %178 : vector<16x128xf32>
    %180 = arith.index_cast %2 : i32 to index
    %c3_132 = arith.constant 3 : index
    %c0_133 = arith.constant 0 : index
    %c0_134 = arith.constant 0 : index
    %181 = vector.load %arg4[%180, %c3_132, %c0_133, %c0_134] : memref<2x4x16x128xf32, #tpu.memory_space<vmem>>, vector<1x1x16x128xf32>
    %182 = vector.shape_cast %181 : vector<1x1x16x128xf32> to vector<16x128xf32>
    %183 = vector.shape_cast %179 : vector<16x128xf32> to vector<1x1x16x128xf32>
    tpu.vector_store %arg4[%180, %c3_132, %c0_133, %c0_134], %183 {strides = array<i32>} : memref<2x4x16x128xf32, #tpu.memory_space<vmem>>, vector<1x1x16x128xf32>,
    %c1_i32_135 = arith.constant 1 : i32
    %184 = arith.cmpi eq, %arg0, %c1_i32_135 : i32
    %185 = arith.extui %184 : i1 to i32
    %c0_i32_136 = arith.constant 0 : i32
    %186 = arith.cmpi ne, %185, %c0_i32_136 : i32
    scf.if %186 {
      %cst = arith.constant 0.000000e+00 : f32
      %187 = vector.broadcast %cst : f32 to vector<4x128xf32>
      %cst_137 = arith.constant dense<0xFF800000> : vector<4xf32>
      %188 = vector.multi_reduction <maximumf>, %187, %cst_137 [1] : vector<4x128xf32> to vector<4xf32>
      %189 = vector.shape_cast %188 : vector<4xf32> to vector<4x1xf32>
      %190 = vector.broadcast %189 : vector<4x1xf32> to vector<4x128xf32>
      %191 = arith.subf %187, %190 : vector<4x128xf32>
      %192 = math.exp %191 : vector<4x128xf32>
      %cst_138 = arith.constant dense<0.000000e+00> : vector<4xf32>
      %193 = vector.multi_reduction <add>, %192, %cst_138 [1] : vector<4x128xf32> to vector<4xf32>
      %194 = vector.shape_cast %193 : vector<4xf32> to vector<4x1xf32>
      %195 = tpu.reciprocal %194 {approx = true} : vector<4x1xf32> -> vector<4x1xf32>
      %196 = arith.mulf %194, %195 : vector<4x1xf32>
      %cst_139 = arith.constant 2.000000e+00 : f32
      %197 = vector.broadcast %cst_139 : f32 to vector<4x1xf32>
      %198 = arith.subf %197, %196 : vector<4x1xf32>
      %199 = arith.mulf %195, %198 : vector<4x1xf32>
      %200 = vector.broadcast %199 : vector<4x1xf32> to vector<4x128xf32>
      %201 = arith.mulf %192, %200 : vector<4x128xf32>
      %cst_140 = arith.constant 0.000000e+00 : f32
      %202 = vector.broadcast %cst_140 : f32 to vector<4x128xf32>
      %c0_141 = arith.constant 0 : index
      %c0_142 = arith.constant 0 : index
      %c0_143 = arith.constant 0 : index
      %c0_144 = arith.constant 0 : index
      %203 = vector.load %arg4[%c0_141, %c0_142, %c0_143, %c0_144] : memref<2x4x16x128xf32, #tpu.memory_space<vmem>>, vector<1x4x16x128xf32>
      %204 = vector.shape_cast %203 : vector<1x4x16x128xf32> to vector<4x16x128xf32>
      %205 = vector.shape_cast %201 : vector<4x128xf32> to vector<4x1x128xf32>
      %206 = vector.broadcast %205 : vector<4x1x128xf32> to vector<4x16x128xf32>
      %207 = arith.mulf %206, %204 : vector<4x16x128xf32>
      %cst_145 = arith.constant dense<0.000000e+00> : vector<4x16xf32>
      %208 = vector.multi_reduction <add>, %207, %cst_145 [2] : vector<4x16x128xf32> to vector<4x16xf32>
      %209 = math.absf %208 : vector<4x16xf32>
      %210 = arith.mulf %208, %209 : vector<4x16xf32>
      %211 = arith.mulf %208, %208 : vector<4x16xf32>
      %cst_146 = arith.constant 1.000000e+00 : f32
      %212 = vector.broadcast %cst_146 : f32 to vector<4x16xf32>
      %213 = arith.addf %212, %211 : vector<4x16xf32>
      %214 = arith.divf %210, %213 : vector<4x16xf32>
      %215 = vector.shape_cast %214 : vector<4x16xf32> to vector<4x16x1xf32>
      %216 = vector.broadcast %215 : vector<4x16x1xf32> to vector<4x16x128xf32>
      %217 = arith.mulf %204, %216 : vector<4x16x128xf32>
      %cst_147 = arith.constant dense<0.000000e+00> : vector<4x128xf32>
      %218 = vector.multi_reduction <add>, %217, %cst_147 [1] : vector<4x16x128xf32> to vector<4x128xf32>
      %219 = arith.addf %202, %218 : vector<4x128xf32>
      %c1_148 = arith.constant 1 : index
      %c0_149 = arith.constant 0 : index
      %c0_150 = arith.constant 0 : index
      %c0_151 = arith.constant 0 : index
      %220 = vector.load %arg4[%c1_148, %c0_149, %c0_150, %c0_151] : memref<2x4x16x128xf32, #tpu.memory_space<vmem>>, vector<1x4x16x128xf32>
      %221 = vector.shape_cast %220 : vector<1x4x16x128xf32> to vector<4x16x128xf32>
      %222 = vector.shape_cast %201 : vector<4x128xf32> to vector<4x1x128xf32>
      %223 = vector.broadcast %222 : vector<4x1x128xf32> to vector<4x16x128xf32>
      %224 = arith.mulf %223, %221 : vector<4x16x128xf32>
      %cst_152 = arith.constant dense<0.000000e+00> : vector<4x16xf32>
      %225 = vector.multi_reduction <add>, %224, %cst_152 [2] : vector<4x16x128xf32> to vector<4x16xf32>
      %226 = math.absf %225 : vector<4x16xf32>
      %227 = arith.mulf %225, %226 : vector<4x16xf32>
      %228 = arith.mulf %225, %225 : vector<4x16xf32>
      %cst_153 = arith.constant 1.000000e+00 : f32
      %229 = vector.broadcast %cst_153 : f32 to vector<4x16xf32>
      %230 = arith.addf %229, %228 : vector<4x16xf32>
      %231 = arith.divf %227, %230 : vector<4x16xf32>
      %232 = vector.shape_cast %231 : vector<4x16xf32> to vector<4x16x1xf32>
      %233 = vector.broadcast %232 : vector<4x16x1xf32> to vector<4x16x128xf32>
      %234 = arith.mulf %221, %233 : vector<4x16x128xf32>
      %cst_154 = arith.constant dense<0.000000e+00> : vector<4x128xf32>
      %235 = vector.multi_reduction <add>, %234, %cst_154 [1] : vector<4x16x128xf32> to vector<4x128xf32>
      %236 = arith.addf %219, %235 : vector<4x128xf32>
      %cst_155 = arith.constant 5.000000e-01 : f32
      %237 = vector.broadcast %cst_155 : f32 to vector<4x128xf32>
      %238 = arith.mulf %236, %237 : vector<4x128xf32>
      %239 = arith.addf %187, %238 : vector<4x128xf32>
      %cst_156 = arith.constant dense<0xFF800000> : vector<4xf32>
      %240 = vector.multi_reduction <maximumf>, %239, %cst_156 [1] : vector<4x128xf32> to vector<4xf32>
      %241 = vector.shape_cast %240 : vector<4xf32> to vector<4x1xf32>
      %242 = vector.broadcast %241 : vector<4x1xf32> to vector<4x128xf32>
      %243 = arith.subf %239, %242 : vector<4x128xf32>
      %244 = math.exp %243 : vector<4x128xf32>
      %cst_157 = arith.constant dense<0.000000e+00> : vector<4xf32>
      %245 = vector.multi_reduction <add>, %244, %cst_157 [1] : vector<4x128xf32> to vector<4xf32>
      %246 = vector.shape_cast %245 : vector<4xf32> to vector<4x1xf32>
      %247 = tpu.reciprocal %246 {approx = true} : vector<4x1xf32> -> vector<4x1xf32>
      %248 = arith.mulf %246, %247 : vector<4x1xf32>
      %cst_158 = arith.constant 2.000000e+00 : f32
      %249 = vector.broadcast %cst_158 : f32 to vector<4x1xf32>
      %250 = arith.subf %249, %248 : vector<4x1xf32>
      %251 = arith.mulf %247, %250 : vector<4x1xf32>
      %252 = vector.broadcast %251 : vector<4x1xf32> to vector<4x128xf32>
      %253 = arith.mulf %244, %252 : vector<4x128xf32>
      %cst_159 = arith.constant 0.000000e+00 : f32
      %254 = vector.broadcast %cst_159 : f32 to vector<4x128xf32>
      %c0_160 = arith.constant 0 : index
      %c0_161 = arith.constant 0 : index
      %c0_162 = arith.constant 0 : index
      %c0_163 = arith.constant 0 : index
      %255 = vector.load %arg4[%c0_160, %c0_161, %c0_162, %c0_163] : memref<2x4x16x128xf32, #tpu.memory_space<vmem>>, vector<1x4x16x128xf32>
      %256 = vector.shape_cast %255 : vector<1x4x16x128xf32> to vector<4x16x128xf32>
      %257 = vector.shape_cast %253 : vector<4x128xf32> to vector<4x1x128xf32>
      %258 = vector.broadcast %257 : vector<4x1x128xf32> to vector<4x16x128xf32>
      %259 = arith.mulf %258, %256 : vector<4x16x128xf32>
      %cst_164 = arith.constant dense<0.000000e+00> : vector<4x16xf32>
      %260 = vector.multi_reduction <add>, %259, %cst_164 [2] : vector<4x16x128xf32> to vector<4x16xf32>
      %261 = math.absf %260 : vector<4x16xf32>
      %262 = arith.mulf %260, %261 : vector<4x16xf32>
      %263 = arith.mulf %260, %260 : vector<4x16xf32>
      %cst_165 = arith.constant 1.000000e+00 : f32
      %264 = vector.broadcast %cst_165 : f32 to vector<4x16xf32>
      %265 = arith.addf %264, %263 : vector<4x16xf32>
      %266 = arith.divf %262, %265 : vector<4x16xf32>
      %267 = vector.shape_cast %266 : vector<4x16xf32> to vector<4x16x1xf32>
      %268 = vector.broadcast %267 : vector<4x16x1xf32> to vector<4x16x128xf32>
      %269 = arith.mulf %256, %268 : vector<4x16x128xf32>
      %cst_166 = arith.constant dense<0.000000e+00> : vector<4x128xf32>
      %270 = vector.multi_reduction <add>, %269, %cst_166 [1] : vector<4x16x128xf32> to vector<4x128xf32>
      %271 = arith.addf %254, %270 : vector<4x128xf32>
      %c1_167 = arith.constant 1 : index
      %c0_168 = arith.constant 0 : index
      %c0_169 = arith.constant 0 : index
      %c0_170 = arith.constant 0 : index
      %272 = vector.load %arg4[%c1_167, %c0_168, %c0_169, %c0_170] : memref<2x4x16x128xf32, #tpu.memory_space<vmem>>, vector<1x4x16x128xf32>
      %273 = vector.shape_cast %272 : vector<1x4x16x128xf32> to vector<4x16x128xf32>
      %274 = vector.shape_cast %253 : vector<4x128xf32> to vector<4x1x128xf32>
      %275 = vector.broadcast %274 : vector<4x1x128xf32> to vector<4x16x128xf32>
      %276 = arith.mulf %275, %273 : vector<4x16x128xf32>
      %cst_171 = arith.constant dense<0.000000e+00> : vector<4x16xf32>
      %277 = vector.multi_reduction <add>, %276, %cst_171 [2] : vector<4x16x128xf32> to vector<4x16xf32>
      %278 = math.absf %277 : vector<4x16xf32>
      %279 = arith.mulf %277, %278 : vector<4x16xf32>
      %280 = arith.mulf %277, %277 : vector<4x16xf32>
      %cst_172 = arith.constant 1.000000e+00 : f32
      %281 = vector.broadcast %cst_172 : f32 to vector<4x16xf32>
      %282 = arith.addf %281, %280 : vector<4x16xf32>
      %283 = arith.divf %279, %282 : vector<4x16xf32>
      %284 = vector.shape_cast %283 : vector<4x16xf32> to vector<4x16x1xf32>
      %285 = vector.broadcast %284 : vector<4x16x1xf32> to vector<4x16x128xf32>
      %286 = arith.mulf %273, %285 : vector<4x16x128xf32>
      %cst_173 = arith.constant dense<0.000000e+00> : vector<4x128xf32>
      %287 = vector.multi_reduction <add>, %286, %cst_173 [1] : vector<4x16x128xf32> to vector<4x128xf32>
      %288 = arith.addf %271, %287 : vector<4x128xf32>
      %cst_174 = arith.constant 5.000000e-01 : f32
      %289 = vector.broadcast %cst_174 : f32 to vector<4x128xf32>
      %290 = arith.mulf %288, %289 : vector<4x128xf32>
      %291 = arith.addf %239, %290 : vector<4x128xf32>
      %cst_175 = arith.constant dense<0xFF800000> : vector<4xf32>
      %292 = vector.multi_reduction <maximumf>, %291, %cst_175 [1] : vector<4x128xf32> to vector<4xf32>
      %293 = vector.shape_cast %292 : vector<4xf32> to vector<4x1xf32>
      %294 = vector.broadcast %293 : vector<4x1xf32> to vector<4x128xf32>
      %295 = arith.subf %291, %294 : vector<4x128xf32>
      %296 = math.exp %295 : vector<4x128xf32>
      %cst_176 = arith.constant dense<0.000000e+00> : vector<4xf32>
      %297 = vector.multi_reduction <add>, %296, %cst_176 [1] : vector<4x128xf32> to vector<4xf32>
      %298 = vector.shape_cast %297 : vector<4xf32> to vector<4x1xf32>
      %299 = tpu.reciprocal %298 {approx = true} : vector<4x1xf32> -> vector<4x1xf32>
      %300 = arith.mulf %298, %299 : vector<4x1xf32>
      %cst_177 = arith.constant 2.000000e+00 : f32
      %301 = vector.broadcast %cst_177 : f32 to vector<4x1xf32>
      %302 = arith.subf %301, %300 : vector<4x1xf32>
      %303 = arith.mulf %299, %302 : vector<4x1xf32>
      %304 = vector.broadcast %303 : vector<4x1xf32> to vector<4x128xf32>
      %305 = arith.mulf %296, %304 : vector<4x128xf32>
      %c0_178 = arith.constant 0 : index
      %c0_179 = arith.constant 0 : index
      %c0_180 = arith.constant 0 : index
      %c0_181 = arith.constant 0 : index
      %306 = vector.load %arg4[%c0_178, %c0_179, %c0_180, %c0_181] : memref<2x4x16x128xf32, #tpu.memory_space<vmem>>, vector<1x4x16x128xf32>
      %307 = vector.shape_cast %306 : vector<1x4x16x128xf32> to vector<4x16x128xf32>
      %308 = vector.shape_cast %305 : vector<4x128xf32> to vector<4x1x128xf32>
      %309 = vector.broadcast %308 : vector<4x1x128xf32> to vector<4x16x128xf32>
      %310 = arith.mulf %309, %307 : vector<4x16x128xf32>
      %cst_182 = arith.constant dense<0.000000e+00> : vector<4x16xf32>
      %311 = vector.multi_reduction <add>, %310, %cst_182 [2] : vector<4x16x128xf32> to vector<4x16xf32>
      %312 = math.absf %311 : vector<4x16xf32>
      %313 = arith.mulf %311, %312 : vector<4x16xf32>
      %314 = arith.mulf %311, %311 : vector<4x16xf32>
      %cst_183 = arith.constant 1.000000e+00 : f32
      %315 = vector.broadcast %cst_183 : f32 to vector<4x16xf32>
      %316 = arith.addf %315, %314 : vector<4x16xf32>
      %317 = arith.divf %313, %316 : vector<4x16xf32>
      %c1_184 = arith.constant 1 : index
      %c0_185 = arith.constant 0 : index
      %c0_186 = arith.constant 0 : index
      %c0_187 = arith.constant 0 : index
      %318 = vector.load %arg4[%c1_184, %c0_185, %c0_186, %c0_187] : memref<2x4x16x128xf32, #tpu.memory_space<vmem>>, vector<1x4x16x128xf32>
      %319 = vector.shape_cast %318 : vector<1x4x16x128xf32> to vector<4x16x128xf32>
      %320 = vector.shape_cast %305 : vector<4x128xf32> to vector<4x1x128xf32>
      %321 = vector.broadcast %320 : vector<4x1x128xf32> to vector<4x16x128xf32>
      %322 = arith.mulf %321, %319 : vector<4x16x128xf32>
      %cst_188 = arith.constant dense<0.000000e+00> : vector<4x16xf32>
      %323 = vector.multi_reduction <add>, %322, %cst_188 [2] : vector<4x16x128xf32> to vector<4x16xf32>
      %324 = math.absf %323 : vector<4x16xf32>
      %325 = arith.mulf %323, %324 : vector<4x16xf32>
      %326 = arith.mulf %323, %323 : vector<4x16xf32>
      %cst_189 = arith.constant 1.000000e+00 : f32
      %327 = vector.broadcast %cst_189 : f32 to vector<4x16xf32>
      %328 = arith.addf %327, %326 : vector<4x16xf32>
      %329 = arith.divf %325, %328 : vector<4x16xf32>
      %330 = vector.shape_cast %317 : vector<4x16xf32> to vector<1x4x16xf32>
      %331 = vector.shape_cast %329 : vector<4x16xf32> to vector<1x4x16xf32>
      %332 = tpu.concatenate %330, %331 in 0 : vector<1x4x16xf32>, vector<1x4x16xf32> -> vector<2x4x16xf32>
      %333 = vector.shape_cast %332 : vector<2x4x16xf32> to vector<1x128xf32>
      %c0_190 = arith.constant 0 : index
      %c0_191 = arith.constant 0 : index
      %334 = vector.load %arg3[%c0_190, %c0_191] : memref<1x128xf32, #tpu.memory_space<vmem>>, vector<1x128xf32>
      tpu.vector_store %arg3[%c0_190, %c0_191], %333 {strides = array<i32>} : memref<1x128xf32, #tpu.memory_space<vmem>>, vector<1x128xf32>,
    } else {
    }
    return
  }
  func.func @transform_0(%arg0: i32) -> (i32, i32, i32) {
    %c0_i32 = arith.constant 0 : i32
    %c0_i32_0 = arith.constant 0 : i32
    %c0_i32_1 = arith.constant 0 : i32
    return %arg0, %c0_i32, %c0_i32_0 : i32, i32, i32
  }
  func.func @transform_1(%arg0: i32) -> (i32, i32, i32, i32) {
    %c0_i32 = arith.constant 0 : i32
    %c0_i32_0 = arith.constant 0 : i32
    %c0_i32_1 = arith.constant 0 : i32
    %c0_i32_2 = arith.constant 0 : i32
    %c0_i32_3 = arith.constant 0 : i32
    return %c0_i32, %c0_i32_0, %c0_i32_1, %c0_i32_2 : i32, i32, i32, i32
  }
  func.func @transform_2(%arg0: i32) -> (i32, i32) {
    %c0_i32 = arith.constant 0 : i32
    %c0_i32_0 = arith.constant 0 : i32
    %c0_i32_1 = arith.constant 0 : i32
    return %c0_i32, %c0_i32_0 : i32, i32
  }
}

</mosaic_0001>

<bundles_post_ra>
// kernel: wafercaps_forward.1
= control target key start
LH: loop header
LB: loop body
LE: loop exit
PB: predicated region body
PF: predicated region fallthrough
CT: control target
= control target key end

     0   :  { %7 = vsyncpa [#allocation4], 0  ;;  %s3877_s0 = inlined_call_operand.hbm [shape: f32[2,8,128], index: 0, kind: input, shape index: {}]   ;;  %s3878_s1 = inlined_call_operand.hbm [shape: f32[8,4,16,128], index: 1, kind: input, shape index: {}]   ;;  %s3879_s2 = inlined_call_operand.vmem [shape: f32[1,128], index: 2, kind: output, shape index: {}]  }
   0x1   :  { %9 = vsyncpa [#allocation4 + $0x1], 0 }
   0x2   :  { %10 = vsyncpa [#allocation6], 0  ;;  %s2321_s9 = smov 0   ;;  %s2323_s10 = smov 0  }
   0x3   :  { %s2325_s11 = smov 0   ;;  %s2327_s12 = smov 0  }
   0x4 LB: > { %s100_s15 = sshll.u32 %s3878_s1, 4  ;;  %s2343_s16 = sadd.s32 4294967295, %s2299_s12   ;;  %s2299_s12 = sphi %s2327_s12, %s3970_s12   ;;  %s2295_s11 = sphi %s2325_s11, %s3969_s11   ;;  %s2291_s10 = sphi %s2323_s10, %s3968_s10   ;;  %s2287_s9 = sphi %s2321_s9, %s3967_s9   ;;  %s101_s15 = int_to_ptr.hbm [resolvable:$true] %s100_s15 }
   0x5   : > { %p1988_p0 = scmp.ge.s32.totalorder %s2299_s12, 1  ;;  %p37_p1 = scmp.eq.s32.totalorder %s2343_s16, 0 }
   0x6   : > { %p89_p2 = scmp.lt.s32.totalorder %s2299_s12, 3  ;;  %s2301_s18 = smov [#allocation5]  }
   0x7   : > { %s102_s19 = sshll.u32 %s2301_s18, 4  ;;  %s2302_s20 = smov 128   ;;  %s103_s19 = int_to_ptr.vmem [resolvable:$true] %s102_s19 }
   0x8   : > { %p2348_p3 = pnand %p1988_p0, %p89_p2  ;;  %s2303_s21 = smov 8  }
   0x9   : > { %s2357_s22 = sadd.s32 1, %s2299_s12   ;;  %s23_s24 = sadd.s32 1, %s2295_s11 }
   0xa   : > { %p2015_p4 = pneg %p2348_p3  ;;  %s20_s23 = ssub.s32 %s2299_s12, %s2357_s22 }
   0xb   : > { %p21_p6 = scmp.eq.s32.totalorder %s20_s23, 0  ;;  %p30_p7 = scmp.ne.s32.totalorder %s2295_s11, %s2291_s10 }
   0xc   : > { %p2016_p5 = pnand %p2015_p4, %p37_p1  ;;  %p31_p8 = scmp.eq.s32.totalorder %s2299_s12, 0 }
   0xd   : > { %p36_p9 = scmp.ne.s32.totalorder %s2291_s10, %s2287_s9  ;;  %p2024_p12 = scmp.lt.s32.totalorder %s2299_s12, 2 }
   0xe   : > { %2018 = dma.hbm_to_vmem [thread:$0]  (!%p2016_p5), %s101_s15, 8192, %s103_s19, [#allocation6], %s2302_s20, %s2302_s20, %s2303_s21  }
   0xf   : > { %s2367_s25 = scalar_select %p21_p6, %s2295_s11, %s23_s24  }
  0x10   : > { %p32_p10 = por %p31_p8, %p30_p7  ;;  %p2371_p11 = por %p37_p1, %p36_p9 }
  0x11   : > { %s116_s27 = sand.u32 1, %s2295_s11   ;;  %s1992_s29 = sshll.u32 %s2299_s12, 3 }
  0x12   : > { %s1991_s28 = sshll.u32 %s116_s27, 3  ;;  %s124_s4 = scalar_lea.hbm %s3877_s0, %s1992_s29 }
  0x13   : > { %s120_s5 = scalar_lea.vmem [#allocation3], %s1991_s28  ;;  %s126_s7 = sshll.u32 %s124_s4, 4  ;;  %s127_s7 = int_to_ptr.hbm [resolvable:$true] %s126_s7 }
  0x14   : > { %s128_s6 = sshll.u32 %s120_s5, 4  ;;  %p2381_p13 = pnand %p2024_p12, %p32_p10  ;;  %s129_s6 = int_to_ptr.vmem [resolvable:$true] %s128_s6 }
  0x15   : > { %s117_s9 = scalar_lea.sflag [#allocation4], %s116_s27  ;;  %s2231_s13 = sshra.s32 %s127_s7, 4  ;;  %s2232_s13 = int_to_ptr.hbm [resolvable:$true] %s2231_s13 }
  0x16   : > { %s2233_s14 = scalar_lea.hbm %s2232_s13, 8  ;;  %p2235_p2 = pneg %p2381_p13 }
  0x17   : > { %p2234_p0 = scmp.ne.s32.totalorder %s2232_s13, %s2233_s14  ;;  %s2238_s18 = scalar_lea.hbm %s3877_s0, 16 }
  0x18   : > { %p2239_p6 = scmp.lt.s32.totalorder %s2232_s13, %s3877_s0  ;;  %p2240_p7 = scmp.lt.s32.totalorder %s2238_s18, %s2233_s14 }
  0x19   : > { %p2236_p4 = pnand %p2235_p2, %p2234_p0 }
  0x1a   : > { %p2241_p8 = por %p2240_p7, %p2239_p6 }
  0x1b   : > { %p2237_p5 = pneg %p2236_p4 }
  0x1d   : > { %p2242_p9 = pnand %p2241_p8, %p2237_p5 }
  0x1f   : > { %2245 = shalt.err (!%p2242_p9)
}
  0x20   : > { %2022 = dma.hbm_to_vmem [thread:$0]  (!%p2381_p13), %s127_s7, 128, %s129_s6, %s117_s9  }
  0x21   : > { %137 = sbr.rel (%p2348_p3) target bundleno = 1518 (0x5ee), region = 28  ;;  %s139_s21 = sand.u32 (!%p2348_p3), 1, %s2291_s10  }
  0x22   : > { %s1994_s23 = sshll.u32 (!%p2348_p3), %s139_s21, 3  ;;  %s140_s24 = scalar_lea.sflag (!%p2348_p3), [#allocation4], %s139_s21 }
  0x23   : > { %s143_s27 = scalar_lea.vmem (!%p2348_p3), [#allocation3], %s1994_s23 }
  0x26   : > { %2278 = dma.done.wait (%p2371_p11), %s140_s24, 128  }
  0x27   : > { %2280 = vsyncadd (%p2371_p11), %s140_s24, 4294967168 }
  0x28   : > { %2282 = dma.done.wait (%p37_p1), [#allocation6], 8192  }
  0x29   : > { %2284 = vsyncadd (%p37_p1), [#allocation6], 4294959104  ;;  %v165_v0 = vld [vmem:[%s143_s27] sm:$0xff]  ;;  %v166_v1 = vld [vmem:[#allocation5] sm:$0xff]  ;;  %s1996_s17 = sshll.u32 %s2343_s16, 6  ;;  %p2006_p1 = scmp.ne.s32.totalorder %s2343_s16, 1 }
  0x2a   : > { %v172_v2 = vld [vmem:[#allocation5 + $0x40] sm:$0xff]  ;;  %v2406_v3 = vperm.slane %v165_v0, 0  ;;  %v2408_v4 = vperm.slane %v165_v0, 1  ;;  %v2410_v6 = vperm.slane %v165_v0, 2  ;;  %v2412_v8 = vperm.slane %v165_v0, 3  ;;  %v167_v18 = vld [vmem:[#allocation5 + $0x8] sm:$0xff] }
  0x2b   : > { %v180_v5 = vld [vmem:[#allocation5 + $0x80] sm:$0xff]  ;;  %v2414_v10 = vperm.slane %v165_v0, 4  ;;  %v2416_v12 = vperm.slane %v165_v0, 5  ;;  %v2418_v13 = vperm.slane %v165_v0, 6  ;;  %v173_v19 = vld [vmem:[#allocation5 + $0x48] sm:$0xff]  ;;  %v2424_v22 = vperm.slane %v165_v0, 7 }
  0x2c   : > { %v188_v7 = vld [vmem:[#allocation5 + $0xc0] sm:$0xff]  ;;  %v169_v14 = vmul.f32 %v2406_v3, %v166_v1  ;;  %v175_v15 = vmul.f32 %v2408_v4, %v172_v2  ;;  %v183_v16 = vmul.f32 %v2410_v6, %v180_v5  ;;  %v181_v23 = vld [vmem:[#allocation5 + $0x88] sm:$0xff]  ;;  %v170_v26 = vmul.f32 %v2406_v3, %v167_v18  ;;  %v232_v35 = vld [vmem:[#allocation5 + $0x10] sm:$0xff]  ;;  %s2461_s26 = scalar_lea.vmem [#allocation2], %s1996_s17 }
  0x2d   : > { %v196_v9 = vld [vmem:[#allocation5 + $0x100] sm:$0xff]  ;;  %v191_v20 = vmul.f32 %v2412_v8, %v188_v7  ;;  %v189_v24 = vld [vmem:[#allocation5 + $0xc8] sm:$0xff]  ;;  %v176_v27 = vmul.f32 %v2408_v4, %v173_v19  ;;  %v184_v28 = vmul.f32 %v2410_v6, %v181_v23  ;;  %v237_v36 = vld [vmem:[#allocation5 + $0x50] sm:$0xff]  ;;  %v234_v45 = vmul.f32 %v232_v35, %v2406_v3 }
  0x2e   : > { %v204_v11 = vld [vmem:[#allocation5 + $0x140] sm:$0xff]  ;;  %v177_v25 = vadd.f32 %v175_v15, %v169_v14  ;;  %v197_v29 = vld [vmem:[#allocation5 + $0x108] sm:$0xff]  ;;  %v199_v32 = vmul.f32 %v2414_v10, %v196_v9  ;;  %v244_v37 = vld [vmem:[#allocation5 + $0x90] sm:$0xff]  ;;  %v192_v41 = vmul.f32 %v2412_v8, %v189_v24  ;;  %v239_v46 = vmul.f32 %v237_v36, %v2408_v4 }
  0x2f   : > { %v212_v17 = vld [vmem:[#allocation5 + $0x180] sm:$0xff]  ;;  %v205_v30 = vld [vmem:[#allocation5 + $0x148] sm:$0xff]  ;;  %v207_v33 = vmul.f32 %v2416_v12, %v204_v11  ;;  %v178_v40 = vadd.f32 %v176_v27, %v170_v26  ;;  %v251_v43 = vld [vmem:[#allocation5 + $0xd0] sm:$0xff]  ;;  %v200_v44 = vmul.f32 %v2414_v10, %v197_v29  ;;  %v246_v47 = vmul.f32 %v244_v37, %v2410_v6 }
  0x30   : > { %v220_v21 = vld [vmem:[#allocation5 + $0x1c0] sm:$0xff]  ;;  %v213_v31 = vld [vmem:[#allocation5 + $0x188] sm:$0xff]  ;;  %v215_v34 = vmul.f32 %v2418_v13, %v212_v17  ;;  %v185_v38 = vadd.f32 %v183_v16, %v177_v25  ;;  %v258_v48 = vld [vmem:[#allocation5 + $0x110] sm:$0xff]  ;;  %v208_v53 = vmul.f32 %v2416_v12, %v205_v30  ;;  %v241_v59 = vadd.f32 %v239_v46, %v234_v45 }
  0x31   : > { %v223_v39 = vmul.f32 %v2424_v22, %v220_v21  ;;  %v221_v42 = vld [vmem:[#allocation5 + $0x1c8] sm:$0xff]  ;;  %v265_v49 = vld [vmem:[#allocation5 + $0x150] sm:$0xff]  ;;  %v233_v50 = vld [vmem:[#allocation5 + $0x18] sm:$0xff]  ;;  %v186_v52 = vadd.f32 %v184_v28, %v178_v40  ;;  %v216_v54 = vmul.f32 %v2418_v13, %v213_v31  ;;  %v253_v60 = vmul.f32 %v251_v43, %v2412_v8 }
  0x32   : > { %v193_v51 = vadd.f32 %v191_v20, %v185_v38  ;;  %v272_v55 = vld [vmem:[#allocation5 + $0x190] sm:$0xff]  ;;  %v238_v56 = vld [vmem:[#allocation5 + $0x58] sm:$0xff]  ;;  %v224_v58 = vmul.f32 %v2424_v22, %v221_v42  ;;  %v235_v61 = vmul.f32 %v233_v50, %v2406_v3  ;;  %v290_v7 = vld [vmem:[#allocation5 + $0x20] sm:$0xff]  ;;  %v248_v11 = vadd.f32 %v246_v47, %v241_v59 }
  0x33   : > { %v245_v57 = vld [vmem:[#allocation5 + $0x98] sm:$0xff]  ;;  %v194_v0 = vadd.f32 %v192_v41, %v186_v52  ;;  %v240_v1 = vmul.f32 %v238_v56, %v2408_v4  ;;  %v295_v9 = vld [vmem:[#allocation5 + $0x60] sm:$0xff]  ;;  %v260_v14 = vmul.f32 %v258_v48, %v2414_v10  ;;  %v267_v15 = vmul.f32 %v265_v49, %v2416_v12  ;;  %v279_v20 = vld [vmem:[#allocation5 + $0x1d0] sm:$0xff] }
  0x34   : > { %v252_v62 = vld [vmem:[#allocation5 + $0xd8] sm:$0xff]  ;;  %v201_v63 = vadd.f32 %v199_v32, %v193_v51  ;;  %v247_v2 = vmul.f32 %v245_v57, %v2410_v6  ;;  %v274_v16 = vmul.f32 %v272_v55, %v2418_v13  ;;  %v302_v17 = vld [vmem:[#allocation5 + $0xa0] sm:$0xff]  ;;  %v255_v25 = vadd.f32 %v253_v60, %v248_v11  ;;  %v291_v42 = vld [vmem:[#allocation5 + $0x28] sm:$0xff] }
  0x35   : > { %v259_v5 = vld [vmem:[#allocation5 + $0x118] sm:$0xff]  ;;  %v202_v19 = vadd.f32 %v200_v44, %v194_v0  ;;  %v242_v21 = vadd.f32 %v240_v1, %v235_v61  ;;  %v254_v23 = vmul.f32 %v252_v62, %v2412_v8  ;;  %v309_v24 = vld [vmem:[#allocation5 + $0xe0] sm:$0xff]  ;;  %v292_v28 = vmul.f32 %v290_v7, %v2406_v3  ;;  %v296_v43 = vld [vmem:[#allocation5 + $0x68] sm:$0xff] }
  0x36   : > { %v209_v18 = vadd.f32 %v207_v33, %v201_v63  ;;  %v261_v26 = vmul.f32 %v259_v5, %v2414_v10  ;;  %v266_v27 = vld [vmem:[#allocation5 + $0x158] sm:$0xff]  ;;  %v297_v29 = vmul.f32 %v295_v9, %v2408_v4  ;;  %v304_v33 = vmul.f32 %v302_v17, %v2410_v6  ;;  %v316_v36 = vld [vmem:[#allocation5 + $0x120] sm:$0xff]  ;;  %v303_v48 = vld [vmem:[#allocation5 + $0xa8] sm:$0xff] }
  0x37   : > { %v210_v31 = vadd.f32 %v208_v53, %v202_v19  ;;  %v249_v32 = vadd.f32 %v247_v2, %v242_v21  ;;  %v273_v35 = vld [vmem:[#allocation5 + $0x198] sm:$0xff]  ;;  %v262_v37 = vadd.f32 %v260_v14, %v255_v25  ;;  %v281_v38 = vmul.f32 %v279_v20, %v2424_v22  ;;  %v323_v47 = vld [vmem:[#allocation5 + $0x160] sm:$0xff]  ;;  %v310_v55 = vld [vmem:[#allocation5 + $0xe8] sm:$0xff] }
  0x38   : > { %v217_v30 = vadd.f32 %v215_v34, %v209_v18  ;;  %v299_v40 = vadd.f32 %v297_v29, %v292_v28  ;;  %v311_v41 = vmul.f32 %v309_v24, %v2412_v8  ;;  %v268_v34 = vmul.f32 %v266_v27, %v2416_v12  ;;  %v280_v51 = vld [vmem:[#allocation5 + $0x1d8] sm:$0xff]  ;;  %v330_v56 = vld [vmem:[#allocation5 + $0x1a0] sm:$0xff]  ;;  %v317_v60 = vld [vmem:[#allocation5 + $0x128] sm:$0xff] }
  0x39   : > { %v218_v45 = vadd.f32 %v216_v54, %v210_v31  ;;  %v256_v46 = vadd.f32 %v254_v23, %v249_v32  ;;  %v269_v49 = vadd.f32 %v267_v15, %v262_v37  ;;  %v275_v50 = vmul.f32 %v273_v35, %v2418_v13  ;;  %v348_v1 = vld [vmem:[#allocation5 + $0x30] sm:$0xff]  ;;  %v324_v14 = vld [vmem:[#allocation5 + $0x168] sm:$0xff]  ;;  %v349_v28 = vld [vmem:[#allocation5 + $0x38] sm:$0xff] }
  0x3a   : > { %v225_v44 = vadd.f32 %v223_v39, %v217_v30  ;;  %v306_v52 = vadd.f32 %v304_v33, %v299_v40  ;;  %v318_v53 = vmul.f32 %v316_v36, %v2414_v10  ;;  %v293_v57 = vmul.f32 %v291_v42, %v2406_v3  ;;  %v353_v2 = vld [vmem:[#allocation5 + $0x70] sm:$0xff]  ;;  %v331_v24 = vld [vmem:[#allocation5 + $0x1a8] sm:$0xff]  ;;  %v354_v35 = vld [vmem:[#allocation5 + $0x78] sm:$0xff] }
  0x3b   : > { %v226_v39 = vadd.f32 %v224_v58, %v218_v45  ;;  %v263_v54 = vadd.f32 %v261_v26, %v256_v46  ;;  %v298_v59 = vmul.f32 %v296_v43, %v2408_v4  ;;  %v276_v61 = vadd.f32 %v274_v16, %v269_v49  ;;  %v337_v58 = vld [vmem:[#allocation5 + $0x1e0] sm:$0xff]  ;;  %v360_v15 = vld [vmem:[#allocation5 + $0xb0] sm:$0xff]  ;;  %v361_v33 = vld [vmem:[#allocation5 + $0xb8] sm:$0xff] }
  0x3c   : > { %229 = vst [vmem:[%s2461_s26] sm:$0xff] %v225_v44  ;;  %v313_v62 = vadd.f32 %v311_v41, %v306_v52  ;;  %v325_v63 = vmul.f32 %v323_v47, %v2416_v12  ;;  %v305_v0 = vmul.f32 %v303_v48, %v2410_v6  ;;  %v282_v7 = vmul.f32 %v280_v51, %v2424_v22  ;;  %v367_v20 = vld [vmem:[#allocation5 + $0xf0] sm:$0xff] }
  0x3d   : > { %230 = vst [vmem:[%s2461_s26 + $0x8] sm:$0xff] %v226_v39  ;;  %v270_v5 = vadd.f32 %v268_v34, %v263_v54  ;;  %v300_v9 = vadd.f32 %v298_v59, %v293_v57  ;;  %v312_v11 = vmul.f32 %v310_v55, %v2412_v8  ;;  %v283_v17 = vadd.f32 %v281_v38, %v276_v61  ;;  %v374_v27 = vld [vmem:[#allocation5 + $0x130] sm:$0xff]  ;;  %v338_v38 = vld [vmem:[#allocation5 + $0x1e8] sm:$0xff]  ;;  %v368_v34 = vld [vmem:[#allocation5 + $0xf8] sm:$0xff] }
  0x3e   : > { %v320_v16 = vadd.f32 %v318_v53, %v313_v62  ;;  %v332_v18 = vmul.f32 %v330_v56, %v2418_v13  ;;  %v319_v19 = vmul.f32 %v317_v60, %v2414_v10  ;;  %v350_v25 = vmul.f32 %v348_v1, %v2406_v3  ;;  %v381_v42 = vld [vmem:[#allocation5 + $0x170] sm:$0xff]  ;;  %v375_v39 = vld [vmem:[#allocation5 + $0x138] sm:$0xff] }
  0x3f   : > { %v277_v21 = vadd.f32 %v275_v50, %v270_v5  ;;  %v307_v23 = vadd.f32 %v305_v0, %v300_v9  ;;  %v355_v26 = vmul.f32 %v353_v2, %v2408_v4  ;;  %1998 = vst [vmem:[%s2461_s26 + $0x10] sm:$0xff] %v283_v17  ;;  %v339_v30 = vmul.f32 %v337_v58, %v2424_v22  ;;  %v388_v49 = vld [vmem:[#allocation5 + $0x1b0] sm:$0xff]  ;;  %v382_v61 = vld [vmem:[#allocation5 + $0x178] sm:$0xff] }
  0x40   : > { %v327_v29 = vadd.f32 %v325_v63, %v320_v16  ;;  %v326_v31 = vmul.f32 %v324_v14, %v2416_v12  ;;  %v362_v32 = vmul.f32 %v360_v15, %v2410_v6  ;;  %v369_v41 = vmul.f32 %v367_v20, %v2412_v8  ;;  %v395_v57 = vld [vmem:[#allocation5 + $0x1f0] sm:$0xff]  ;;  %v389_v1 = vld [vmem:[#allocation5 + $0x1b8] sm:$0xff] }
  0x41   : > { %v284_v36 = vadd.f32 %v282_v7, %v277_v21  ;;  %v314_v37 = vadd.f32 %v312_v11, %v307_v23  ;;  %v357_v40 = vadd.f32 %v355_v26, %v350_v25  ;;  %v333_v44 = vmul.f32 %v331_v24, %v2418_v13 }
  0x42   : > { %v334_v43 = vadd.f32 %v332_v18, %v327_v29  ;;  %v376_v45 = vmul.f32 %v374_v27, %v2414_v10  ;;  %v351_v46 = vmul.f32 %v349_v28, %v2406_v3  ;;  %v356_v50 = vmul.f32 %v354_v35, %v2408_v4 }
  0x43   : > { %1999 = vst [vmem:[%s2461_s26 + $0x18] sm:$0xff] %v284_v36  ;;  %v321_v47 = vadd.f32 %v319_v19, %v314_v37  ;;  %v364_v48 = vadd.f32 %v362_v32, %v357_v40  ;;  %v363_v51 = vmul.f32 %v361_v33, %v2410_v6  ;;  %v340_v53 = vmul.f32 %v338_v38, %v2424_v22 }
  0x44   : > { %v341_v52 = vadd.f32 %v339_v30, %v334_v43  ;;  %v383_v55 = vmul.f32 %v381_v42, %v2416_v12  ;;  %v358_v3 = vadd.f32 %v356_v50, %v351_v46  ;;  %v370_v59 = vmul.f32 %v368_v34, %v2412_v8  ;;  %v396_v8 = vld [vmem:[#allocation5 + $0x1f8] sm:$0xff] }
  0x45   : > { %v328_v54 = vadd.f32 %v326_v31, %v321_v47  ;;  %v371_v56 = vadd.f32 %v369_v41, %v364_v48  ;;  %v390_v60 = vmul.f32 %v388_v49, %v2418_v13  ;;  %v377_v63 = vmul.f32 %v375_v39, %v2414_v10 }
  0x46   : > { %2001 = vst [vmem:[%s2461_s26 + $0x20] sm:$0xff] %v341_v52  ;;  %v365_v6 = vadd.f32 %v363_v51, %v358_v3  ;;  %v397_v0 = vmul.f32 %v395_v57, %v2424_v22  ;;  %v384_v58 = vmul.f32 %v382_v61, %v2416_v12  ;;  %v391_v14 = vmul.f32 %v389_v1, %v2418_v13 }
  0x47   : > { %v335_v4 = vadd.f32 %v333_v44, %v328_v54  ;;  %v378_v62 = vadd.f32 %v376_v45, %v371_v56  ;;  %v398_v16 = vmul.f32 %v396_v8, %v2424_v22 }
  0x48   : > { %v372_v7 = vadd.f32 %v370_v59, %v365_v6 }
  0x49   : > { %v342_v2 = vadd.f32 %v340_v53, %v335_v4  ;;  %v385_v5 = vadd.f32 %v383_v55, %v378_v62 }
  0x4a   : > { %v379_v11 = vadd.f32 %v377_v63, %v372_v7 }
  0x4b   : > { %2002 = vst [vmem:[%s2461_s26 + $0x28] sm:$0xff] %v342_v2  ;;  %v392_v9 = vadd.f32 %v390_v60, %v385_v5 }
  0x4c   : > { %v386_v17 = vadd.f32 %v384_v58, %v379_v11 }
  0x4d   : > { %v399_v15 = vadd.f32 %v397_v0, %v392_v9 }
  0x4e   : > { %v393_v10 = vadd.f32 %v391_v14, %v386_v17  ;;  %408 = sbr.rel (%p2006_p1) target bundleno = 1518 (0x5ee), region = 40 }
  0x4f   : > { %2004 = vst [vmem:[%s2461_s26 + $0x30] sm:$0xff] %v399_v15 }
  0x50   : > { %v400_v18 = vadd.f32 %v398_v16, %v393_v10 }
  0x52   : > { %2005 = vst [vmem:[%s2461_s26 + $0x38] sm:$0xff] %v400_v18 }
  0x53   : > { %v2304_v19 = vmov 1.0  }
  0x54   : > { %409 = vadd.xlane.f32.xlu0 %v2304_v19 }
  0x59   : > { %v2500_v24 = vld [vmem:[#allocation2 + $0x18] sm:$0xff]  ;;  %v2502_v13 = vld [vmem:[#allocation2 + $0x8] sm:$0xff]  ;;  %v2504_v25 = vld [vmem:[#allocation2] sm:$0xff] }
  0x5a   : > { %v2509_v29 = vld [vmem:[#allocation2 + $0x40] sm:$0xff]  ;;  %v2511_v30 = vld [vmem:[#allocation2 + $0x10] sm:$0xff]  ;;  %v2513_v31 = vld [vmem:[#allocation2 + $0x48] sm:$0xff] }
  0x5b   : > { %v2518_v36 = vld [vmem:[#allocation2 + $0x58] sm:$0xff]  ;;  %v2520_v37 = vld [vmem:[#allocation2 + $0x50] sm:$0xff]  ;;  %v2522_v38 = vld [vmem:[#allocation2 + $0x20] sm:$0xff] }
  0x5c   : > { %v2527_v43 = vld [vmem:[#allocation2 + $0x60] sm:$0xff]  ;;  %v2529_v44 = vld [vmem:[#allocation2 + $0x28] sm:$0xff]  ;;  %v2536_v48 = vld [vmem:[#allocation2 + $0x38] sm:$0xff] }
  0x5d   : > { %v2531_v45 = vld [vmem:[#allocation2 + $0x68] sm:$0xff]  ;;  %v2538_v49 = vld [vmem:[#allocation2 + $0x30] sm:$0xff]  ;;  %v2545_v55 = vld [vmem:[#allocation2 + $0x78] sm:$0xff] }
  0x5e   : > { %v2540_v50 = vld [vmem:[#allocation2 + $0x70] sm:$0xff] }
  0xc7   : > { %v410_v12 = vpop.xlane.xlu0 %409 }
  0xc8   : > { %2066 = vrcp.f32 %v410_v12 }
  0xce   : > { %v2067_v20 = vpop.eup %2066 }
  0xcf   : > { %v412_v21 = vmul.f32 %v2067_v20, %v410_v12 }
  0xd1   : > { %v413_v23 = vsub.f32 2.0, %v412_v21 }
  0xd3   : > { %v414_v22 = vmul.f32 %v2067_v20, %v413_v23 }
  0xd5   : > { %v426_v26 = vmul.f32 %v2500_v24, %v414_v22  ;;  %v424_v27 = vmul.f32 %v2502_v13, %v414_v22  ;;  %v423_v28 = vmul.f32 %v2504_v25, %v414_v22  ;;  %v648_v32 = vmul.f32 %v2509_v29, %v414_v22 }
  0xd6   : > { %v425_v35 = vmul.f32 %v2511_v30, %v414_v22  ;;  %v649_v33 = vmul.f32 %v2513_v31, %v414_v22  ;;  %v651_v40 = vmul.f32 %v2518_v36, %v414_v22  ;;  %v650_v41 = vmul.f32 %v2520_v37, %v414_v22 }
  0xd7   : > { %437 = vadd.xlane.f32.xlu2 %v426_v26  ;;  %433 = vadd.xlane.f32.xlu1 %v424_v27  ;;  %v427_v42 = vmul.f32 %v2522_v38, %v414_v22  ;;  %v652_v46 = vmul.f32 %v2527_v43, %v414_v22  ;;  %v428_v34 = vmul.f32 %v2529_v44, %v414_v22 }
  0xd8   : > { %431 = vadd.xlane.f32.xlu0 %v423_v28  ;;  %v653_v47 = vmul.f32 %v2531_v45, %v414_v22  ;;  %v430_v51 = vmul.f32 %v2536_v48, %v414_v22  ;;  %v429_v52 = vmul.f32 %v2538_v49, %v414_v22  ;;  %v654_v53 = vmul.f32 %v2540_v50, %v414_v22 }
  0xd9   : > { %v655_v39 = vmul.f32 %v2545_v55, %v414_v22 }
  0xdf   : > { %656 = vadd.xlane.f32.xlu2 %v648_v32  ;;  %435 = vadd.xlane.f32.xlu1 %v425_v35 }
  0xe0   : > { %658 = vadd.xlane.f32.xlu0 %v649_v33 }
  0xe7   : > { %662 = vadd.xlane.f32.xlu2 %v651_v40  ;;  %660 = vadd.xlane.f32.xlu1 %v650_v41 }
  0xe8   : > { %439 = vadd.xlane.f32.xlu0 %v427_v42 }
  0xef   : > { %664 = vadd.xlane.f32.xlu2 %v652_v46  ;;  %441 = vadd.xlane.f32.xlu1 %v428_v34 }
  0xf0   : > { %666 = vadd.xlane.f32.xlu0 %v653_v47 }
  0xf7   : > { %445 = vadd.xlane.f32.xlu2 %v430_v51  ;;  %443 = vadd.xlane.f32.xlu1 %v429_v52 }
  0xf8   : > { %668 = vadd.xlane.f32.xlu0 %v654_v53 }
  0xff   : > { %670 = vadd.xlane.f32.xlu1 %v655_v39 }
 0x14a   : > { %v438_v54 = vpop.xlane.xlu2 %437  ;;  %v434_v56 = vpop.xlane.xlu1 %433 }
 0x14b   : > { %v466_v57 = vmul.f32 %v438_v54, %v438_v54  ;;  %v464_v3 = vmul.f32 %v434_v56, %v434_v56  ;;  %v432_v59 = vpop.xlane.xlu0 %431  ;;  %v450_v6 = vand.u32 2147483647, %v438_v54  ;;  %v448_v63 = vand.u32 2147483647, %v434_v56 }
 0x14c   : > { %v463_v60 = vmul.f32 %v432_v59, %v432_v59  ;;  %v447_v0 = vand.u32 2147483647, %v432_v59 }
 0x14d   : > { %v2548_v61 = vadd.f32 1.0, %v466_v57  ;;  %v2550_v4 = vadd.f32 1.0, %v464_v3  ;;  %v2559_v8 = vmul.f32 %v450_v6, %v438_v54  ;;  %v2566_v15 = vmul.f32 %v448_v63, %v434_v56 }
 0x14e   : > { %v2552_v62 = vadd.f32 1.0, %v463_v60  ;;  %v2578_v20 = vmul.f32 %v447_v0, %v432_v59 }
 0x14f   : > { %2068 = vrcp.f32 %v2548_v61  ;;  %v535_v14 = vand.u32 2147483648, %v2548_v61  ;;  %v503_v19 = vand.u32 2147483647, %v2550_v4  ;;  %v505_v12 = vand.u32 2147483648, %v2550_v4 }
 0x150   : > { %2070 = vrcp.f32 %v2550_v4  ;;  %v488_v22 = vand.u32 2147483647, %v2552_v62  ;;  %v533_v27 = vand.u32 2147483647, %v2548_v61  ;;  %vm499_vm0 = vweird.f32 %v2550_v4 }
 0x151   : > { %2072 = vrcp.f32 %v2552_v62  ;;  %v490_v32 = vand.u32 2147483648, %v2552_v62  ;;  %v2593_v35 = vor.u32 1.1754944e-38, %v535_v14  ;;  %vm484_vm1 = vweird.f32 %v2552_v62 }
 0x152   : > { %v657_v1 = vpop.xlane.xlu2 %656  ;;  %v436_v2 = vpop.xlane.xlu1 %435  ;;  %vm2597_vm2 = vcmp.eq.f32.partialorder %v503_v19, 8.507059e+37  ;;  %v506_v42 = vor.u32 1.1754944e-38, %v505_v12  ;;  %vm2602_vm3 = vcmp.eq.f32.partialorder %v488_v22, 8.507059e+37  ;;  %vm529_vm6 = vweird.f32 %v2548_v61 }
 0x153   : > { %v688_v5 = vmul.f32 %v657_v1, %v657_v1  ;;  %v465_v7 = vmul.f32 %v436_v2, %v436_v2  ;;  %v2557_v58 = vpop.xlane.xlu0 %658  ;;  %v672_v34 = vand.u32 2147483647, %v657_v1  ;;  %v449_v52 = vand.u32 2147483647, %v436_v2 }
 0x154   : > { %v689_v9 = vmul.f32 %v2557_v58, %v2557_v58  ;;  %v491_v39 = vor.u32 1.1754944e-38, %v490_v32  ;;  %v673_v59 = vand.u32 2147483647, %v2557_v58  ;;  %vm2655_vm13 = vcmp.eq.f32.partialorder %v533_v27, 8.507059e+37 }
 0x155   : > { %v2563_v11 = vpop.eup %2068  ;;  %v2568_v17 = vadd.f32 1.0, %v688_v5  ;;  %v2570_v16 = vadd.f32 1.0, %v465_v7  ;;  %v2617_v63 = vmul.f32 %v672_v34, %v657_v1 }
 0x156   : > { %v2572_v10 = vpop.eup %2070  ;;  %v525_v18 = vmul.f32 %v2563_v11, %v2548_v61  ;;  %v2586_v26 = vadd.f32 1.0, %v689_v9  ;;  %vm530_vm7 = vweird.f32 %v2563_v11  ;;  %v457_v9 = vmul.f32 %v449_v52, %v436_v2 }
 0x157   : > { %v2580_v21 = vpop.eup %2072  ;;  %v495_v23 = vmul.f32 %v2572_v10, %v2550_v4  ;;  %2074 = vrcp.f32 %v2568_v17  ;;  %vm500_vm4 = vweird.f32 %v2572_v10  ;;  %v713_v54 = vand.u32 2147483647, %v2568_v17 }
 0x158   : > { %v480_v28 = vmul.f32 %v2580_v21, %v2552_v62  ;;  %2076 = vrcp.f32 %v2570_v16  ;;  %v526_v40 = vsub.f32 1.0, %v525_v18  ;;  %vm485_vm5 = vweird.f32 %v2580_v21  ;;  %vm2625_vm8 = vmor %vm499_vm0, %vm500_vm4 }
 0x159   : > { %v496_v33 = vsub.f32 1.0, %v495_v23  ;;  %2078 = vrcp.f32 %v2586_v26  ;;  %v715_v3 = vand.u32 2147483648, %v2568_v17  ;;  %vm709_vm9 = vweird.f32 %v2568_v17  ;;  %vm2638_vm11 = vmor %vm484_vm1, %vm485_vm5 }
 0x15a   : > { %v481_v46 = vsub.f32 1.0, %v480_v28  ;;  %v527_v60 = vmul.f32 %v2563_v11, %v526_v40  ;;  %vm514_vm10 = vweird.f32 %v2570_v16  ;;  %vm2642_vm12 = vcmp.eq.f32.partialorder %v713_v54, 8.507059e+37  ;;  %v2652_v22 = vpop.xlane.xlu2 %662 }
 0x15b   : > { %v497_v47 = vmul.f32 %v2572_v10, %v496_v33  ;;  %v518_v2 = vand.u32 2147483647, %v2570_v16  ;;  %v716_v12 = vor.u32 1.1754944e-38, %v715_v3  ;;  %v520_v62 = vand.u32 2147483648, %v2570_v16 }
 0x15c   : > { %v482_v53 = vmul.f32 %v2580_v21, %v481_v46  ;;  %v528_v28 = vadd.f32 %v2563_v11, %v527_v60  ;;  %v2660_v46 = vpop.xlane.xlu1 %660  ;;  %vm724_vm15 = vweird.f32 %v2586_v26  ;;  %v691_v54 = vmul.f32 %v2652_v22, %v2652_v22 }
 0x15d   : > { %v2075_v56 = vpop.eup %2074  ;;  %v498_v57 = vadd.f32 %v2572_v10, %v497_v47  ;;  %v728_v47 = vand.u32 2147483647, %v2586_v26  ;;  %v690_v3 = vmul.f32 %v2660_v46, %v2660_v46  ;;  %vm519_vm5 = vcmp.eq.f32.partialorder %v518_v2, 8.507059e+37 }
 0x15e   : > { %v483_v6 = vadd.f32 %v2580_v21, %v482_v53  ;;  %v705_v0 = vmul.f32 %v2075_v56, %v2568_v17  ;;  %v2077_v5 = vpop.eup %2076  ;;  %vm710_vm14 = vweird.f32 %v2075_v56  ;;  %v2681_v60 = vadd.f32 1.0, %v691_v54 }
 0x15f   : > { %v502_v1 = vsel %vm2625_vm8, %v2572_v10, %v498_v57  ;;  %v2079_v19 = vpop.eup %2078  ;;  %v510_v23 = vmul.f32 %v2077_v5, %v2570_v16  ;;  %vm2672_vm0 = vmor %vm709_vm9, %vm710_vm14  ;;  %vm515_vm1 = vweird.f32 %v2077_v5  ;;  %v2699_v61 = vadd.f32 1.0, %v690_v3 }
 0x160   : > { %v706_v4 = vsub.f32 1.0, %v705_v0  ;;  %v487_v10 = vsel %vm2638_vm11, %v2580_v21, %v483_v6  ;;  %v720_v40 = vmul.f32 %v2079_v19, %v2586_v26  ;;  %v507_v21 = vsel %vm2597_vm2, %v506_v42, %v502_v1  ;;  %vm516_vm4 = vmor %vm514_vm10, %vm515_vm1 }
 0x161   : > { %v511_v34 = vsub.f32 1.0, %v510_v23  ;;  %v492_v27 = vsel %vm2602_vm3, %v491_v39, %v487_v10  ;;  %v730_v42 = vand.u32 2147483648, %v2586_v26  ;;  %vm725_vm2 = vweird.f32 %v2079_v19  ;;  %vm2687_vm3 = vmor %vm529_vm6, %vm530_vm7 }
 0x162   : > { %v707_v33 = vmul.f32 %v2075_v56, %v706_v4  ;;  %v721_v53 = vsub.f32 1.0, %v720_v40  ;;  %v508_v6 = vmul.f32 %v507_v21, %v2566_v15  ;;  %v493_v0 = vmul.f32 %v492_v27, %v2578_v20  ;;  %vm726_vm6 = vmor %vm724_vm15, %vm725_vm2 }
 0x163   : > { %v512_v41 = vmul.f32 %v2077_v5, %v511_v34  ;;  %v521_v1 = vor.u32 1.1754944e-38, %v520_v62  ;;  %2080 = vrcp.f32 %v2681_v60  ;;  %v731_v20 = vor.u32 1.1754944e-38, %v730_v42 }
 0x164   : > { %v708_v52 = vadd.f32 %v2075_v56, %v707_v33  ;;  %v722_v39 = vmul.f32 %v2079_v19, %v721_v53  ;;  %vm729_vm7 = vcmp.eq.f32.partialorder %v728_v47, 8.507059e+37  ;;  %v600_v18 = vmul.f32 %v508_v6, %v2502_v13 }
 0x165   : > { %v513_v7 = vadd.f32 %v2077_v5, %v512_v41  ;;  %2082 = vrcp.f32 %v2699_v61  ;;  %v675_v33 = vand.u32 2147483647, %v2652_v22  ;;  %vm754_vm8 = vweird.f32 %v2681_v60 }
 0x166   : > { %v712_v51 = vsel %vm2672_vm0, %v2075_v56, %v708_v52  ;;  %v532_v56 = vsel %vm2687_vm3, %v2563_v11, %v528_v28  ;;  %v723_v14 = vadd.f32 %v2079_v19, %v722_v39  ;;  %v681_v11 = vmul.f32 %v673_v59, %v2557_v58 }
 0x167   : > { %v717_v4 = vsel %vm2642_vm12, %v716_v12, %v712_v51  ;;  %v517_v15 = vsel %vm516_vm4, %v2077_v5, %v513_v7  ;;  %v537_v23 = vsel %vm2655_vm13, %v2593_v35, %v532_v56  ;;  %v599_v5 = vmul.f32 %v493_v0, %v2504_v25  ;;  %v2714_v12 = vpop.xlane.xlu0 %439  ;;  %v2742_v0 = vpop.xlane.xlu1 %441 }
 0x168   : > { %v522_v10 = vsel %vm519_vm5, %v521_v1, %v517_v15  ;;  %v727_v16 = vsel %vm726_vm6, %v2079_v19, %v723_v14  ;;  %v718_v26 = vmul.f32 %v717_v4, %v2617_v63  ;;  %v538_v59 = vmul.f32 %v537_v23, %v2559_v8  ;;  %v665_v19 = vpop.xlane.xlu2 %664 }
 0x169   : > { %v732_v2 = vsel %vm729_vm7, %v731_v20, %v727_v16  ;;  %v523_v62 = vmul.f32 %v522_v10, %v457_v9  ;;  %v2718_v58 = vpop.eup %2080  ;;  %v467_v35 = vmul.f32 %v2714_v12, %v2714_v12  ;;  %v607_v32 = vadd.f32 %v600_v18, %v599_v5 }
 0x16a   : > { %v733_v28 = vmul.f32 %v732_v2, %v681_v11  ;;  %v750_v40 = vmul.f32 %v2718_v58, %v2681_v60  ;;  %v824_v63 = vmul.f32 %v718_v26, %v2509_v29  ;;  %v674_v8 = vand.u32 2147483647, %v2660_v46 }
 0x16b   : > { %v601_v9 = vmul.f32 %v523_v62, %v2511_v30  ;;  %v2729_v34 = vadd.f32 1.0, %v467_v35  ;;  %v692_v27 = vmul.f32 %v665_v19, %v665_v19  ;;  %v2083_v52 = vpop.eup %2082  ;;  %v602_v53 = vmul.f32 %v538_v59, %v2500_v24 }
 0x16c   : > { %v825_v21 = vmul.f32 %v733_v28, %v2513_v31  ;;  %v751_v47 = vsub.f32 1.0, %v750_v40  ;;  %v608_v54 = vrot.slane %v607_v32, 4  ;;  %v735_v41 = vmul.f32 %v2083_v52, %v2699_v61 }
 0x16d   : > { %2084 = vrcp.f32 %v2729_v34  ;;  %v614_v42 = vadd.f32 %v602_v53, %v601_v9  ;;  %v683_v51 = vmul.f32 %v675_v33, %v2652_v22  ;;  %v2737_v39 = vadd.f32 1.0, %v692_v27 }
 0x16e   : > { %v752_v57 = vmul.f32 %v2718_v58, %v751_v47  ;;  %v832_v3 = vadd.f32 %v825_v21, %v824_v63  ;;  %v758_v17 = vand.u32 2147483647, %v2681_v60  ;;  %v682_v6 = vmul.f32 %v674_v8, %v2660_v46 }
 0x16f   : > { %v736_v24 = vsub.f32 1.0, %v735_v41  ;;  %vm755_vm9 = vweird.f32 %v2718_v58  ;;  %v760_v7 = vand.u32 2147483648, %v2681_v60  ;;  %v743_v1 = vand.u32 2147483647, %v2699_v61  ;;  %v2755_v10 = vpop.xlane.xlu0 %666 }
 0x170   : > { %2086 = vrcp.f32 %v2737_v39  ;;  %v2748_v22 = vadd.f32 %v608_v54, %v607_v32  ;;  %v753_v56 = vadd.f32 %v2718_v58, %v752_v57  ;;  %vm740_vm10 = vweird.f32 %v2083_v52  ;;  %vm2759_vm12 = vmor %vm754_vm8, %vm755_vm9 }
 0x171   : > { %v737_v14 = vmul.f32 %v2083_v52, %v736_v24  ;;  %v615_v46 = vrot.slane %v614_v42, 4  ;;  %v833_v15 = vrot.slane %v832_v3, 4  ;;  %vm739_vm11 = vweird.f32 %v2699_v61 }
 0x172   : > { %v745_v20 = vand.u32 2147483648, %v2699_v61  ;;  %v451_v23 = vand.u32 2147483647, %v2714_v12  ;;  %v676_v5 = vand.u32 2147483647, %v665_v19  ;;  %vm2766_vm13 = vcmp.eq.f32.partialorder %v758_v17, 8.507059e+37  ;;  %vm2770_vm14 = vmor %vm739_vm11, %vm740_vm10 }
 0x173   : > { %v2751_v4 = vpop.eup %2084  ;;  %v738_v16 = vadd.f32 %v2083_v52, %v737_v14  ;;  %v761_v61 = vor.u32 1.1754944e-38, %v760_v7  ;;  %vm2774_vm15 = vcmp.eq.f32.partialorder %v743_v1, 8.507059e+37  ;;  %v468_v62 = vmul.f32 %v2742_v0, %v2742_v0 }
 0x174   : > { %v540_v18 = vmul.f32 %v2751_v4, %v2729_v34  ;;  %v757_v28 = vsel %vm2759_vm12, %v2718_v58, %v753_v56  ;;  %v693_v32 = vmul.f32 %v2755_v10, %v2755_v10  ;;  %v2789_v40 = vadd.f32 %v615_v46, %v614_v42  ;;  %v2815_v42 = vpop.xlane.xlu1 %443 }
 0x175   : > { %v742_v59 = vsel %vm2770_vm14, %v2083_v52, %v738_v16  ;;  %v2791_v63 = vadd.f32 %v833_v15, %v832_v3  ;;  %v746_v9 = vor.u32 1.1754944e-38, %v745_v20  ;;  %v2793_v21 = vadd.f32 1.0, %v468_v62  ;;  %v2803_v52 = vpop.xlane.xlu2 %445 }
 0x176   : > { %v541_v35 = vsub.f32 1.0, %v540_v18  ;;  %v2787_v33 = vpop.eup %2086  ;;  %v2796_v47 = vmul.f32 %v451_v23, %v2714_v12  ;;  %v548_v58 = vand.u32 2147483647, %v2729_v34  ;;  %v2799_v8 = vmul.f32 %v676_v5, %v665_v19 }
 0x177   : > { %v765_v27 = vmul.f32 %v2787_v33, %v2737_v39  ;;  %v762_v53 = vsel %vm2766_vm13, %v761_v61, %v757_v28  ;;  %v747_v54 = vsel %vm2774_vm15, %v746_v9, %v742_v59  ;;  %v550_v57 = vand.u32 2147483648, %v2729_v34 }
 0x178   : > { %2088 = vrcp.f32 %v2793_v21  ;;  %v542_v12 = vmul.f32 %v2751_v4, %v541_v35  ;;  %vm544_vm0 = vweird.f32 %v2729_v34  ;;  %v2813_v41 = vadd.f32 1.0, %v693_v32 }
 0x179   : > { %v766_v19 = vsub.f32 1.0, %v765_v27  ;;  %v617_v3 = vrot.slane %v2789_v40, 2  ;;  %v835_v17 = vrot.slane %v2791_v63, 2  ;;  %v452_v24 = vand.u32 2147483647, %v2742_v0 }
 0x17a   : > { %v470_v7 = vmul.f32 %v2803_v52, %v2803_v52  ;;  %v763_v1 = vmul.f32 %v762_v53, %v683_v51  ;;  %v748_v56 = vmul.f32 %v747_v54, %v682_v6  ;;  %vm2822_vm1 = vcmp.eq.f32.partialorder %v548_v58, 8.507059e+37 }
 0x17b   : > { %v767_v46 = vmul.f32 %v2787_v33, %v766_v19  ;;  %2090 = vrcp.f32 %v2813_v41  ;;  %v551_v15 = vor.u32 1.1754944e-38, %v550_v57  ;;  %vm769_vm2 = vweird.f32 %v2737_v39 }
 0x17c   : > { %v773_v20 = vand.u32 2147483647, %v2737_v39  ;;  %v775_v11 = vand.u32 2147483648, %v2737_v39  ;;  %v543_v16 = vadd.f32 %v2751_v4, %v542_v12  ;;  %vm545_vm3 = vweird.f32 %v2751_v4 }
 0x17d   : > { %v677_v51 = vand.u32 2147483647, %v2755_v10  ;;  %v2834_v6 = vadd.f32 1.0, %v470_v7  ;;  %v768_v18 = vadd.f32 %v2787_v33, %v767_v46  ;;  %vm770_vm4 = vweird.f32 %v2787_v33  ;;  %vm2846_vm5 = vmor %vm544_vm0, %vm545_vm3 }
 0x17e   : > { %v2089_v23 = vpop.eup %2088  ;;  %v460_v5 = vmul.f32 %v452_v24, %v2742_v0  ;;  %v563_v2 = vand.u32 2147483647, %v2793_v21  ;;  %v827_v61 = vmul.f32 %v763_v1, %v2518_v36  ;;  %v826_v26 = vmul.f32 %v748_v56, %v2520_v37  ;;  %vm2862_vm7 = vmor %vm769_vm2, %vm770_vm4  ;;  %v2881_v24 = vpop.xlane.xlu1 %670 }
 0x17f   : > { %v555_v60 = vmul.f32 %v2089_v23, %v2793_v21  ;;  %v565_v62 = vand.u32 2147483648, %v2793_v21  ;;  %vm2850_vm6 = vcmp.eq.f32.partialorder %v773_v20, 8.507059e+37  ;;  %v776_v0 = vor.u32 1.1754944e-38, %v775_v11 }
 0x180   : > { %2092 = vrcp.f32 %v2834_v6  ;;  %v469_v35 = vmul.f32 %v2815_v42, %v2815_v42  ;;  %v547_v9 = vsel %vm2846_vm5, %v2751_v4, %v543_v16  ;;  %v685_v27 = vmul.f32 %v677_v51, %v2755_v10  ;;  %v2877_v4 = vpop.xlane.xlu0 %668 }
 0x181   : > { %v2091_v32 = vpop.eup %2090  ;;  %v556_v58 = vsub.f32 1.0, %v555_v60  ;;  %v454_v53 = vand.u32 2147483647, %v2803_v52  ;;  %v772_v54 = vsel %vm2862_vm7, %v2787_v33, %v768_v18  ;;  %vm559_vm8 = vweird.f32 %v2793_v21 }
 0x182   : > { %vm2872_vm9 = vcmp.eq.f32.partialorder %v563_v2, 8.507059e+37  ;;  %v780_v39 = vmul.f32 %v2091_v32, %v2813_v41  ;;  %v2879_v12 = vadd.f32 %v827_v61, %v826_v26  ;;  %vm560_vm10 = vweird.f32 %v2089_v23 }
 0x183   : > { %v557_v19 = vmul.f32 %v2089_v23, %v556_v58  ;;  %v566_v10 = vor.u32 1.1754944e-38, %v565_v62  ;;  %v552_v33 = vsel %vm2822_vm1, %v551_v15, %v547_v9  ;;  %v788_v1 = vand.u32 2147483647, %v2813_v41  ;;  %vm561_vm11 = vmor %vm559_vm8, %vm560_vm10 }
 0x184   : > { %v781_v7 = vsub.f32 1.0, %v780_v39  ;;  %v2886_v56 = vadd.f32 1.0, %v469_v35  ;;  %v777_v46 = vsel %vm2850_vm6, %v776_v0, %v772_v54  ;;  %v790_v11 = vand.u32 2147483648, %v2813_v41 }
 0x185   : > { %v558_v20 = vadd.f32 %v2089_v23, %v557_v19  ;;  %v694_v16 = vmul.f32 %v2877_v4, %v2877_v4  ;;  %vm785_vm12 = vweird.f32 %v2091_v32  ;;  %v695_v15 = vmul.f32 %v2881_v24, %v2881_v24 }
 0x186   : > { %v2093_v51 = vpop.eup %2092  ;;  %v782_v14 = vmul.f32 %v2091_v32, %v781_v7  ;;  %2094 = vrcp.f32 %v2886_v56  ;;  %v553_v18 = vmul.f32 %v552_v33, %v2796_v47  ;;  %vm784_vm13 = vweird.f32 %v2813_v41 }
 0x187   : > { %v562_v2 = vsel %vm561_vm11, %v2089_v23, %v558_v20  ;;  %v585_v61 = vmul.f32 %v2093_v51, %v2834_v6  ;;  %v778_v26 = vmul.f32 %v777_v46, %v2799_v8  ;;  %vm789_vm14 = vcmp.eq.f32.partialorder %v788_v1, 8.507059e+37  ;;  %vm786_vm15 = vmor %vm784_vm13, %vm785_vm12 }
 0x188   : > { %v567_v21 = vsel %vm2872_vm9, %v566_v10, %v562_v2  ;;  %v783_v60 = vadd.f32 %v2091_v32, %v782_v14  ;;  %v791_v28 = vor.u32 1.1754944e-38, %v790_v11  ;;  %v2904_v0 = vadd.f32 1.0, %v694_v16 }
 0x189   : > { %v568_v62 = vmul.f32 %v567_v21, %v460_v5  ;;  %v586_v59 = vsub.f32 1.0, %v585_v61  ;;  %v593_v47 = vand.u32 2147483647, %v2834_v6  ;;  %v595_v41 = vand.u32 2147483648, %v2834_v6 }
 0x18a   : > { %v787_v35 = vsel %vm786_vm15, %v2091_v32, %v783_v60  ;;  %v2908_v23 = vadd.f32 1.0, %v695_v15  ;;  %vm590_vm0 = vweird.f32 %v2093_v51  ;;  %2096 = vrcp.f32 %v2904_v0 }
 0x18b   : > { %v792_v9 = vsel %vm789_vm14, %v791_v28, %v787_v35  ;;  %v587_v8 = vmul.f32 %v2093_v51, %v586_v59  ;;  %v840_v5 = vrot.slane %v2879_v12, 4  ;;  %v828_v58 = vmul.f32 %v778_v26, %v2527_v43 }
 0x18c   : > { %v2095_v34 = vpop.eup %2094  ;;  %v604_v54 = vmul.f32 %v568_v62, %v2529_v44  ;;  %v793_v57 = vmul.f32 %v792_v9, %v685_v27  ;;  %vm589_vm1 = vweird.f32 %v2834_v6  ;;  %v453_v39 = vand.u32 2147483647, %v2815_v42 }
 0x18d   : > { %v588_v32 = vadd.f32 %v2093_v51, %v587_v8  ;;  %v570_v19 = vmul.f32 %v2095_v34, %v2886_v56  ;;  %v603_v10 = vmul.f32 %v553_v18, %v2522_v38  ;;  %vm591_vm2 = vmor %vm589_vm1, %vm590_vm0  ;;  %v596_v7 = vor.u32 1.1754944e-38, %v595_v41 }
 0x18e   : > { %v829_v33 = vmul.f32 %v793_v57, %v2531_v45  ;;  %2098 = vrcp.f32 %v2908_v23  ;;  %v462_v1 = vmul.f32 %v454_v53, %v2803_v52  ;;  %vm594_vm3 = vcmp.eq.f32.partialorder %v593_v47, 8.507059e+37 }
 0x18f   : > { %v592_v46 = vsel %vm591_vm2, %v2093_v51, %v588_v32  ;;  %v571_v27 = vsub.f32 1.0, %v570_v19  ;;  %v621_v20 = vadd.f32 %v604_v54, %v603_v10  ;;  %v580_v16 = vand.u32 2147483648, %v2886_v56 }
 0x190   : > { %v846_v11 = vadd.f32 %v829_v33, %v828_v58  ;;  %v597_v6 = vsel %vm594_vm3, %v596_v7, %v592_v46  ;;  %v2097_v14 = vpop.eup %2096  ;;  %v841_v15 = vadd.f32 %v840_v5, %v2879_v12  ;;  %vm575_vm4 = vweird.f32 %v2095_v34 }
 0x191   : > { %v572_v18 = vmul.f32 %v2095_v34, %v571_v27  ;;  %v578_v2 = vand.u32 2147483647, %v2886_v56  ;;  %v461_v61 = vmul.f32 %v453_v39, %v2815_v42  ;;  %v678_v26 = vand.u32 2147483647, %v2877_v4 }
 0x192   : > { %v795_v52 = vmul.f32 %v2097_v14, %v2904_v0  ;;  %v679_v53 = vand.u32 2147483647, %v2881_v24  ;;  %v598_v51 = vmul.f32 %v597_v6, %v462_v1  ;;  %vm574_vm5 = vweird.f32 %v2886_v56 }
 0x193   : > { %v573_v21 = vadd.f32 %v2095_v34, %v572_v18  ;;  %v805_v60 = vand.u32 2147483648, %v2904_v0  ;;  %v622_v12 = vrot.slane %v621_v20, 4  ;;  %v847_v28 = vrot.slane %v846_v11, 4  ;;  %vm576_vm6 = vmor %vm574_vm5, %vm575_vm4 }
 0x194   : > { %v2099_v62 = vpop.eup %2098  ;;  %v581_v59 = vor.u32 1.1754944e-38, %v580_v16  ;;  %v796_v35 = vsub.f32 1.0, %v795_v52  ;;  %vm579_vm7 = vcmp.eq.f32.partialorder %v578_v2, 8.507059e+37  ;;  %vm799_vm8 = vweird.f32 %v2904_v0 }
 0x195   : > { %v577_v47 = vsel %vm576_vm6, %v2095_v34, %v573_v21  ;;  %v810_v42 = vmul.f32 %v2099_v62, %v2908_v23  ;;  %vm800_vm9 = vweird.f32 %v2097_v14  ;;  %v803_v8 = vand.u32 2147483647, %v2904_v0 }
 0x196   : > { %v582_v41 = vsel %vm579_vm7, %v581_v59, %v577_v47  ;;  %v797_v9 = vmul.f32 %v2097_v14, %v796_v35  ;;  %v606_v56 = vmul.f32 %v598_v51, %v2536_v48  ;;  %v806_v58 = vor.u32 1.1754944e-38, %v805_v60  ;;  %vm801_vm10 = vmor %vm799_vm8, %vm800_vm9 }
 0x197   : > { %v583_v5 = vmul.f32 %v582_v41, %v461_v61  ;;  %v811_v54 = vsub.f32 1.0, %v810_v42  ;;  %v623_v57 = vadd.f32 %v622_v12, %v621_v20  ;;  %v848_v32 = vadd.f32 %v847_v28, %v846_v11 }
 0x198   : > { %v798_v39 = vadd.f32 %v2097_v14, %v797_v9  ;;  %v820_v34 = vand.u32 2147483648, %v2908_v23  ;;  %vm815_vm11 = vweird.f32 %v2099_v62  ;;  %v818_v33 = vand.u32 2147483647, %v2908_v23 }
 0x199   : > { %v605_v19 = vmul.f32 %v583_v5, %v2538_v49  ;;  %v812_v10 = vmul.f32 %v2099_v62, %v811_v54  ;;  %v842_v7 = vrot.slane %v841_v15, 2  ;;  %v686_v1 = vmul.f32 %v678_v26, %v2877_v4 }
 0x19a   : > { %v802_v46 = vsel %vm801_vm10, %v2097_v14, %v798_v39  ;;  %vm804_vm12 = vcmp.eq.f32.partialorder %v803_v8, 8.507059e+37  ;;  %vm814_vm13 = vweird.f32 %v2908_v23  ;;  %v624_v6 = vrot.slane %v623_v57, 2 }
 0x19b   : > { %v628_v27 = vadd.f32 %v606_v56, %v605_v19  ;;  %v807_v20 = vsel %vm804_vm12, %v806_v58, %v802_v46  ;;  %v813_v11 = vadd.f32 %v2099_v62, %v812_v10  ;;  %v849_v16 = vrot.slane %v848_v32, 2  ;;  %vm816_vm14 = vmor %vm814_vm13, %vm815_vm11 }
 0x19c   : > { %v687_v18 = vmul.f32 %v679_v53, %v2881_v24  ;;  %v821_v0 = vor.u32 1.1754944e-38, %v820_v34  ;;  %v808_v61 = vmul.f32 %v807_v20, %v686_v1  ;;  %vm819_vm15 = vcmp.eq.f32.partialorder %v818_v33, 8.507059e+37 }
 0x19d   : > { %v629_v2 = vrot.slane %v628_v27, 4  ;;  %v817_v52 = vsel %vm816_vm14, %v2099_v62, %v813_v11  ;;  %v610_v4 = vrot.slane %v2748_v22, 2  ;;  %v843_v14 = vadd.f32 %v842_v7, %v841_v15 }
 0x19e   : > { %v822_v51 = vsel %vm819_vm15, %v821_v0, %v817_v52  ;;  %v625_v60 = vadd.f32 %v624_v6, %v623_v57  ;;  %v850_v12 = vadd.f32 %v849_v16, %v848_v32  ;;  %v618_v23 = vadd.f32 %v617_v3, %v2789_v40 }
 0x19f   : > { %v630_v26 = vadd.f32 %v629_v2, %v628_v27  ;;  %v823_v21 = vmul.f32 %v822_v51, %v687_v18  ;;  %v836_v24 = vadd.f32 %v835_v17, %v2791_v63  ;;  %v830_v53 = vmul.f32 %v808_v61, %v2540_v50 }
 0x1a0   : > { %v611_v28 = vadd.f32 %v610_v4, %v2748_v22  ;;  %v844_v35 = vrot.slane %v843_v14, 1  ;;  %v626_v47 = vrot.slane %v625_v60, 1  ;;  %v851_v42 = vrot.slane %v850_v12, 1 }
 0x1a1   : > { %v831_v62 = vmul.f32 %v823_v21, %v2545_v55  ;;  %v631_v15 = vrot.slane %v630_v26, 2  ;;  %v619_v9 = vrot.slane %v618_v23, 1  ;;  %v837_v8 = vrot.slane %v836_v24, 1 }
 0x1a2   : > { %v612_v40 = vrot.slane %v611_v28, 1  ;;  %v845_v5 = vadd.f32 %v844_v35, %v843_v14  ;;  %v627_v58 = vadd.f32 %v626_v47, %v625_v60  ;;  %v852_v63 = vadd.f32 %v851_v42, %v850_v12 }
 0x1a3   : > { %v853_v59 = vadd.f32 %v831_v62, %v830_v53  ;;  %v632_v3 = vadd.f32 %v631_v15, %v630_v26  ;;  %v620_v17 = vadd.f32 %v619_v9, %v618_v23  ;;  %v838_v54 = vadd.f32 %v837_v8, %v836_v24 }
 0x1a4   : > { %v613_v32 = vadd.f32 %v612_v40, %v611_v28  ;;  %v862_v19 = vadd.f32 %v852_v63, %v627_v58  ;;  %vm876_vm0 = vcmask 1041409   ;;  %vm878_vm1 = vcmask 1042434  }
 0x1a5   : > { %v854_v41 = vrot.slane %v853_v59, 4  ;;  %v633_v39 = vrot.slane %v632_v3, 1  ;;  %v861_v34 = vadd.f32 %v845_v5, %v620_v17  ;;  %vm880_vm2 = vcmask 1043459  }
 0x1a6   : > { %v860_v33 = vadd.f32 %v838_v54, %v613_v32  ;;  %v2954_v27 = vmul.f32 0.5, %v862_v19  ;;  %vm883_vm3 = vcmask 1043456  }
 0x1a7   : > { %v855_v56 = vadd.f32 %v854_v41, %v853_v59  ;;  %v634_v7 = vadd.f32 %v633_v39, %v632_v3  ;;  %v2952_v46 = vmul.f32 0.5, %v861_v34 }
 0x1a8   : > { %v2956_v11 = vmul.f32 0.5, %v860_v33 }
 0x1a9   : > { %v856_v57 = vrot.slane %v855_v56, 2 }
 0x1aa   : > { %v877_v16 = vsel %vm876_vm0, %v2952_v46, %v2956_v11 }
 0x1ab   : > { %v857_v22 = vadd.f32 %v856_v57, %v855_v56  ;;  %v879_v18 = vsel %vm878_vm1, %v2954_v27, %v877_v16 }
 0x1ad   : > { %v858_v10 = vrot.slane %v857_v22, 1 }
 0x1af   : > { %v859_v1 = vadd.f32 %v858_v10, %v857_v22 }
 0x1b1   : > { %v863_v20 = vadd.f32 %v859_v1, %v634_v7 }
 0x1b3   : > { %v2958_v6 = vmul.f32 0.5, %v863_v20  ;;  %v2981_v20 = vld [vmem:[#allocation2 + $0x18] sm:$0xff] }
 0x1b5   : > { %v881_v0 = vsel %vm880_vm2, %v2958_v6, %v879_v18 }
 0x1b6   : > { %v884_v2 = vsel %vm883_vm3, %v881_v0, -inf }
 0x1b7   : > { %885 = vmax.xlane.f32.xlu2 %v884_v2 }
 0x22a   : > { %v886_v61 = vpop.xlane.xlu2 %885 }
 0x22b   : > { %v888_v52 = vrot.slane %v886_v61, 1  ;;  %v889_v51 = vrot.slane %v886_v61, 2  ;;  %v890_v4 = vrot.slane %v886_v61, 3  ;;  %v895_v14 = vsub.f32 %v2956_v11, %v886_v61 }
 0x22d   : > { %v896_v26 = vsub.f32 %v2952_v46, %v888_v52  ;;  %v897_v21 = vsub.f32 %v2954_v27, %v889_v51  ;;  %v898_v60 = vsub.f32 %v2958_v6, %v890_v4  ;;  %v899_v12 = vmul.f32 1.442695, %v895_v14 }
 0x22f   : > { %v901_v23 = vmul.f32 1.442695, %v896_v26  ;;  %v903_v24 = vmul.f32 1.442695, %v897_v21  ;;  %v905_v53 = vmul.f32 1.442695, %v898_v60  ;;  %2100 = vpow2.f32 %v899_v12 }
 0x231   : > { %2102 = vpow2.f32 %v901_v23 }
 0x232   : > { %2104 = vpow2.f32 %v903_v24 }
 0x233   : > { %2106 = vpow2.f32 %v905_v53 }
 0x235   : > { %v2101_v62 = vpop.eup %2100 }
 0x237   : > { %v2103_v28 = vpop.eup %2102 }
 0x238   : > { %v2105_v59 = vpop.eup %2104  ;;  %v911_v15 = vrot.slane %v2103_v28, 7 }
 0x239   : > { %v2107_v35 = vpop.eup %2106  ;;  %v913_v47 = vrot.slane %v2105_v59, 6 }
 0x23a   : > { %v912_v42 = vsel %vm876_vm0, %v911_v15, %v2101_v62  ;;  %v915_v41 = vrot.slane %v2107_v35, 5 }
 0x23b   : > { %v914_v9 = vsel %vm878_vm1, %v913_v47, %v912_v42 }
 0x23c   : > { %v916_v8 = vsel %vm880_vm2, %v915_v41, %v914_v9 }
 0x23d   : > { %v918_v56 = vsel %vm883_vm3, %v916_v8, 0.0 }
 0x23e   : > { %919 = vadd.xlane.f32.xlu0 %v918_v56 }
 0x2b1   : > { %v920_v40 = vpop.xlane.xlu0 %919 }
 0x2b2   : > { %2108 = vrcp.f32 %v920_v40 }
 0x2b8   : > { %v2109_v3 = vpop.eup %2108 }
 0x2b9   : > { %v922_v5 = vmul.f32 %v2109_v3, %v920_v40 }
 0x2bb   : > { %v923_v58 = vsub.f32 2.0, %v922_v5 }
 0x2bd   : > { %v924_v63 = vmul.f32 %v2109_v3, %v923_v58 }
 0x2bf   : > { %v933_v17 = vmul.f32 %v2101_v62, %v924_v63  ;;  %v926_v54 = vrot.slane %v924_v63, 1  ;;  %v927_v10 = vrot.slane %v924_v63, 2 }
 0x2c1   : > { %v937_v57 = vperm.slane %v933_v17, 0  ;;  %v934_v34 = vmul.f32 %v2103_v28, %v926_v54  ;;  %v935_v1 = vmul.f32 %v2105_v59, %v927_v10 }
 0x2c3   : > { %v1158_v32 = vmul.f32 %v937_v57, %v2513_v31  ;;  %v942_v39 = vmul.f32 %v937_v57, %v2502_v13  ;;  %v941_v22 = vmul.f32 %v937_v57, %v2504_v25  ;;  %v938_v19 = vperm.slane %v934_v34, 0 }
 0x2c4   : > { %v1157_v33 = vmul.f32 %v937_v57, %v2509_v29  ;;  %v939_v13 = vperm.slane %v935_v1, 0  ;;  %v928_v29 = vrot.slane %v924_v63, 3 }
 0x2c5   : > { %1167 = vadd.xlane.f32.xlu0 %v1158_v32  ;;  %951 = vadd.xlane.f32.xlu2 %v942_v39  ;;  %v943_v7 = vmul.f32 %v938_v19, %v2511_v30  ;;  %v944_v16 = vmul.f32 %v2981_v20, %v938_v19  ;;  %v1160_v25 = vmul.f32 %v938_v19, %v2518_v36 }
 0x2c6   : > { %949 = vadd.xlane.f32.xlu1 %v941_v22  ;;  %v945_v31 = vmul.f32 %v939_v13, %v2522_v38  ;;  %v1159_v18 = vmul.f32 %v938_v19, %v2520_v37  ;;  %v1161_v30 = vmul.f32 %v939_v13, %v2527_v43  ;;  %v1162_v0 = vmul.f32 %v939_v13, %v2531_v45 }
 0x2c7   : > { %v936_v2 = vmul.f32 %v2107_v35, %v928_v29  ;;  %v946_v61 = vmul.f32 %v939_v13, %v2529_v44 }
 0x2c9   : > { %v940_v52 = vperm.slane %v936_v2, 0 }
 0x2cb   : > { %v948_v36 = vmul.f32 %v940_v52, %v2536_v48  ;;  %v1163_v38 = vmul.f32 %v940_v52, %v2540_v50  ;;  %v947_v37 = vmul.f32 %v940_v52, %v2538_v49  ;;  %v1164_v43 = vmul.f32 %v940_v52, %v2545_v55 }
 0x2cd   : > { %1165 = vadd.xlane.f32.xlu2 %v1157_v33  ;;  %953 = vadd.xlane.f32.xlu0 %v943_v7 }
 0x2ce   : > { %955 = vadd.xlane.f32.xlu1 %v944_v16 }
 0x2d5   : > { %1171 = vadd.xlane.f32.xlu2 %v1160_v25  ;;  %957 = vadd.xlane.f32.xlu0 %v945_v31 }
 0x2d6   : > { %1169 = vadd.xlane.f32.xlu1 %v1159_v18 }
 0x2dd   : > { %1173 = vadd.xlane.f32.xlu2 %v1161_v30  ;;  %1175 = vadd.xlane.f32.xlu0 %v1162_v0 }
 0x2de   : > { %959 = vadd.xlane.f32.xlu1 %v946_v61 }
 0x2e5   : > { %963 = vadd.xlane.f32.xlu2 %v948_v36  ;;  %1177 = vadd.xlane.f32.xlu0 %v1163_v38 }
 0x2e6   : > { %961 = vadd.xlane.f32.xlu1 %v947_v37 }
 0x2ee   : > { %1179 = vadd.xlane.f32.xlu1 %v1164_v43 }
 0x338   : > { %v1168_v45 = vpop.xlane.xlu0 %1167  ;;  %v952_v51 = vpop.xlane.xlu2 %951 }
 0x339   : > { %v1198_v4 = vmul.f32 %v1168_v45, %v1168_v45  ;;  %v982_v44 = vmul.f32 %v952_v51, %v952_v51  ;;  %v950_v14 = vpop.xlane.xlu1 %949  ;;  %v1182_v9 = vand.u32 2147483647, %v1168_v45  ;;  %v966_v8 = vand.u32 2147483647, %v952_v51 }
 0x33a   : > { %v981_v26 = vmul.f32 %v950_v14, %v950_v14  ;;  %v965_v56 = vand.u32 2147483647, %v950_v14 }
 0x33b   : > { %v2994_v21 = vadd.f32 1.0, %v1198_v4  ;;  %v2996_v60 = vadd.f32 1.0, %v982_v44  ;;  %v3040_v54 = vmul.f32 %v1182_v9, %v1168_v45  ;;  %v3043_v32 = vmul.f32 %v966_v8, %v952_v51 }
 0x33c   : > { %v2998_v48 = vadd.f32 1.0, %v981_v26  ;;  %v3045_v39 = vmul.f32 %v965_v56, %v950_v14 }
 0x33d   : > { %2110 = vrcp.f32 %v2994_v21  ;;  %v1239_v3 = vand.u32 2147483648, %v2994_v21  ;;  %v1023_v58 = vand.u32 2147483648, %v2996_v60  ;;  %v1237_v57 = vand.u32 2147483647, %v2994_v21 }
 0x33e   : > { %2112 = vrcp.f32 %v2996_v60  ;;  %vm1233_vm4 = vweird.f32 %v2994_v21  ;;  %vm1017_vm5 = vweird.f32 %v2996_v60  ;;  %v1021_v22 = vand.u32 2147483647, %v2996_v60 }
 0x33f   : > { %2114 = vrcp.f32 %v2998_v48  ;;  %v1240_v33 = vor.u32 1.1754944e-38, %v1239_v3  ;;  %vm1002_vm6 = vweird.f32 %v2998_v48  ;;  %v1024_v1 = vor.u32 1.1754944e-38, %v1023_v58 }
 0x340   : > { %v3003_v49 = vpop.xlane.xlu2 %1165  ;;  %v3005_v50 = vpop.xlane.xlu0 %953  ;;  %v1006_v13 = vand.u32 2147483647, %v2998_v48  ;;  %vm3062_vm8 = vcmp.eq.f32.partialorder %v1237_v57, 8.507059e+37  ;;  %v1008_v29 = vand.u32 2147483648, %v2998_v48  ;;  %vm3072_vm10 = vcmp.eq.f32.partialorder %v1021_v22, 8.507059e+37 }
 0x341   : > { %v1197_v55 = vmul.f32 %v3003_v49, %v3003_v49  ;;  %v3009_v12 = vpop.xlane.xlu1 %955  ;;  %v983_v23 = vmul.f32 %v3005_v50, %v3005_v50 }
 0x342   : > { %v984_v24 = vmul.f32 %v3009_v12, %v3009_v12  ;;  %v968_v58 = vand.u32 2147483647, %v3009_v12 }
 0x343   : > { %v3015_v53 = vpop.eup %2110  ;;  %v3017_v62 = vadd.f32 1.0, %v1197_v55  ;;  %v3030_v42 = vadd.f32 1.0, %v983_v23  ;;  %v3215_v55 = vld [vmem:[#allocation2 + $0x8] sm:$0xff] }
 0x344   : > { %v3019_v28 = vpop.eup %2112  ;;  %v3021_v59 = vadd.f32 1.0, %v984_v24  ;;  %v1229_v35 = vmul.f32 %v3015_v53, %v2994_v21  ;;  %vm1234_vm7 = vweird.f32 %v3015_v53  ;;  %v1181_v21 = vand.u32 2147483647, %v3003_v49 }
 0x345   : > { %v3023_v15 = vpop.eup %2114  ;;  %v1013_v47 = vmul.f32 %v3019_v28, %v2996_v60  ;;  %2116 = vrcp.f32 %v3017_v62  ;;  %vm1018_vm9 = vweird.f32 %v3019_v28  ;;  %v1224_v52 = vand.u32 2147483648, %v3017_v62  ;;  %vm3090_vm13 = vmor %vm1233_vm4, %vm1234_vm7 }
 0x346   : > { %v998_v41 = vmul.f32 %v3023_v15, %v2998_v48  ;;  %2118 = vrcp.f32 %v3021_v59  ;;  %v1230_v40 = vsub.f32 1.0, %v1229_v35  ;;  %vm1003_vm11 = vweird.f32 %v3023_v15  ;;  %vm3102_vm14 = vmor %vm1017_vm5, %vm1018_vm9 }
 0x347   : > { %v1014_v5 = vsub.f32 1.0, %v1013_v47  ;;  %2120 = vrcp.f32 %v3030_v42  ;;  %vm1218_vm15 = vweird.f32 %v3017_v62  ;;  %v1222_v23 = vand.u32 2147483647, %v3017_v62  ;;  %vm3131_vm5 = vmor %vm1002_vm6, %vm1003_vm11 }
 0x348   : > { %v999_v63 = vsub.f32 1.0, %v998_v41  ;;  %v1231_v10 = vmul.f32 %v3015_v53, %v1230_v40  ;;  %v3070_v0 = vpop.xlane.xlu2 %1171  ;;  %vm3111_vm4 = vcmp.eq.f32.partialorder %v1006_v13, 8.507059e+37  ;;  %v1009_v47 = vor.u32 1.1754944e-38, %v1008_v29 }
 0x349   : > { %v1015_v7 = vmul.f32 %v3019_v28, %v1014_v5  ;;  %v3081_v38 = vpop.xlane.xlu1 %1169  ;;  %v1200_v26 = vmul.f32 %v3070_v0, %v3070_v0  ;;  %v1225_v41 = vor.u32 1.1754944e-38, %v1224_v52  ;;  %v1189_v48 = vmul.f32 %v1181_v21, %v3003_v49 }
 0x34a   : > { %v1000_v16 = vmul.f32 %v3023_v15, %v999_v63  ;;  %v1232_v37 = vadd.f32 %v3015_v53, %v1231_v10  ;;  %v1199_v24 = vmul.f32 %v3081_v38, %v3081_v38  ;;  %vm1223_vm6 = vcmp.eq.f32.partialorder %v1222_v23, 8.507059e+37  ;;  %v3218_v23 = vld [vmem:[#allocation2] sm:$0xff] }
 0x34b   : > { %v3038_v17 = vpop.eup %2116  ;;  %v1016_v43 = vadd.f32 %v3019_v28, %v1015_v7  ;;  %v3119_v9 = vadd.f32 1.0, %v1200_v26  ;;  %v1051_v63 = vand.u32 2147483647, %v3021_v59  ;;  %v1053_v22 = vand.u32 2147483648, %v3021_v59 }
 0x34c   : > { %v1214_v34 = vmul.f32 %v3038_v17, %v3017_v62  ;;  %v3052_v19 = vpop.eup %2118  ;;  %vm1219_vm12 = vweird.f32 %v3038_v17  ;;  %v1001_v4 = vadd.f32 %v3023_v15, %v1000_v16  ;;  %v1236_v8 = vsel %vm3090_vm13, %v3015_v53, %v1232_v37 }
 0x34d   : > { %v3059_v31 = vpop.eup %2120  ;;  %v1043_v30 = vmul.f32 %v3052_v19, %v3021_v59  ;;  %vm3115_vm7 = vmor %vm1218_vm15, %vm1219_vm12  ;;  %v1020_v62 = vsel %vm3102_vm14, %v3019_v28, %v1016_v43  ;;  %2122 = vrcp.f32 %v3119_v9  ;;  %v3144_v5 = vadd.f32 1.0, %v1199_v24  ;;  %v3203_v43 = vld [vmem:[#allocation2 + $0x40] sm:$0xff] }
 0x34e   : > { %v1215_v25 = vsub.f32 1.0, %v1214_v34  ;;  %v1028_v36 = vmul.f32 %v3059_v31, %v3030_v42  ;;  %v1005_v53 = vsel %vm3131_vm5, %v3023_v15, %v1001_v4  ;;  %v1036_v15 = vand.u32 2147483647, %v3030_v42 }
 0x34f   : > { %v1044_v45 = vsub.f32 1.0, %v1043_v30  ;;  %v1025_v34 = vsel %vm3072_vm10, %v1024_v1, %v1020_v62  ;;  %v1010_v10 = vsel %vm3111_vm4, %v1009_v47, %v1005_v53  ;;  %vm1048_vm9 = vweird.f32 %v3052_v19 }
 0x350   : > { %v1216_v61 = vmul.f32 %v3038_v17, %v1215_v25  ;;  %v1029_v14 = vsub.f32 1.0, %v1028_v36  ;;  %vm1033_vm11 = vweird.f32 %v3059_v31  ;;  %2124 = vrcp.f32 %v3144_v5 }
 0x351   : > { %v1045_v3 = vmul.f32 %v3052_v19, %v1044_v45  ;;  %v976_v13 = vmul.f32 %v968_v58, %v3009_v12  ;;  %v967_v1 = vand.u32 2147483647, %v3005_v50  ;;  %v1026_v29 = vmul.f32 %v1025_v34, %v3043_v32  ;;  %v3178_v12 = vpop.xlane.xlu2 %1173  ;;  %v3230_v62 = vpop.xlane.xlu1 %959 }
 0x352   : > { %v1217_v44 = vadd.f32 %v3038_v17, %v1216_v61  ;;  %v1030_v28 = vmul.f32 %v3059_v31, %v1029_v14  ;;  %v1011_v30 = vmul.f32 %v1010_v10, %v3045_v39  ;;  %vm1032_vm12 = vweird.f32 %v3030_v42  ;;  %v3176_v61 = vpop.xlane.xlu0 %957 }
 0x353   : > { %v1046_v49 = vadd.f32 %v3052_v19, %v1045_v3  ;;  %v3166_v25 = vpop.eup %2122  ;;  %vm3183_vm13 = vcmp.eq.f32.partialorder %v1051_v63, 8.507059e+37  ;;  %v1054_v32 = vor.u32 1.1754944e-38, %v1053_v22  ;;  %vm3189_vm14 = vmor %vm1032_vm12, %vm1033_vm11  ;;  %vm3198_vm15 = vcmp.eq.f32.partialorder %v1036_v15, 8.507059e+37 }
 0x354   : > { %v1221_v40 = vsel %vm3115_vm7, %v3038_v17, %v1217_v44  ;;  %v1241_v17 = vsel %vm3062_vm8, %v1240_v33, %v1236_v8  ;;  %v1031_v7 = vadd.f32 %v3059_v31, %v1030_v28  ;;  %v1038_v33 = vand.u32 2147483648, %v3030_v42 }
 0x355   : > { %v1226_v57 = vsel %vm1223_vm6, %v1225_v41, %v1221_v40  ;;  %vm1047_vm8 = vweird.f32 %v3021_v59  ;;  %v1242_v18 = vmul.f32 %v1241_v17, %v3040_v54  ;;  %v1259_v42 = vmul.f32 %v3166_v25, %v3119_v9  ;;  %v3405_v54 = vld [vmem:[#allocation2 + $0x60] sm:$0xff] }
 0x356   : > { %v1227_v16 = vmul.f32 %v1226_v57, %v1189_v48  ;;  %vm3171_vm10 = vmor %vm1047_vm8, %vm1048_vm9  ;;  %v1035_v52 = vsel %vm3189_vm14, %v3059_v31, %v1031_v7  ;;  %v1039_v36 = vor.u32 1.1754944e-38, %v1038_v33  ;;  %v1184_v37 = vand.u32 2147483647, %v3070_v0  ;;  %v3210_v14 = vpop.eup %2124  ;;  %v3212_v31 = vld [vmem:[#allocation2 + $0x48] sm:$0xff] }
 0x357   : > { %v1050_v59 = vsel %vm3171_vm10, %v3052_v19, %v1046_v49  ;;  %v1260_v51 = vsub.f32 1.0, %v1259_v42  ;;  %v985_v4 = vmul.f32 %v3176_v61, %v3176_v61  ;;  %v1201_v44 = vmul.f32 %v3178_v12, %v3178_v12 }
 0x358   : > { %v1333_v45 = vmul.f32 %v3203_v43, %v1227_v16  ;;  %v1334_v26 = vmul.f32 %v3212_v31, %v1242_v18  ;;  %v1118_v21 = vmul.f32 %v3215_v55, %v1026_v29  ;;  %v1117_v24 = vmul.f32 %v3218_v23, %v1011_v30 }
 0x359   : > { %v1055_v35 = vsel %vm3183_vm13, %v1054_v32, %v1050_v59  ;;  %v1040_v47 = vsel %vm3198_vm15, %v1039_v36, %v1035_v52  ;;  %v1261_v60 = vmul.f32 %v3166_v25, %v1260_v51  ;;  %v1244_v41 = vmul.f32 %v3210_v14, %v3144_v5  ;;  %v3289_v36 = vpop.xlane.xlu2 %963 }
 0x35a   : > { %v3228_v8 = vadd.f32 1.0, %v985_v4  ;;  %v975_v56 = vmul.f32 %v967_v1, %v3005_v50  ;;  %v1192_v40 = vmul.f32 %v1184_v37, %v3070_v0  ;;  %v1183_v3 = vand.u32 2147483647, %v3081_v38  ;;  %v3259_v1 = vld [vmem:[#allocation2 + $0x10] sm:$0xff]  ;;  %v1176_v32 = vpop.xlane.xlu0 %1175 }
 0x35b   : > { %v3235_v53 = vadd.f32 1.0, %v1201_v44  ;;  %v1341_v28 = vadd.f32 %v1334_v26, %v1333_v45  ;;  %v1056_v48 = vmul.f32 %v1055_v35, %v976_v13  ;;  %v1245_v58 = vsub.f32 1.0, %v1244_v41 }
 0x35c   : > { %2126 = vrcp.f32 %v3228_v8  ;;  %v1041_v63 = vmul.f32 %v1040_v47, %v975_v56  ;;  %v1262_v17 = vadd.f32 %v3166_v25, %v1261_v60  ;;  %vm1264_vm4 = vweird.f32 %v3166_v25 }
 0x35d   : > { %v986_v57 = vmul.f32 %v3230_v62, %v3230_v62  ;;  %v3242_v50 = vadd.f32 %v1118_v21, %v1117_v24  ;;  %v1269_v0 = vand.u32 2147483648, %v3119_v9  ;;  %v1246_v22 = vmul.f32 %v3210_v14, %v1245_v58 }
 0x35e   : > { %2128 = vrcp.f32 %v3235_v53  ;;  %vm1263_vm7 = vweird.f32 %v3119_v9  ;;  %v1267_v15 = vand.u32 2147483647, %v3119_v9  ;;  %v1191_v34 = vmul.f32 %v1183_v3, %v3081_v38 }
 0x35f   : > { %v1252_v10 = vand.u32 2147483647, %v3144_v5  ;;  %v1120_v49 = vmul.f32 %v2981_v20, %v1056_v48  ;;  %vm3252_vm5 = vmor %vm1263_vm7, %vm1264_vm4  ;;  %v1247_v33 = vadd.f32 %v3210_v14, %v1246_v22  ;;  %vm1249_vm6 = vweird.f32 %v3210_v14 }
 0x360   : > { %v1254_v16 = vand.u32 2147483648, %v3144_v5  ;;  %v1342_v13 = vrot.slane %v1341_v28, 4  ;;  %v1119_v9 = vmul.f32 %v3259_v1, %v1041_v63  ;;  %v1266_v38 = vsel %vm3252_vm5, %v3166_v25, %v1262_v17 }
 0x361   : > { %v3265_v20 = vadd.f32 1.0, %v986_v57  ;;  %v1126_v29 = vrot.slane %v3242_v50, 4  ;;  %v1270_v30 = vor.u32 1.1754944e-38, %v1269_v0  ;;  %vm1248_vm9 = vweird.f32 %v3144_v5 }
 0x362   : > { %v3267_v18 = vpop.eup %2126  ;;  %v969_v2 = vand.u32 2147483647, %v3176_v61  ;;  %vm1268_vm11 = vcmp.eq.f32.partialorder %v1267_v15, 8.507059e+37  ;;  %vm3272_vm8 = vmor %vm1248_vm9, %vm1249_vm6  ;;  %vm3276_vm10 = vcmp.eq.f32.partialorder %v1252_v10, 8.507059e+37  ;;  %v1255_v52 = vor.u32 1.1754944e-38, %v1254_v16 }
 0x363   : > { %v1058_v25 = vmul.f32 %v3267_v18, %v3228_v8  ;;  %2130 = vrcp.f32 %v3265_v20  ;;  %v1271_v5 = vsel %vm1268_vm11, %v1270_v30, %v1266_v38  ;;  %v1251_v42 = vsel %vm3272_vm8, %v3210_v14, %v1247_v33 }
 0x364   : > { %v3283_v39 = vpop.eup %2128  ;;  %v1185_v19 = vand.u32 2147483647, %v3178_v12  ;;  %v3291_v37 = vadd.f32 %v1342_v13, %v1341_v28  ;;  %v3293_v45 = vadd.f32 %v1120_v49, %v1119_v9  ;;  %v3298_v44 = vmul.f32 %v969_v2, %v3176_v61  ;;  %v3329_v49 = vpop.xlane.xlu1 %961  ;;  %v3338_v9 = vld [vmem:[#allocation2 + $0x50] sm:$0xff] }
 0x365   : > { %v1059_v51 = vsub.f32 1.0, %v1058_v25  ;;  %v1274_v4 = vmul.f32 %v3283_v39, %v3235_v53  ;;  %v1066_v26 = vand.u32 2147483647, %v3228_v8  ;;  %v1068_v14 = vand.u32 2147483648, %v3228_v8 }
 0x366   : > { %v1202_v21 = vmul.f32 %v1176_v32, %v1176_v32  ;;  %v1272_v24 = vmul.f32 %v1271_v5, %v1192_v40  ;;  %v1256_v35 = vsel %vm3276_vm10, %v1255_v52, %v1251_v42  ;;  %v988_v60 = vmul.f32 %v3289_v36, %v3289_v36 }
 0x367   : > { %v1275_v47 = vsub.f32 1.0, %v1274_v4  ;;  %vm1062_vm12 = vweird.f32 %v3228_v8  ;;  %v3308_v41 = vmul.f32 %v1185_v19, %v3178_v12  ;;  %v970_v61 = vand.u32 2147483647, %v3230_v62  ;;  %v3320_v12 = vld [vmem:[#allocation2 + $0x58] sm:$0xff]  ;;  %v3361_v4 = vpop.xlane.xlu0 %1177 }
 0x368   : > { %v3311_v56 = vadd.f32 1.0, %v1202_v21  ;;  %v1060_v28 = vmul.f32 %v3267_v18, %v1059_v51  ;;  %vm1278_vm13 = vweird.f32 %v3235_v53  ;;  %v3316_v48 = vadd.f32 1.0, %v988_v60 }
 0x369   : > { %v2131_v3 = vpop.eup %2130  ;;  %v1276_v40 = vmul.f32 %v3283_v39, %v1275_v47  ;;  %v1257_v58 = vmul.f32 %v1256_v35, %v1191_v34  ;;  %v1069_v63 = vor.u32 1.1754944e-38, %v1068_v14  ;;  %v1336_v57 = vmul.f32 %v3320_v12, %v1272_v24 }
 0x36a   : > { %v1073_v17 = vmul.f32 %v2131_v3, %v3265_v20  ;;  %2132 = vrcp.f32 %v3311_v56  ;;  %vm3323_vm14 = vcmp.eq.f32.partialorder %v1066_v26, 8.507059e+37  ;;  %v1282_v22 = vand.u32 2147483647, %v3235_v53 }
 0x36b   : > { %v1284_v15 = vand.u32 2147483648, %v3235_v53  ;;  %v1186_v10 = vand.u32 2147483647, %v1176_v32  ;;  %vm1063_vm15 = vweird.f32 %v3267_v18  ;;  %v1081_v7 = vand.u32 2147483647, %v3265_v20 }
 0x36c   : > { %v1074_v34 = vsub.f32 1.0, %v1073_v17  ;;  %v1083_v33 = vand.u32 2147483648, %v3265_v20  ;;  %v1061_v16 = vadd.f32 %v3267_v18, %v1060_v28  ;;  %v1277_v13 = vadd.f32 %v3283_v39, %v1276_v40  ;;  %vm3345_vm5 = vmor %vm1062_vm12, %vm1063_vm15 }
 0x36d   : > { %vm1279_vm4 = vweird.f32 %v3283_v39  ;;  %2134 = vrcp.f32 %v3316_v48  ;;  %v1335_v38 = vmul.f32 %v3338_v9, %v1257_v58  ;;  %vm1078_vm7 = vweird.f32 %v2131_v3 }
 0x36e   : > { %v1075_v30 = vmul.f32 %v2131_v3, %v1074_v34  ;;  %v987_v2 = vmul.f32 %v3329_v49, %v3329_v49  ;;  %vm3349_vm6 = vcmp.eq.f32.partialorder %v1282_v22, 8.507059e+37  ;;  %v1285_v25 = vor.u32 1.1754944e-38, %v1284_v15  ;;  %vm3357_vm11 = vmor %vm1278_vm13, %vm1279_vm4 }
 0x36f   : > { %v978_v5 = vmul.f32 %v970_v61, %v3230_v62  ;;  %vm1077_vm9 = vweird.f32 %v3265_v20  ;;  %vm1082_vm8 = vcmp.eq.f32.partialorder %v1081_v7, 8.507059e+37  ;;  %v1084_v19 = vor.u32 1.1754944e-38, %v1083_v33  ;;  %v3393_v7 = vpop.xlane.xlu1 %1179 }
 0x370   : > { %v2133_v42 = vpop.eup %2132  ;;  %v1076_v8 = vadd.f32 %v2131_v3, %v1075_v30  ;;  %v1194_v51 = vmul.f32 %v1186_v10, %v1176_v32  ;;  %v1065_v26 = vsel %vm3345_vm5, %v3267_v18, %v1061_v16  ;;  %v1281_v62 = vsel %vm3357_vm11, %v3283_v39, %v1277_v13  ;;  %vm1079_vm10 = vmor %vm1077_vm9, %vm1078_vm7  ;;  %v3399_v13 = vld [vmem:[#allocation2 + $0x28] sm:$0xff] }
 0x371   : > { %v1289_v53 = vmul.f32 %v2133_v42, %v3311_v56  ;;  %v972_v20 = vand.u32 2147483647, %v3289_v36  ;;  %v3372_v14 = vadd.f32 %v1336_v57, %v1335_v38  ;;  %v971_v32 = vand.u32 2147483647, %v3329_v49 }
 0x372   : > { %v1080_v21 = vsel %vm1079_vm10, %v2131_v3, %v1076_v8  ;;  %v3375_v24 = vadd.f32 1.0, %v987_v2  ;;  %v1299_v60 = vand.u32 2147483648, %v3311_v56  ;;  %v1203_v39 = vmul.f32 %v3361_v4, %v3361_v4 }
 0x373   : > { %v2135_v35 = vpop.eup %2134  ;;  %v1085_v47 = vsel %vm1082_vm8, %v1084_v19, %v1080_v21  ;;  %v1290_v18 = vsub.f32 1.0, %v1289_v53  ;;  %v1070_v61 = vsel %vm3323_vm14, %v1069_v63, %v1065_v26  ;;  %v1286_v28 = vsel %vm3349_vm6, %v1285_v25, %v1281_v62  ;;  %v3415_v62 = vld [vmem:[#allocation2 + $0x68] sm:$0xff] }
 0x374   : > { %v1103_v3 = vmul.f32 %v2135_v35, %v3316_v48  ;;  %2136 = vrcp.f32 %v3375_v24  ;;  %vm1294_vm12 = vweird.f32 %v2133_v42  ;;  %v1297_v58 = vand.u32 2147483647, %v3311_v56 }
 0x375   : > { %v1291_v40 = vmul.f32 %v2133_v42, %v1290_v18  ;;  %v980_v17 = vmul.f32 %v972_v20, %v3289_v36  ;;  %v1086_v57 = vmul.f32 %v1085_v47, %v978_v5  ;;  %vm1293_vm13 = vweird.f32 %v3311_v56 }
 0x376   : > { %v1104_v22 = vsub.f32 1.0, %v1103_v3  ;;  %v3389_v15 = vadd.f32 1.0, %v1203_v39  ;;  %v1071_v63 = vmul.f32 %v1070_v61, %v3298_v44  ;;  %v1287_v0 = vmul.f32 %v1286_v28, %v3308_v41  ;;  %vm1295_vm14 = vmor %vm1293_vm13, %vm1294_vm12 }
 0x377   : > { %v1292_v10 = vadd.f32 %v2133_v42, %v1291_v40  ;;  %v1300_v34 = vor.u32 1.1754944e-38, %v1299_v60  ;;  %vm1108_vm15 = vweird.f32 %v2135_v35  ;;  %v1113_v16 = vand.u32 2147483648, %v3316_v48 }
 0x378   : > { %v1105_v33 = vmul.f32 %v2135_v35, %v1104_v22  ;;  %2138 = vrcp.f32 %v3389_v15  ;;  %vm1298_vm4 = vcmp.eq.f32.partialorder %v1297_v58, 8.507059e+37  ;;  %vm1107_vm7 = vweird.f32 %v3316_v48 }
 0x379   : > { %v1296_v36 = vsel %vm1295_vm14, %v2133_v42, %v1292_v10  ;;  %v1111_v56 = vand.u32 2147483647, %v3316_v48  ;;  %v1122_v41 = vmul.f32 %v3399_v13, %v1086_v57  ;;  %v1204_v2 = vmul.f32 %v3393_v7, %v3393_v7  ;;  %vm1109_vm5 = vmor %vm1107_vm7, %vm1108_vm15  ;;  %v3410_v42 = vld [vmem:[#allocation2 + $0x20] sm:$0xff] }
 0x37a   : > { %v2137_v44 = vpop.eup %2136  ;;  %v1301_v38 = vsel %vm1298_vm4, %v1300_v34, %v1296_v36  ;;  %v1106_v30 = vadd.f32 %v2135_v35, %v1105_v33  ;;  %v1349_v59 = vrot.slane %v3372_v14, 4  ;;  %v1337_v25 = vmul.f32 %v3405_v54, %v1287_v0 }
 0x37b   : > { %v1302_v5 = vmul.f32 %v1301_v38, %v1194_v51  ;;  %v1088_v48 = vmul.f32 %v2137_v44, %v3375_v24  ;;  %v1121_v52 = vmul.f32 %v3410_v42, %v1071_v63  ;;  %v1114_v19 = vor.u32 1.1754944e-38, %v1113_v16 }
 0x37c   : > { %v1110_v8 = vsel %vm1109_vm5, %v2135_v35, %v1106_v30  ;;  %v3413_v26 = vadd.f32 1.0, %v1204_v2  ;;  %vm1112_vm6 = vcmp.eq.f32.partialorder %v1111_v56, 8.507059e+37  ;;  %v1096_v51 = vand.u32 2147483647, %v3375_v24 }
 0x37d   : > { %v1338_v53 = vmul.f32 %v3415_v62, %v1302_v5  ;;  %v1089_v20 = vsub.f32 1.0, %v1088_v48  ;;  %v1139_v47 = vadd.f32 %v1122_v41, %v1121_v52  ;;  %v1115_v18 = vsel %vm1112_vm6, %v1114_v19, %v1110_v8 }
 0x37e   : > { %v2139_v21 = vpop.eup %2138  ;;  %v1098_v60 = vand.u32 2147483648, %v3375_v24  ;;  %2140 = vrcp.f32 %v3413_v26  ;;  %vm1093_vm9 = vweird.f32 %v2137_v44  ;;  %v3425_v28 = vadd.f32 %v1126_v29, %v3242_v50 }
 0x37f   : > { %v1355_v39 = vadd.f32 %v1338_v53, %v1337_v25  ;;  %v1090_v35 = vmul.f32 %v2137_v44, %v1089_v20  ;;  %v1304_v61 = vmul.f32 %v2139_v21, %v3389_v15  ;;  %v1344_v3 = vrot.slane %v3291_v37, 2  ;;  %v3447_v25 = vld [vmem:[#allocation2 + $0x30] sm:$0xff] }
 0x380   : > { %v1133_v40 = vrot.slane %v3293_v45, 4  ;;  %v1350_v58 = vadd.f32 %v1349_v59, %v3372_v14  ;;  %v1116_v57 = vmul.f32 %v1115_v18, %v980_v17  ;;  %vm1092_vm11 = vweird.f32 %v3375_v24  ;;  %v3437_v17 = vld [vmem:[#allocation2 + $0x38] sm:$0xff] }
 0x381   : > { %v1091_v22 = vadd.f32 %v2137_v44, %v1090_v35  ;;  %v1305_v63 = vsub.f32 1.0, %v1304_v61  ;;  %v1140_v0 = vrot.slane %v1139_v47, 4  ;;  %v1356_v10 = vrot.slane %v1355_v39, 4  ;;  %vm1094_vm8 = vmor %vm1092_vm11, %vm1093_vm9 }
 0x382   : > { %v979_v34 = vmul.f32 %v971_v32, %v3329_v49  ;;  %v1099_v50 = vor.u32 1.1754944e-38, %v1098_v60  ;;  %vm1097_vm10 = vcmp.eq.f32.partialorder %v1096_v51, 8.507059e+37  ;;  %vm1309_vm12 = vweird.f32 %v2139_v21 }
 0x383   : > { %v1095_v29 = vsel %vm1094_vm8, %v2137_v44, %v1091_v22  ;;  %v1306_v33 = vmul.f32 %v2139_v21, %v1305_v63  ;;  %vm1308_vm13 = vweird.f32 %v3389_v15  ;;  %v1312_v14 = vand.u32 2147483647, %v3389_v15 }
 0x384   : > { %v2141_v16 = vpop.eup %2140  ;;  %v1100_v36 = vsel %vm1097_vm10, %v1099_v50, %v1095_v29  ;;  %v1314_v24 = vand.u32 2147483648, %v3389_v15  ;;  %v1124_v56 = vmul.f32 %v3437_v17, %v1116_v57  ;;  %v1134_v44 = vadd.f32 %v1133_v40, %v3293_v45  ;;  %vm3443_vm14 = vmor %vm1308_vm13, %vm1309_vm12 }
 0x385   : > { %v1101_v41 = vmul.f32 %v1100_v36, %v979_v34  ;;  %v1307_v49 = vadd.f32 %v2139_v21, %v1306_v33  ;;  %v1319_v32 = vmul.f32 %v2141_v16, %v3413_v26  ;;  %v1351_v38 = vrot.slane %v1350_v58, 2 }
 0x386   : > { %v1141_v30 = vadd.f32 %v1140_v0, %v1139_v47  ;;  %v1357_v2 = vadd.f32 %v1356_v10, %v1355_v39  ;;  %v1187_v5 = vand.u32 2147483647, %v3361_v4  ;;  %vm1313_vm15 = vcmp.eq.f32.partialorder %v1312_v14, 8.507059e+37 }
 0x387   : > { %v1123_v15 = vmul.f32 %v3447_v25, %v1101_v41  ;;  %v1311_v48 = vsel %vm3443_vm14, %v2139_v21, %v1307_v49  ;;  %v1320_v52 = vsub.f32 1.0, %v1319_v32  ;;  %v1315_v45 = vor.u32 1.1754944e-38, %v1314_v24  ;;  %v3464_v24 = vld [vmem:[#allocation2 + $0x70] sm:$0xff] }
 0x388   : > { %v1188_v8 = vand.u32 2147483647, %v3393_v7  ;;  %v1329_v19 = vand.u32 2147483648, %v3413_v26  ;;  %vm1324_vm4 = vweird.f32 %v2141_v16  ;;  %v1327_v51 = vand.u32 2147483647, %v3413_v26 }
 0x389   : > { %v1146_v53 = vadd.f32 %v1124_v56, %v1123_v15  ;;  %v1321_v20 = vmul.f32 %v2141_v16, %v1320_v52  ;;  %v1135_v47 = vrot.slane %v1134_v44, 2  ;;  %v1142_v18 = vrot.slane %v1141_v30, 2 }
 0x38a   : > { %v1358_v60 = vrot.slane %v1357_v2, 2  ;;  %v1316_v39 = vsel %vm1313_vm15, %v1315_v45, %v1311_v48  ;;  %v1195_v61 = vmul.f32 %v1187_v5, %v3361_v4  ;;  %vm1323_vm7 = vweird.f32 %v3413_v26 }
 0x38b   : > { %v1147_v35 = vrot.slane %v1146_v53, 4  ;;  %v1322_v21 = vadd.f32 %v2141_v16, %v1321_v20  ;;  %v1128_v40 = vrot.slane %v3425_v28, 2  ;;  %v1352_v57 = vadd.f32 %v1351_v38, %v1350_v58  ;;  %vm1325_vm5 = vmor %vm1323_vm7, %vm1324_vm4 }
 0x38c   : > { %v1330_v22 = vor.u32 1.1754944e-38, %v1329_v19  ;;  %v1317_v63 = vmul.f32 %v1316_v39, %v1195_v61  ;;  %v1196_v0 = vmul.f32 %v1188_v8, %v3393_v7  ;;  %vm1328_vm6 = vcmp.eq.f32.partialorder %v1327_v51, 8.507059e+37  ;;  %v3467_v7 = vld [vmem:[#allocation2 + $0x78] sm:$0xff] }
 0x38d   : > { %v1326_v10 = vsel %vm1325_vm5, %v2141_v16, %v1322_v21  ;;  %v1143_v34 = vadd.f32 %v1142_v18, %v1141_v30  ;;  %v1359_v50 = vadd.f32 %v1358_v60, %v1357_v2  ;;  %v1345_v4 = vadd.f32 %v1344_v3, %v3291_v37 }
 0x38e   : > { %v1331_v29 = vsel %vm1328_vm6, %v1330_v22, %v1326_v10  ;;  %v1136_v33 = vadd.f32 %v1135_v47, %v1134_v44  ;;  %v1148_v36 = vadd.f32 %v1147_v35, %v1146_v53  ;;  %v1129_v14 = vadd.f32 %v1128_v40, %v3425_v28 }
 0x38f   : > { %v1332_v26 = vmul.f32 %v1331_v29, %v1196_v0  ;;  %v1353_v58 = vrot.slane %v1352_v57, 1  ;;  %v1339_v56 = vmul.f32 %v3464_v24, %v1317_v63  ;;  %v1144_v41 = vrot.slane %v1143_v34, 1 }
 0x390   : > { %v1360_v49 = vrot.slane %v1359_v50, 1  ;;  %v1346_v32 = vrot.slane %v1345_v4, 1  ;;  %v1137_v38 = vrot.slane %v1136_v33, 1  ;;  %v1149_v30 = vrot.slane %v1148_v36, 2 }
 0x391   : > { %v1340_v16 = vmul.f32 %v3467_v7, %v1332_v26  ;;  %v1130_v3 = vrot.slane %v1129_v14, 1  ;;  %v1354_v2 = vadd.f32 %v1353_v58, %v1352_v57  ;;  %v1145_v59 = vadd.f32 %v1144_v41, %v1143_v34 }
 0x392   : > { %v1361_v28 = vadd.f32 %v1360_v49, %v1359_v50  ;;  %v1138_v5 = vadd.f32 %v1137_v38, %v1136_v33  ;;  %v1150_v48 = vadd.f32 %v1149_v30, %v1148_v36  ;;  %v1347_v52 = vadd.f32 %v1346_v32, %v1345_v4 }
 0x393   : > { %v1362_v37 = vadd.f32 %v1340_v16, %v1339_v56  ;;  %v1131_v8 = vadd.f32 %v1130_v3, %v1129_v14 }
 0x394   : > { %v1370_v19 = vadd.f32 %v1354_v2, %v1138_v5  ;;  %v1371_v53 = vadd.f32 %v1361_v28, %v1145_v59  ;;  %v1151_v20 = vrot.slane %v1150_v48, 1 }
 0x395   : > { %v1363_v44 = vrot.slane %v1362_v37, 4  ;;  %v1369_v47 = vadd.f32 %v1347_v52, %v1131_v8 }
 0x396   : > { %v1374_v60 = vmul.f32 0.5, %v1370_v19  ;;  %v1375_v39 = vmul.f32 0.5, %v1371_v53  ;;  %v1152_v35 = vadd.f32 %v1151_v20, %v1150_v48 }
 0x397   : > { %v1364_v15 = vadd.f32 %v1363_v44, %v1362_v37  ;;  %v1373_v21 = vmul.f32 0.5, %v1369_v47 }
 0x398   : > { %v1378_v57 = vadd.f32 %v1374_v60, %v2952_v46  ;;  %v1379_v22 = vadd.f32 %v1375_v39, %v2954_v27 }
 0x399   : > { %v1365_v45 = vrot.slane %v1364_v15, 2  ;;  %v1377_v0 = vadd.f32 %v1373_v21, %v2956_v11 }
 0x39b   : > { %v1366_v51 = vadd.f32 %v1365_v45, %v1364_v15  ;;  %v1385_v34 = vsel %vm876_vm0, %v1378_v57, %v1377_v0 }
 0x39c   : > { %v1386_v50 = vsel %vm878_vm1, %v1379_v22, %v1385_v34 }
 0x39d   : > { %v1367_v18 = vrot.slane %v1366_v51, 1 }
 0x39f   : > { %v1368_v61 = vadd.f32 %v1367_v18, %v1366_v51 }
 0x3a1   : > { %v1372_v40 = vadd.f32 %v1368_v61, %v1152_v35 }
 0x3a3   : > { %v1376_v63 = vmul.f32 0.5, %v1372_v40 }
 0x3a5   : > { %v1380_v10 = vadd.f32 %v1376_v63, %v2958_v6 }
 0x3a7   : > { %v1387_v29 = vsel %vm880_vm2, %v1380_v10, %v1386_v50 }
 0x3a8   : > { %v1389_v4 = vsel %vm883_vm3, %v1387_v29, -inf }
 0x3a9   : > { %1390 = vmax.xlane.f32.xlu2 %v1389_v4 }
 0x41c   : > { %v1391_v33 = vpop.xlane.xlu2 %1390 }
 0x41d   : > { %v1393_v36 = vrot.slane %v1391_v33, 1  ;;  %v1394_v26 = vrot.slane %v1391_v33, 2  ;;  %v1395_v46 = vrot.slane %v1391_v33, 3  ;;  %v1400_v14 = vsub.f32 %v1377_v0, %v1391_v33 }
 0x41f   : > { %v1401_v27 = vsub.f32 %v1378_v57, %v1393_v36  ;;  %v1402_v58 = vsub.f32 %v1379_v22, %v1394_v26  ;;  %v1403_v56 = vsub.f32 %v1380_v10, %v1395_v46  ;;  %v1404_v11 = vmul.f32 1.442695, %v1400_v14  ;;  %v2200_v10 = vld [vmem:[#allocation2 + $0x18] sm:$0xff] }
 0x421   : > { %v1406_v16 = vmul.f32 1.442695, %v1401_v27  ;;  %v1408_v6 = vmul.f32 1.442695, %v1402_v58  ;;  %v1410_v41 = vmul.f32 1.442695, %v1403_v56  ;;  %2142 = vpow2.f32 %v1404_v11 }
 0x423   : > { %2144 = vpow2.f32 %v1406_v16 }
 0x424   : > { %2146 = vpow2.f32 %v1408_v6 }
 0x425   : > { %2148 = vpow2.f32 %v1410_v41 }
 0x427   : > { %v2143_v49 = vpop.eup %2142 }
 0x429   : > { %v2145_v32 = vpop.eup %2144 }
 0x42a   : > { %v2147_v38 = vpop.eup %2146  ;;  %v1416_v30 = vrot.slane %v2145_v32, 7 }
 0x42b   : > { %v2149_v37 = vpop.eup %2148  ;;  %v1418_v3 = vrot.slane %v2147_v38, 6 }
 0x42c   : > { %v1417_v44 = vsel %vm876_vm0, %v1416_v30, %v2143_v49  ;;  %v1420_v2 = vrot.slane %v2149_v37, 5 }
 0x42d   : > { %v1419_v59 = vsel %vm878_vm1, %v1418_v3, %v1417_v44 }
 0x42e   : > { %v1421_v28 = vsel %vm880_vm2, %v1420_v2, %v1419_v59 }
 0x42f   : > { %v1423_v15 = vsel %vm883_vm3, %v1421_v28, 0.0 }
 0x430   : > { %1424 = vadd.xlane.f32.xlu0 %v1423_v15 }
 0x4a3   : > { %v1425_v5 = vpop.xlane.xlu0 %1424 }
 0x4a4   : > { %2150 = vrcp.f32 %v1425_v5 }
 0x4aa   : > { %v2151_v48 = vpop.eup %2150 }
 0x4ab   : > { %v1427_v52 = vmul.f32 %v2151_v48, %v1425_v5 }
 0x4ad   : > { %v1428_v45 = vsub.f32 2.0, %v1427_v52 }
 0x4af   : > { %v1429_v8 = vmul.f32 %v2151_v48, %v1428_v45 }
 0x4b1   : > { %v1438_v19 = vmul.f32 %v2143_v49, %v1429_v8  ;;  %v1432_v53 = vrot.slane %v1429_v8, 2  ;;  %v1431_v20 = vrot.slane %v1429_v8, 1  ;;  %v1433_v40 = vrot.slane %v1429_v8, 3 }
 0x4b3   : > { %v1442_v51 = vperm.slane %v1438_v19, 0  ;;  %v1440_v47 = vmul.f32 %v2147_v38, %v1432_v53  ;;  %v1439_v35 = vmul.f32 %v2145_v32, %v1431_v20  ;;  %v1441_v63 = vmul.f32 %v2149_v37, %v1433_v40 }
 0x4b5   : > { %v1622_v18 = vmul.f32 %v3203_v43, %v1442_v51  ;;  %v1447_v60 = vmul.f32 %v3215_v55, %v1442_v51  ;;  %v1446_v39 = vmul.f32 %v3218_v23, %v1442_v51  ;;  %v1444_v61 = vperm.slane %v1440_v47, 0 }
 0x4b6   : > { %v1443_v21 = vperm.slane %v1439_v35, 0  ;;  %v1623_v0 = vmul.f32 %v3212_v31, %v1442_v51  ;;  %v1445_v43 = vperm.slane %v1441_v63, 0 }
 0x4b7   : > { %1630 = vadd.xlane.f32.xlu0 %v1622_v18  ;;  %1456 = vadd.xlane.f32.xlu2 %v1447_v60  ;;  %v1450_v57 = vmul.f32 %v3410_v42, %v1444_v61  ;;  %v1451_v23 = vmul.f32 %v3399_v13, %v1444_v61  ;;  %v1627_v31 = vmul.f32 %v3415_v62, %v1444_v61 }
 0x4b8   : > { %1454 = vadd.xlane.f32.xlu1 %v1446_v39  ;;  %v1448_v22 = vmul.f32 %v3259_v1, %v1443_v21  ;;  %v1453_v55 = vmul.f32 %v3437_v17, %v1445_v43  ;;  %v1449_v34 = vmul.f32 %v2200_v10, %v1443_v21  ;;  %v1624_v42 = vmul.f32 %v3338_v9, %v1443_v21 }
 0x4b9   : > { %v1625_v1 = vmul.f32 %v3320_v12, %v1443_v21  ;;  %v1452_v50 = vmul.f32 %v3447_v25, %v1445_v43  ;;  %v1628_v17 = vmul.f32 %v3464_v24, %v1445_v43  ;;  %v1626_v13 = vmul.f32 %v3405_v54, %v1444_v61 }
 0x4ba   : > { %v1629_v29 = vmul.f32 %v3467_v7, %v1445_v43  ;;  %v2305_v9 = vmov 0  }
 0x4bb   : > { %2064 = vset.pattern.permute.xlu0 %v2305_v9  ;;  %2063 = vset.pattern.permute.xlu2 %v2305_v9 }
 0x4bc   : > { %2065 = vset.pattern.permute.xlu1 %v2305_v9 }
 0x4bf   : > { %1462 = vadd.xlane.f32.xlu2 %v1450_v57  ;;  %1458 = vadd.xlane.f32.xlu0 %v1448_v22 }
 0x4c0   : > { %1632 = vadd.xlane.f32.xlu1 %v1623_v0 }
 0x4c7   : > { %1468 = vadd.xlane.f32.xlu2 %v1453_v55  ;;  %1464 = vadd.xlane.f32.xlu0 %v1451_v23 }
 0x4c8   : > { %1460 = vadd.xlane.f32.xlu1 %v1449_v34 }
 0x4cf   : > { %1634 = vadd.xlane.f32.xlu2 %v1624_v42  ;;  %1636 = vadd.xlane.f32.xlu0 %v1625_v1 }
 0x4d0   : > { %1466 = vadd.xlane.f32.xlu1 %v1452_v50 }
 0x4d7   : > { %1640 = vadd.xlane.f32.xlu2 %v1627_v31  ;;  %1642 = vadd.xlane.f32.xlu0 %v1628_v17 }
 0x4d8   : > { %1638 = vadd.xlane.f32.xlu1 %v1626_v13 }
 0x4e0   : > { %1644 = vadd.xlane.f32.xlu1 %v1629_v29 }
 0x52a   : > { %v1631_v12 = vpop.xlane.xlu0 %1630  ;;  %v1457_v25 = vpop.xlane.xlu2 %1456 }
 0x52b   : > { %v1662_v4 = vmul.f32 %v1631_v12, %v1631_v12  ;;  %v1487_v33 = vmul.f32 %v1457_v25, %v1457_v25  ;;  %v1455_v36 = vpop.xlane.xlu1 %1454  ;;  %v1646_v54 = vand.u32 2147483647, %v1631_v12  ;;  %v1471_v46 = vand.u32 2147483647, %v1457_v25 }
 0x52c   : > { %v1486_v62 = vmul.f32 %v1455_v36, %v1455_v36  ;;  %v1470_v7 = vand.u32 2147483647, %v1455_v36 }
 0x52d   : > { %v3497_v26 = vadd.f32 1.0, %v1662_v4  ;;  %v3499_v24 = vadd.f32 1.0, %v1487_v33  ;;  %v3506_v27 = vmul.f32 %v1646_v54, %v1631_v12  ;;  %v3508_v58 = vmul.f32 %v1471_v46, %v1457_v25 }
 0x52e   : > { %v3501_v14 = vadd.f32 1.0, %v1486_v62  ;;  %v3517_v59 = vmul.f32 %v1470_v7, %v1455_v36 }
 0x52f   : > { %2152 = vrcp.f32 %v3497_v26  ;;  %v1526_v16 = vand.u32 2147483647, %v3499_v24  ;;  %v1528_v38 = vand.u32 2147483648, %v3499_v24  ;;  %v1689_v44 = vand.u32 2147483648, %v3497_v26 }
 0x530   : > { %2154 = vrcp.f32 %v3499_v24  ;;  %v1513_v32 = vand.u32 2147483648, %v3501_v14  ;;  %v1511_v3 = vand.u32 2147483647, %v3501_v14  ;;  %vm1522_vm0 = vweird.f32 %v3499_v24 }
 0x531   : > { %2156 = vrcp.f32 %v3501_v14  ;;  %vm1507_vm1 = vweird.f32 %v3501_v14  ;;  %v1529_v20 = vor.u32 1.1754944e-38, %v1528_v38  ;;  %v1687_v51 = vand.u32 2147483647, %v3497_v26 }
 0x532   : > { %v1463_v56 = vpop.xlane.xlu2 %1462  ;;  %v1459_v11 = vpop.xlane.xlu0 %1458  ;;  %v1514_v19 = vor.u32 1.1754944e-38, %v1513_v32  ;;  %vm3536_vm2 = vcmp.eq.f32.partialorder %v1511_v3, 8.507059e+37  ;;  %vm3540_vm3 = vcmp.eq.f32.partialorder %v1526_v16, 8.507059e+37  ;;  %v3544_v35 = vor.u32 1.1754944e-38, %v1689_v44 }
 0x533   : > { %v1633_v6 = vpop.xlane.xlu1 %1632  ;;  %v1490_v41 = vmul.f32 %v1463_v56, %v1463_v56  ;;  %v1488_v49 = vmul.f32 %v1459_v11, %v1459_v11  ;;  %v1474_v37 = vand.u32 2147483647, %v1463_v56  ;;  %v1472_v15 = vand.u32 2147483647, %v1459_v11 }
 0x534   : > { %v1663_v30 = vmul.f32 %v1633_v6, %v1633_v6  ;;  %v1647_v48 = vand.u32 2147483647, %v1633_v6  ;;  %vm1683_vm10 = vweird.f32 %v3497_v26  ;;  %vm3575_vm14 = vcmp.eq.f32.partialorder %v1687_v51, 8.507059e+37 }
 0x535   : > { %v3515_v2 = vpop.eup %2152  ;;  %v3519_v28 = vadd.f32 1.0, %v1490_v41  ;;  %v3526_v45 = vadd.f32 1.0, %v1488_v49  ;;  %v3533_v47 = vmul.f32 %v1474_v37, %v1463_v56  ;;  %v3547_v61 = vmul.f32 %v1472_v15, %v1459_v11 }
 0x536   : > { %v3522_v5 = vpop.eup %2154  ;;  %v3524_v52 = vadd.f32 1.0, %v1663_v30  ;;  %v1679_v40 = vmul.f32 %v3515_v2, %v3497_v26  ;;  %v3551_v57 = vmul.f32 %v1647_v48, %v1633_v6  ;;  %vm1684_vm9 = vweird.f32 %v3515_v2 }
 0x537   : > { %v2157_v8 = vpop.eup %2156  ;;  %v1518_v53 = vmul.f32 %v3522_v5, %v3499_v24  ;;  %vm1523_vm8 = vweird.f32 %v3522_v5  ;;  %v1541_v13 = vand.u32 2147483647, %v3526_v45  ;;  %v1543_v7 = vand.u32 2147483648, %v3526_v45  ;;  %vm1685_vm5 = vmor %vm1683_vm10, %vm1684_vm9 }
 0x538   : > { %2158 = vrcp.f32 %v3524_v52  ;;  %v1503_v18 = vmul.f32 %v2157_v8, %v3501_v14  ;;  %vm1508_vm11 = vweird.f32 %v2157_v8  ;;  %v1702_v50 = vand.u32 2147483647, %v3524_v52  ;;  %vm3570_vm12 = vmor %vm1522_vm0, %vm1523_vm8 }
 0x539   : > { %2160 = vrcp.f32 %v3519_v28  ;;  %v1519_v21 = vsub.f32 1.0, %v1518_v53  ;;  %v1704_v31 = vand.u32 2147483648, %v3524_v52  ;;  %v1680_v17 = vsub.f32 1.0, %v1679_v40  ;;  %vm1509_vm15 = vmor %vm1507_vm1, %vm1508_vm11 }
 0x53a   : > { %2162 = vrcp.f32 %v3526_v45  ;;  %v1469_v22 = vpop.xlane.xlu2 %1468  ;;  %v1465_v63 = vpop.xlane.xlu0 %1464  ;;  %v1504_v0 = vsub.f32 1.0, %v1503_v18  ;;  %vm1698_vm13 = vweird.f32 %v3524_v52  ;;  %vm1537_vm7 = vweird.f32 %v3526_v45 }
 0x53b   : > { %v1477_v43 = vand.u32 2147483647, %v1469_v22  ;;  %v1493_v55 = vmul.f32 %v1469_v22, %v1469_v22  ;;  %v1461_v23 = vpop.xlane.xlu1 %1460  ;;  %v1475_v34 = vand.u32 2147483647, %v1465_v63  ;;  %v1520_v1 = vmul.f32 %v3522_v5, %v1519_v21 }
 0x53c   : > { %v1489_v10 = vmul.f32 %v1461_v23, %v1461_v23  ;;  %v1505_v42 = vmul.f32 %v2157_v8, %v1504_v0  ;;  %v1491_v12 = vmul.f32 %v1465_v63, %v1465_v63  ;;  %v1473_v46 = vand.u32 2147483647, %v1461_v23 }
 0x53d   : > { %v1521_v4 = vadd.f32 %v3522_v5, %v1520_v1  ;;  %v3581_v54 = vmul.f32 %v1477_v43, %v1469_v22  ;;  %v3591_v11 = vadd.f32 1.0, %v1493_v55  ;;  %v3593_v16 = vmul.f32 %v1475_v34, %v1465_v63 }
 0x53e   : > { %v3561_v29 = vpop.eup %2158  ;;  %v3563_v9 = vadd.f32 1.0, %v1489_v10  ;;  %v1506_v25 = vadd.f32 %v2157_v8, %v1505_v42  ;;  %v3603_v38 = vadd.f32 1.0, %v1491_v12  ;;  %v1681_v15 = vmul.f32 %v3515_v2, %v1680_v17 }
 0x53f   : > { %v3579_v62 = vpop.eup %2160  ;;  %v1694_v24 = vmul.f32 %v3561_v29, %v3524_v52  ;;  %v1525_v41 = vsel %vm3570_vm12, %v3522_v5, %v1521_v4  ;;  %vm1699_vm4 = vweird.f32 %v3561_v29  ;;  %v3615_v51 = vmul.f32 %v1473_v46, %v1461_v23 }
 0x540   : > { %v3589_v56 = vpop.eup %2162  ;;  %v1510_v6 = vsel %vm1509_vm15, %v2157_v8, %v1506_v25  ;;  %2164 = vrcp.f32 %v3563_v9  ;;  %v1530_v49 = vsel %vm3540_vm3, %v1529_v20, %v1525_v41  ;;  %v1705_v60 = vor.u32 1.1754944e-38, %v1704_v31  ;;  %vm1700_vm6 = vmor %vm1698_vm13, %vm1699_vm4 }
 0x541   : > { %v1515_v14 = vsel %vm3536_vm2, %v1514_v19, %v1510_v6  ;;  %v1695_v32 = vsub.f32 1.0, %v1694_v24  ;;  %v1531_v3 = vmul.f32 %v1530_v49, %v3508_v58  ;;  %v1533_v19 = vmul.f32 %v3589_v56, %v3526_v45 }
 0x542   : > { %v1516_v30 = vmul.f32 %v1515_v14, %v3517_v59  ;;  %v1635_v37 = vpop.xlane.xlu2 %1634  ;;  %v1637_v44 = vpop.xlane.xlu0 %1636  ;;  %v1682_v58 = vadd.f32 %v3515_v2, %v1681_v15  ;;  %2166 = vrcp.f32 %v3591_v11  ;;  %vm1703_vm0 = vcmp.eq.f32.partialorder %v1702_v50, 8.507059e+37 }
 0x543   : > { %v1648_v5 = vand.u32 2147483647, %v1635_v37  ;;  %v1664_v48 = vmul.f32 %v1635_v37, %v1635_v37  ;;  %v1467_v8 = vpop.xlane.xlu1 %1466  ;;  %1818 = vperm.xlu0 %2064, %v1531_v3   ;;  %v1649_v59 = vand.u32 2147483647, %v1637_v44  ;;  %v1696_v20 = vmul.f32 %v3561_v29, %v1695_v32 }
 0x544   : > { %1815 = vperm.xlu2 %2063, %v1516_v30   ;;  %v1492_v53 = vmul.f32 %v1467_v8, %v1467_v8  ;;  %v1665_v18 = vmul.f32 %v1637_v44, %v1637_v44  ;;  %2168 = vrcp.f32 %v3603_v38  ;;  %v1686_v40 = vsel %vm1685_vm5, %v3515_v2, %v1682_v58 }
 0x545   : > { %v3622_v39 = vadd.f32 1.0, %v1664_v48  ;;  %v1697_v21 = vadd.f32 %v3561_v29, %v1696_v20  ;;  %v1476_v63 = vand.u32 2147483647, %v1467_v8  ;;  %v1691_v26 = vsel %vm3575_vm14, %v3544_v35, %v1686_v40 }
 0x546   : > { %v3626_v22 = vpop.eup %2164  ;;  %v3628_v0 = vadd.f32 1.0, %v1492_v53  ;;  %v1534_v43 = vsub.f32 1.0, %v1533_v19  ;;  %v3637_v55 = vmul.f32 %v1648_v5, %v1635_v37  ;;  %v3639_v23 = vmul.f32 %v1649_v59, %v1637_v44 }
 0x547   : > { %v1701_v2 = vsel %vm1700_vm6, %v3561_v29, %v1697_v21  ;;  %v3644_v10 = vadd.f32 1.0, %v1665_v18  ;;  %vm1538_vm1 = vweird.f32 %v3589_v56  ;;  %2170 = vrcp.f32 %v3622_v39 }
 0x548   : > { %v1706_v34 = vsel %vm1703_vm0, %v1705_v60, %v1701_v2  ;;  %v1535_v42 = vmul.f32 %v3589_v56, %v1534_v43  ;;  %v1692_v31 = vmul.f32 %v1691_v26, %v3506_v27  ;;  %v1548_v52 = vmul.f32 %v3626_v22, %v3563_v9  ;;  %v3655_v50 = vpop.eup %2166  ;;  %vm1539_vm2 = vmor %vm1537_vm7, %vm1538_vm1 }
 0x549   : > { %v1707_v35 = vmul.f32 %v1706_v34, %v3551_v57  ;;  %v3657_v29 = vmul.f32 %v1476_v63, %v1467_v8  ;;  %2172 = vrcp.f32 %v3628_v0  ;;  %vm1542_vm3 = vcmp.eq.f32.partialorder %v1541_v13, 8.507059e+37 }
 0x54a   : > { %v3650_v1 = vpop.xlane.xlu2 %1640  ;;  %v1643_v17 = vpop.xlane.xlu0 %1642  ;;  %v1536_v57 = vadd.f32 %v3589_v56, %v1535_v42  ;;  %v1544_v33 = vor.u32 1.1754944e-38, %v1543_v7  ;;  %v1549_v36 = vsub.f32 1.0, %v1548_v52  ;;  %2174 = vrcp.f32 %v3644_v10 }
 0x54b   : > { %v1667_v12 = vmul.f32 %v3650_v1, %v3650_v1  ;;  %v3662_v25 = vpop.xlane.xlu1 %1638  ;;  %v3665_v4 = vpop.eup %2168  ;;  %1839 = vperm.xlu0 %2064, %v1692_v31   ;;  %v1652_v6 = vand.u32 2147483647, %v1643_v17  ;;  %v1668_v41 = vmul.f32 %v1643_v17, %v1643_v17  ;;  %vm1552_vm9 = vweird.f32 %v3563_v9 }
 0x54c   : > { %1842 = vperm.xlu2 %2063, %v1707_v35   ;;  %v1666_v27 = vmul.f32 %v3662_v25, %v3662_v25  ;;  %v1540_v24 = vsel %vm1539_vm2, %v3589_v56, %v1536_v57  ;;  %v1550_v13 = vmul.f32 %v3626_v22, %v1549_v36  ;;  %vm1553_vm11 = vweird.f32 %v3626_v22 }
 0x54d   : > { %v3677_v46 = vadd.f32 1.0, %v1667_v12  ;;  %v1545_v49 = vsel %vm1542_vm3, %v1544_v33, %v1540_v24  ;;  %v1556_v45 = vand.u32 2147483647, %v3563_v9  ;;  %v3688_v7 = vpop.eup %2170  ;;  %v1651_v56 = vand.u32 2147483647, %v3650_v1  ;;  %vm1554_vm8 = vmor %vm1552_vm9, %vm1553_vm11 }
 0x54e   : > { %v3681_v14 = vadd.f32 1.0, %v1666_v27  ;;  %v1546_v32 = vmul.f32 %v1545_v49, %v3547_v61  ;;  %v1650_v30 = vand.u32 2147483647, %v3662_v25  ;;  %v1558_v37 = vand.u32 2147483648, %v3563_v9 }
 0x54f   : > { %v1578_v3 = vmul.f32 %v3665_v4, %v3603_v38  ;;  %v3695_v44 = vpop.eup %2172  ;;  %2176 = vrcp.f32 %v3677_v46  ;;  %v3698_v61 = vmul.f32 %v1652_v6, %v1643_v17  ;;  %v3700_v15 = vadd.f32 1.0, %v1668_v41 }
 0x550   : > { %1821 = vperm.xlu1 %2065, %v1546_v32   ;;  %v1551_v5 = vadd.f32 %v3626_v22, %v1550_v13  ;;  %2178 = vrcp.f32 %v3681_v14  ;;  %vm1557_vm10 = vcmp.eq.f32.partialorder %v1556_v45, 8.507059e+37  ;;  %v1559_v48 = vor.u32 1.1754944e-38, %v1558_v37  ;;  %v3713_v58 = vpop.eup %2174 }
 0x551   : > { %v1579_v8 = vsub.f32 1.0, %v1578_v3  ;;  %vm1583_vm12 = vweird.f32 %v3665_v4  ;;  %v1588_v59 = vand.u32 2147483648, %v3603_v38  ;;  %v1563_v20 = vmul.f32 %v3579_v62, %v3519_v28 }
 0x552   : > { %v1555_v19 = vsel %vm1554_vm8, %v3626_v22, %v1551_v5  ;;  %v1586_v21 = vand.u32 2147483647, %v3603_v38  ;;  %2180 = vrcp.f32 %v3700_v15  ;;  %vm1582_vm13 = vweird.f32 %v3603_v38 }
 0x553   : > { %v3707_v53 = vpop.xlane.xlu1 %1644  ;;  %v1560_v18 = vsel %vm1557_vm10, %v1559_v48, %v1555_v19  ;;  %v1580_v60 = vmul.f32 %v3665_v4, %v1579_v8  ;;  %v1564_v22 = vsub.f32 1.0, %v1563_v20  ;;  %vm1567_vm14 = vweird.f32 %v3519_v28  ;;  %vm1584_vm4 = vmor %vm1582_vm13, %vm1583_vm12 }
 0x554   : > { %v1669_v9 = vmul.f32 %v3707_v53, %v3707_v53  ;;  %v1561_v40 = vmul.f32 %v1560_v18, %v3615_v51  ;;  %vm1568_vm15 = vweird.f32 %v3579_v62  ;;  %v1571_v26 = vand.u32 2147483647, %v3519_v28 }
 0x555   : > { %v1581_v63 = vadd.f32 %v3665_v4, %v1580_v60  ;;  %v3726_v43 = vpop.eup %2176  ;;  %v1589_v2 = vor.u32 1.1754944e-38, %v1588_v59  ;;  %v1565_v51 = vmul.f32 %v3579_v62, %v1564_v22  ;;  %v1573_v38 = vand.u32 2147483648, %v3519_v28  ;;  %vm1569_vm0 = vmor %vm1567_vm14, %vm1568_vm15 }
 0x556   : > { %1824 = vperm.xlu2 %2063, %v1561_v40   ;;  %v1608_v34 = vmul.f32 %v3655_v50, %v3591_v11  ;;  %v3734_v42 = vpop.eup %2178  ;;  %v3736_v35 = vadd.f32 1.0, %v1669_v9  ;;  %vm1587_vm7 = vcmp.eq.f32.partialorder %v1586_v21, 8.507059e+37  ;;  %vm1612_vm5 = vweird.f32 %v3591_v11 }
 0x557   : > { %v1585_v31 = vsel %vm1584_vm4, %v3665_v4, %v1581_v63  ;;  %v1566_v52 = vadd.f32 %v3579_v62, %v1565_v51  ;;  %vm1572_vm6 = vcmp.eq.f32.partialorder %v1571_v26, 8.507059e+37  ;;  %v1574_v27 = vor.u32 1.1754944e-38, %v1573_v38 }
 0x558   : > { %v1590_v17 = vsel %vm1587_vm7, %v1589_v2, %v1585_v31  ;;  %v1609_v12 = vsub.f32 1.0, %v1608_v34  ;;  %v1618_v33 = vand.u32 2147483648, %v3591_v11  ;;  %v1724_v4 = vmul.f32 %v3713_v58, %v3644_v10  ;;  %v3749_v36 = vpop.eup %2180 }
 0x559   : > { %v1591_v57 = vmul.f32 %v1590_v17, %v3593_v16  ;;  %v1570_v24 = vsel %vm1569_vm0, %v3579_v62, %v1566_v52  ;;  %vm1613_vm1 = vweird.f32 %v3655_v50  ;;  %v1616_v16 = vand.u32 2147483647, %v3591_v11 }
 0x55a   : > { %v1610_v6 = vmul.f32 %v3655_v50, %v1609_v12  ;;  %2182 = vrcp.f32 %v3736_v35  ;;  %v1575_v28 = vsel %vm1572_vm6, %v1574_v27, %v1570_v24  ;;  %v1725_v41 = vsub.f32 1.0, %v1724_v4  ;;  %vm1614_vm3 = vmor %vm1612_vm5, %vm1613_vm1 }
 0x55b   : > { %1830 = vperm.xlu1 %2065, %v1591_v57   ;;  %vm1728_vm2 = vweird.f32 %v3644_v10  ;;  %v1576_v49 = vmul.f32 %v1575_v28, %v3533_v47  ;;  %v1732_v13 = vand.u32 2147483647, %v3644_v10  ;;  %v1734_v62 = vand.u32 2147483648, %v3644_v10 }
 0x55c   : > { %v1611_v32 = vadd.f32 %v3655_v50, %v1610_v6  ;;  %v1619_v45 = vor.u32 1.1754944e-38, %v1618_v33  ;;  %v1726_v37 = vmul.f32 %v3713_v58, %v1725_v41  ;;  %vm1729_vm9 = vweird.f32 %v3713_v58 }
 0x55d   : > { %v1593_v3 = vmul.f32 %v3695_v44, %v3628_v0  ;;  %vm1617_vm11 = vcmp.eq.f32.partialorder %v1616_v16, 8.507059e+37  ;;  %vm1597_vm8 = vweird.f32 %v3628_v0  ;;  %v1601_v5 = vand.u32 2147483647, %v3628_v0  ;;  %vm1730_vm12 = vmor %vm1728_vm2, %vm1729_vm9 }
 0x55e   : > { %1827 = vperm.xlu2 %2063, %v1576_v49   ;;  %v1615_v47 = vsel %vm1614_vm3, %v3655_v50, %v1611_v32  ;;  %v1727_v11 = vadd.f32 %v3713_v58, %v1726_v37  ;;  %vm1598_vm10 = vweird.f32 %v3695_v44  ;;  %vm1733_vm13 = vcmp.eq.f32.partialorder %v1732_v13, 8.507059e+37 }
 0x55f   : > { %v1620_v48 = vsel %vm1617_vm11, %v1619_v45, %v1615_v47  ;;  %v1594_v8 = vsub.f32 1.0, %v1593_v3  ;;  %v1735_v19 = vor.u32 1.1754944e-38, %v1734_v62  ;;  %v1603_v59 = vand.u32 2147483648, %v3628_v0  ;;  %vm1599_vm4 = vmor %vm1597_vm8, %vm1598_vm10 }
 0x560   : > { %v1709_v50 = vmul.f32 %v3688_v7, %v3622_v39  ;;  %v3777_v20 = vpop.eup %2182  ;;  %v1621_v18 = vmul.f32 %v1620_v48, %v3581_v54  ;;  %v1731_v9 = vsel %vm1730_vm12, %v3713_v58, %v1727_v11  ;;  %vm3782_vm14 = vcmp.eq.f32.partialorder %v1601_v5, 8.507059e+37 }
 0x561   : > { %v1595_v60 = vmul.f32 %v3695_v44, %v1594_v8  ;;  %v1736_v10 = vsel %vm1733_vm13, %v1735_v19, %v1731_v9  ;;  %v1717_v22 = vand.u32 2147483647, %v3622_v39  ;;  %v1719_v63 = vand.u32 2147483648, %v3622_v39 }
 0x562   : > { %v1710_v40 = vsub.f32 1.0, %v1709_v50  ;;  %v1737_v26 = vmul.f32 %v1736_v10, %v3639_v23  ;;  %vm1713_vm15 = vweird.f32 %v3622_v39  ;;  %v1769_v54 = vmul.f32 %v3749_v36, %v3700_v15 }
 0x563   : > { %1836 = vperm.xlu1 %2065, %v1621_v18   ;;  %v1596_v2 = vadd.f32 %v3695_v44, %v1595_v60  ;;  %v1604_v58 = vor.u32 1.1754944e-38, %v1603_v59  ;;  %vm1714_vm7 = vweird.f32 %v3688_v7  ;;  %vm1773_vm5 = vweird.f32 %v3700_v15 }
 0x564   : > { %v1711_v51 = vmul.f32 %v3688_v7, %v1710_v40  ;;  %1848 = vperm.xlu0 %2064, %v1737_v26   ;;  %vm3801_vm6 = vcmp.eq.f32.partialorder %v1717_v22, 8.507059e+37  ;;  %v1770_v34 = vsub.f32 1.0, %v1769_v54  ;;  %v1779_v31 = vand.u32 2147483648, %v3700_v15  ;;  %vm1715_vm0 = vmor %vm1713_vm15, %vm1714_vm7 }
 0x565   : > { %v1600_v23 = vsel %vm1599_vm4, %v3695_v44, %v1596_v2  ;;  %v1720_v52 = vor.u32 1.1754944e-38, %v1719_v63  ;;  %v1739_v12 = vmul.f32 %v3734_v42, %v3681_v14  ;;  %vm1774_vm1 = vweird.f32 %v3749_v36 }
 0x566   : > { %v1605_v0 = vsel %vm3782_vm14, %v1604_v58, %v1600_v23  ;;  %v1712_v17 = vadd.f32 %v3688_v7, %v1711_v51  ;;  %v1771_v44 = vmul.f32 %v3749_v36, %v1770_v34  ;;  %v1777_v27 = vand.u32 2147483647, %v3700_v15  ;;  %vm1775_vm3 = vmor %vm1773_vm5, %vm1774_vm1 }
 0x567   : > { %v1606_v57 = vmul.f32 %v1605_v0, %v3657_v29  ;;  %v1780_v4 = vor.u32 1.1754944e-38, %v1779_v31  ;;  %v1740_v24 = vsub.f32 1.0, %v1739_v12  ;;  %vm1743_vm2 = vweird.f32 %v3681_v14 }
 0x568   : > { %v1716_v33 = vsel %vm1715_vm0, %v3688_v7, %v1712_v17  ;;  %v1772_v29 = vadd.f32 %v3749_v36, %v1771_v44  ;;  %v1749_v39 = vand.u32 2147483648, %v3681_v14  ;;  %v1754_v16 = vmul.f32 %v3726_v43, %v3677_v46 }
 0x569   : > { %1833 = vperm.xlu2 %2063, %v1606_v57   ;;  %v1721_v6 = vsel %vm3801_vm6, %v1720_v52, %v1716_v33  ;;  %v1741_v7 = vmul.f32 %v3734_v42, %v1740_v24  ;;  %vm1744_vm9 = vweird.f32 %v3734_v42  ;;  %v1747_v41 = vand.u32 2147483647, %v3681_v14 }
 0x56a   : > { %v1722_v28 = vmul.f32 %v1721_v6, %v3637_v55  ;;  %v1776_v49 = vsel %vm1775_vm3, %v3749_v36, %v1772_v29  ;;  %vm1778_vm11 = vcmp.eq.f32.partialorder %v1777_v27, 8.507059e+37  ;;  %v1750_v32 = vor.u32 1.1754944e-38, %v1749_v39  ;;  %vm1745_vm8 = vmor %vm1743_vm2, %vm1744_vm9 }
 0x56b   : > { %v1755_v13 = vsub.f32 1.0, %v1754_v16  ;;  %v1781_v62 = vsel %vm1778_vm11, %v1780_v4, %v1776_v49  ;;  %v1742_v45 = vadd.f32 %v3734_v42, %v1741_v7  ;;  %v1762_v55 = vand.u32 2147483647, %v3677_v46 }
 0x56c   : > { %1845 = vperm.xlu1 %2065, %v1722_v28   ;;  %v1764_v15 = vand.u32 2147483648, %v3677_v46  ;;  %v1782_v37 = vmul.f32 %v1781_v62, %v3698_v61  ;;  %vm1759_vm10 = vweird.f32 %v3726_v43  ;;  %v1784_v36 = vmul.f32 %v3777_v20, %v3736_v35 }
 0x56d   : > { %v1756_v3 = vmul.f32 %v3726_v43, %v1755_v13  ;;  %v1659_v47 = vmul.f32 %v1651_v56, %v3650_v1  ;;  %v1658_v5 = vmul.f32 %v1650_v30, %v3662_v25  ;;  %v1746_v61 = vsel %vm1745_vm8, %v3734_v42, %v1742_v45 }
 0x56e   : > { %vm1748_vm12 = vcmp.eq.f32.partialorder %v1747_v41, 8.507059e+37  ;;  %1857 = vperm.xlu0 %2064, %v1782_v37   ;;  %vm1758_vm13 = vweird.f32 %v3677_v46  ;;  %v1785_v11 = vsub.f32 1.0, %v1784_v36  ;;  %vm1763_vm15 = vcmp.eq.f32.partialorder %v1762_v55, 8.507059e+37 }
 0x56f   : > { %v1751_v14 = vsel %vm1748_vm12, %v1750_v32, %v1746_v61  ;;  %v1757_v48 = vadd.f32 %v3726_v43, %v1756_v3  ;;  %vm1760_vm14 = vmor %vm1758_vm13, %vm1759_vm10  ;;  %v1765_v19 = vor.u32 1.1754944e-38, %v1764_v15  ;;  %v1794_v1 = vand.u32 2147483648, %v3736_v35 }
 0x570   : > { %v1752_v8 = vmul.f32 %v1751_v14, %v1658_v5  ;;  %v1786_v25 = vmul.f32 %v3777_v20, %v1785_v11  ;;  %vm1789_vm4 = vweird.f32 %v3777_v20  ;;  %v1792_v30 = vand.u32 2147483647, %v3736_v35 }
 0x571   : > { %v1761_v56 = vsel %vm1760_vm14, %v3726_v43, %v1757_v48  ;;  %v1653_v42 = vand.u32 2147483647, %v3707_v53  ;;  %vm1788_vm7 = vweird.f32 %v3736_v35  ;;  %v1795_v18 = vor.u32 1.1754944e-38, %v1794_v1 }
 0x572   : > { %1851 = vperm.xlu2 %2063, %v1752_v8   ;;  %v1766_v59 = vsel %vm1763_vm15, %v1765_v19, %v1761_v56  ;;  %v1787_v50 = vadd.f32 %v3777_v20, %v1786_v25  ;;  %vm1790_vm5 = vmor %vm1788_vm7, %vm1789_vm4  ;;  %vm1793_vm6 = vcmp.eq.f32.partialorder %v1792_v30, 8.507059e+37  ;;  %v1862_v63 = vlaneseq }
 0x573   : > { %v1767_v46 = vmul.f32 %v1766_v59, %v1659_v47  ;;  %v1661_v9 = vmul.f32 %v1653_v42, %v3707_v53  ;;  %vm1867_vm0 = vcmask 130112   ;;  %vm1871_vm1 = vcmask 195712  }
 0x574   : > { %v1791_v43 = vsel %vm1790_vm5, %v3777_v20, %v1787_v50  ;;  %v1863_v2 = vand.u32 127, %v1862_v63  ;;  %vm1875_vm2 = vcmask 261312   ;;  %vm1879_vm3 = vcmask 326912  }
 0x575   : > { %1854 = vperm.xlu1 %2065, %v1767_v46   ;;  %v1796_v60 = vsel %vm1793_vm6, %v1795_v18, %v1791_v43  ;;  %vm1883_vm9 = vcmask 392512   ;;  %vm1887_vm11 = vcmask 458112   ;;  %vm1891_vm8 = vcmask 523712  }
 0x576   : > { %v1797_v21 = vmul.f32 %v1796_v60, %v1661_v9  ;;  %v1865_v54 = vadd.s32 4294967288, %v1863_v2  ;;  %v1869_v51 = vadd.s32 4294967280, %v1863_v2  ;;  %v1873_v31 = vadd.s32 4294967272, %v1863_v2 }
 0x577   : > { %v1881_v0 = vadd.s32 4294967256, %v1863_v2  ;;  %v1877_v17 = vadd.s32 4294967264, %v1863_v2  ;;  %v1889_v4 = vadd.s32 4294967240, %v1863_v2  ;;  %v1885_v6 = vadd.s32 4294967248, %v1863_v2 }
 0x578   : > { %v1893_v41 = vadd.s32 4294967232, %v1863_v2  ;;  %v1901_v32 = vadd.s32 4294967216, %v1863_v2  ;;  %v1897_v13 = vadd.s32 4294967224, %v1863_v2  ;;  %vm1895_vm10 = vcmask 589312  }
 0x579   : > { %vm1899_vm12 = vcmask 654912   ;;  %v1905_v5 = vadd.s32 4294967208, %v1863_v2  ;;  %vm1903_vm13 = vcmask 720512   ;;  %v1909_v14 = vadd.s32 4294967200, %v1863_v2 }
 0x57a   : > { %1860 = vperm.xlu2 %2063, %v1797_v21   ;;  %vm1907_vm14 = vcmask 786112   ;;  %v1913_v8 = vadd.s32 4294967192, %v1863_v2  ;;  %v1917_v19 = vadd.s32 4294967184, %v1863_v2  ;;  %v1921_v1 = vadd.s32 4294967176, %v1863_v2 }
 0x57b   : > { %vm1911_vm15 = vcmask 851712   ;;  %vm1915_vm4 = vcmask 917312   ;;  %vm1919_vm7 = vcmask 982912   ;;  %vm1923_vm5 = vcmask 1048512  }
 0x59e   : > { %v1816_v10 = vpop.permute.xlu2 %1815 }
 0x59f   : > { %v1864_v34 = vperm.slane %v1816_v10, %v1863_v2 }
 0x5a6   : > { %v1843_v40 = vpop.permute.xlu2 %1842 }
 0x5a7   : > { %v1898_v47 = vperm.slane %v1843_v40, %v1897_v13 }
 0x5b0   : > { %v1825_v22 = vpop.permute.xlu2 %1824 }
 0x5b1   : > { %v1874_v12 = vperm.slane %v1825_v22, %v1873_v31 }
 0x5b5   : > { %v1819_v35 = vpop.permute.xlu0 %1818 }
 0x5b6   : > { %v1866_v23 = vperm.slane %v1819_v35, %v1865_v54 }
 0x5b8   : > { %v1828_v58 = vpop.permute.xlu2 %1827  ;;  %v1868_v53 = vsel %vm1867_vm0, %v1866_v23, %v1864_v34 }
 0x5b9   : > { %v1878_v24 = vperm.slane %v1828_v58, %v1877_v17 }
 0x5bd   : > { %v1840_v27 = vpop.permute.xlu0 %1839 }
 0x5be   : > { %v1894_v55 = vperm.slane %v1840_v27, %v1893_v41 }
 0x5c2   : > { %v1822_v26 = vpop.permute.xlu1 %1821 }
 0x5c3   : > { %v1870_v38 = vperm.slane %v1822_v26, %v1869_v51  ;;  %v1834_v57 = vpop.permute.xlu2 %1833 }
 0x5c4   : > { %v1886_v7 = vperm.slane %v1834_v57, %v1885_v6 }
 0x5c5   : > { %v1872_v52 = vsel %vm1871_vm1, %v1870_v38, %v1868_v53 }
 0x5c6   : > { %v1876_v44 = vsel %vm1875_vm2, %v1874_v12, %v1872_v52 }
 0x5c7   : > { %v1880_v39 = vsel %vm1879_vm3, %v1878_v24, %v1876_v44 }
 0x5cc   : > { %v1852_v15 = vpop.permute.xlu2 %1851 }
 0x5cd   : > { %v1831_v20 = vpop.permute.xlu1 %1830  ;;  %v1910_v30 = vperm.slane %v1852_v15, %v1909_v14 }
 0x5ce   : > { %v1882_v33 = vperm.slane %v1831_v20, %v1881_v0 }
 0x5d0   : > { %v1884_v16 = vsel %vm1883_vm9, %v1882_v33, %v1880_v39 }
 0x5d1   : > { %v1888_v49 = vsel %vm1887_vm11, %v1886_v7, %v1884_v16 }
 0x5d4   : > { %v1861_v42 = vpop.permute.xlu2 %1860 }
 0x5d5   : > { %v1837_v29 = vpop.permute.xlu1 %1836  ;;  %v1922_v43 = vperm.slane %v1861_v42, %v1921_v1 }
 0x5d6   : > { %v1890_v28 = vperm.slane %v1837_v29, %v1889_v4  ;;  %v1849_v45 = vpop.permute.xlu0 %1848 }
 0x5d7   : > { %v1906_v11 = vperm.slane %v1849_v45, %v1905_v5 }
 0x5d8   : > { %v1892_v62 = vsel %vm1891_vm8, %v1890_v28, %v1888_v49 }
 0x5d9   : > { %v1896_v3 = vsel %vm1895_vm10, %v1894_v55, %v1892_v62 }
 0x5da   : > { %v1900_v61 = vsel %vm1899_vm12, %v1898_v47, %v1896_v3 }
 0x5de   : > { %v1846_v37 = vpop.permute.xlu1 %1845 }
 0x5df   : > { %v1902_v36 = vperm.slane %v1846_v37, %v1901_v32 }
 0x5e0   : > { %v1858_v25 = vpop.permute.xlu0 %1857 }
 0x5e1   : > { %v1904_v48 = vsel %vm1903_vm13, %v1902_v36, %v1900_v61  ;;  %v1918_v50 = vperm.slane %v1858_v25, %v1917_v19 }
 0x5e2   : > { %v1908_v56 = vsel %vm1907_vm14, %v1906_v11, %v1904_v48 }
 0x5e3   : > { %v1912_v18 = vsel %vm1911_vm15, %v1910_v30, %v1908_v56 }
 0x5e7   : > { %v1855_v59 = vpop.permute.xlu1 %1854 }
 0x5e8   : > { %v1914_v46 = vperm.slane %v1855_v59, %v1913_v8 }
 0x5ea   : > { %v1916_v9 = vsel %vm1915_vm4, %v1914_v46, %v1912_v18 }
 0x5eb   : > { %v1920_v60 = vsel %vm1919_vm7, %v1918_v50, %v1916_v9 }
 0x5ec   : > { %v1924_v21 = vsel %vm1923_vm5, %v1922_v43, %v1920_v60 }
 0x5ed   : > { %1926 = vst [vmem:[%s3879_s2] sm:$0x1] %v1924_v21 }
 0x5ee PF: > { %p13_p3 = scmp.ge.s32.totalorder %s2357_s22, 4   ;;  %s3967_s9 = smov %s2291_s10 }
 0x5ef   : > { %s3968_s10 = smov %s2295_s11  ;;  %s3969_s11 = smov %s2367_s25 }
 0x5f0   : > { %s3970_s12 = smov %s2357_s22  ;;  %15 = sbr.rel (!%p13_p3) target bundleno = 4 (0x4), region = 108 }
 0x5f5   :  { %1938 = vsyncpa [#allocation4], 1 }
 0x5f6   :  { %1940 = vsyncpa [#allocation4 + $0x1], 1 }
 0x5f7   :  { %1941 = vsyncpa [#allocation6], 1 }

</bundles_post_ra>
